<compile_context>
chip_gen: v5e
topology: v5e:2x2
jax: 0.10.0
libtpu: 0.0.40
codegen_flags: <defaults>
</compile_context>

<pallas_src>
import jax
import jax.numpy as jnp
from jax import lax
from jax.experimental import pallas as pl
from jax.experimental.pallas import tpu as pltpu

# ---------------- model hyper-parameters (defaults of TransformerNet) -------------
P_ROWS = 16          # p_rows
P_COLS = 8           # p_cols  -> sequence length S of the transformer
D_MODEL = 128
NHEAD = 8
HEAD_DIM = D_MODEL // NHEAD
NUM_LAYERS = 4
DIM_FF = 256
LN_EPS = 1e-5        # PyTorch nn.LayerNorm default
SCALE = 1.0 / (HEAD_DIM ** 0.5)   # 0.25 (power of two -> exact fold into bf16 Wq)
OUT_PAD = 128        # lane-dense output block width (real output is column 0)
ATTN_SUB = 128       # attention sub-tile rows (scores stay <= [128,128])

# Matmul operand dtype.  bf16 is MXU-native on v5e/v6e/v7x; all elementwise math
# (bias adds, LayerNorm, softmax, residuals) stays f32 via preferred_element_type.
COMPUTE_DTYPE = jnp.bfloat16

NT_DIMS = (((1,), (1,)), ((), ()))   # 2-D A @ B^T without an explicit transpose


def _default_bt():
    """Batch-tile size: rows = bt * P_COLS fed to the MXU per grid step."""
    try:
        kind = jax.devices()[0].device_kind.lower()
    except Exception:  # pragma: no cover - conservative fallback
        return 16
    # v6e / v7x have a 256-deep MXU: rows=256 (attention stays sub-tiled at 128).
    if "v6" in kind or "v7" in kind or "7x" in kind:
        return 32
    return 16          # v5e: rows=128 exactly matches the 128-wide MXU


# ---------------------------- fused Pallas kernel ----------------------------------
def _layer_norm(x, gamma, beta):
    mu = jnp.mean(x, axis=-1, keepdims=True)
    xc = x - mu
    var = jnp.mean(xc * xc, axis=-1, keepdims=True)
    return xc * lax.rsqrt(var + LN_EPS) * gamma + beta


def fused_net_kernel(pT_ref, sc_ref, bias_ref, *refs):
    """Embed + NUM_LAYERS post-norm encoder layers + head for one batch tile."""
    out_ref = refs[-1]
    (emb_w, emb_b,
     wqkv_r, bqkv_r, wo_r, vecs_r, w1_r, b1_r, w2_r,
     sc_w, sc_b, fc1_w, fc1_b, fc2_w, fc2_b) = refs[:-1]

    rows = pT_ref.shape[0]            # bt * P_COLS
    bt = sc_ref.shape[0]
    sub = bias_ref.shape[0]           # attention sub-tile rows
    n_sub = rows // sub
    cd = COMPUTE_DTYPE

    # Host-built additive block-diagonal mask (0 inside a batch element,
    # -1e30 across batch elements); identical for every sub-tile / layer / head.
    attn_bias = bias_ref[...]                                            # f32

    # ---- column embedding: [rows, P_ROWS] @ [P_ROWS, D] --------------------------
    tok = (jnp.dot(pT_ref[...].astype(cd), emb_w[...],
                   preferred_element_type=jnp.float32) + emb_b[...])     # [rows, D]

    # ---- transformer encoder layers (post-norm, ReLU FFN, eval-mode dropout) -----
    def layer_body(li, tok):
        wqkv = wqkv_r[li]         # [D, 3D] bf16 (Q columns pre-scaled by 1/sqrt(hd))
        bqkv = bqkv_r[li]         # [1, 3D] f32  (Q part pre-scaled)
        wo = wo_r[li]             # [D, D]  bf16
        vecs = vecs_r[li]         # [6, D]  f32: bo, g1, be1, b2, g2, be2
        w1 = w1_r[li]             # [D, FF] bf16
        b1 = b1_r[li]             # [1, FF] f32
        w2 = w2_r[li]             # [FF, D] bf16

        bo = vecs[0:1, :]
        g1 = vecs[1:2, :]
        be1 = vecs[2:3, :]
        b2 = vecs[3:4, :]
        g2 = vecs[4:5, :]
        be2 = vecs[5:6, :]

        qkv = jnp.dot(tok.astype(cd), wqkv,
                      preferred_element_type=jnp.float32) + bqkv         # [rows, 3D]
        qkv_c = qkv.astype(cd)                                           # cast once

        attn_parts = []
        for s_i in range(n_sub):                  # static: 128-row attention sub-tiles
            r0 = s_i * sub
            ctx_heads = []
            for h in range(NHEAD):                # static head unroll
                c0 = h * HEAD_DIM
                qh = qkv_c[r0:r0 + sub, c0:c0 + HEAD_DIM]
                kh = qkv_c[r0:r0 + sub, D_MODEL + c0:D_MODEL + c0 + HEAD_DIM]
                vh = qkv_c[r0:r0 + sub, 2 * D_MODEL + c0:2 * D_MODEL + c0 + HEAD_DIM]
                # dense scores for the sub-tile; cross-batch entries masked off (f32)
                s = lax.dot_general(qh, kh, NT_DIMS,
                                    preferred_element_type=jnp.float32)  # [sub, sub]
                s = s + attn_bias
                s = s - jnp.max(s, axis=-1, keepdims=True)
                p = jnp.exp(s)                                           # masked -> 0
                inv = pl.reciprocal(jnp.sum(p, axis=-1, keepdims=True), approx=True)
                ctx = jnp.dot(p.astype(cd), vh,
                              preferred_element_type=jnp.float32) * inv  # [sub, hd]
                ctx_heads.append(ctx.astype(cd))
            # concat heads -> single K=128 output projection matmul
            ctx_full = jnp.concatenate(ctx_heads, axis=-1)               # [sub, D]
            attn_parts.append(jnp.dot(ctx_full, wo,
                                      preferred_element_type=jnp.float32))
        attn = attn_parts[0] if n_sub == 1 else jnp.concatenate(attn_parts, axis=0)
        attn = attn + bo

        tok = _layer_norm(tok + attn, g1, be1)

        h1 = jnp.maximum(jnp.dot(tok.astype(cd), w1,
                                 preferred_element_type=jnp.float32) + b1, 0.0)
        h2 = jnp.dot(h1.astype(cd), w2, preferred_element_type=jnp.float32) + b2
        return _layer_norm(tok + h2, g2, be2)

    tok = lax.fori_loop(0, NUM_LAYERS, layer_body, tok)                  # bounded live ranges

    # ---- head: mean-pool + scalar_fc + fc1/relu + fc2 (lane-dense output) --------
    col_repr = jnp.mean(tok.reshape(bt, P_COLS, D_MODEL), axis=1)        # [bt, D]
    scalar_repr = (jnp.dot(sc_ref[...].astype(cd), sc_w[...],
                           preferred_element_type=jnp.float32) + sc_b[...])
    fc1 = fc1_w[...]                                                     # [2D, 2D]
    # concat([col_repr, scalar_repr]) @ fc1  ==  split-row sum (no lane concat)
    hid = (jnp.dot(col_repr.astype(cd), fc1[:D_MODEL, :],
                   preferred_element_type=jnp.float32)
           + jnp.dot(scalar_repr.astype(cd), fc1[D_MODEL:, :],
                     preferred_element_type=jnp.float32)
           + fc1_b[...])
    hid = jnp.maximum(hid, 0.0)
    out_ref[...] = (jnp.dot(hid.astype(cd), fc2_w[...],
                            preferred_element_type=jnp.float32) + fc2_b[...])


# ------------------------------ wrapper / packing ----------------------------------
def _round_up(n, m):
    return ((n + m - 1) // m) * m


def _resident_spec(a):
    nd = a.ndim
    return pl.BlockSpec(a.shape, lambda i, _n=nd: (0,) * _n)   # constant -> resident


def pack_params(params):
    """One-time host-side transform: transpose weights, fold SCALE, stack layers."""
    cd = COMPUTE_DTYPE

    def wt(a):   # matmul RHS weight, pre-transposed, compute dtype
        return a.T.astype(cd)

    def bv(a):   # bias / LN parameter as [1, N] f32
        return a.reshape(1, -1).astype(jnp.float32)

    wqkv_l, bqkv_l, wo_l, vecs_l, w1_l, b1_l, w2_l = [], [], [], [], [], [], []
    for lp in params["layers"]:
        (wqkv, bqkv, wo, bo, g1, be1, w1, b1, w2, b2, g2, be2) = lp
        wq_t = wqkv.T.astype(jnp.float32)                                # [D, 3D]
        wq_t = jnp.concatenate([wq_t[:, :D_MODEL] * SCALE, wq_t[:, D_MODEL:]], axis=1)
        bq = jnp.concatenate([bqkv[:D_MODEL] * SCALE, bqkv[D_MODEL:]])
        wqkv_l.append(wq_t.astype(cd))
        bqkv_l.append(bq.reshape(1, -1).astype(jnp.float32))
        wo_l.append(wt(wo))
        vecs_l.append(jnp.stack([bo, g1, be1, b2, g2, be2]).astype(jnp.float32))
        w1_l.append(wt(w1))
        b1_l.append(bv(b1))
        w2_l.append(wt(w2))

    fc2_t = jnp.pad(params["fc2_w"].T, ((0, 0), (0, OUT_PAD - 1))).astype(cd)
    fc2_b = jnp.pad(params["fc2_b"].reshape(1, -1),
                    ((0, 0), (0, OUT_PAD - 1))).astype(jnp.float32)

    return (wt(params["emb_w"]), bv(params["emb_b"]),
            jnp.stack(wqkv_l), jnp.stack(bqkv_l), jnp.stack(wo_l),
            jnp.stack(vecs_l), jnp.stack(w1_l), jnp.stack(b1_l), jnp.stack(w2_l),
            wt(params["sc_w"]), bv(params["sc_b"]),
            wt(params["fc1_w"]), bv(params["fc1_b"]),
            fc2_t, fc2_b)


def transformer_net_forward(x, params, bt=None):
    B = x.shape[0]
    scalars = x[:, :3]
    P = x[:, 3:].reshape(B, P_ROWS, P_COLS)
    # flatten to [B*S, P_ROWS] on the host so the embed consumes the block directly
    tokens = jnp.transpose(P, (0, 2, 1)).reshape(B * P_COLS, P_ROWS)

    if bt is None:
        bt = min(_default_bt(), _round_up(B, 8))
    Bp = _round_up(B, bt)
    if Bp != B:
        tokens = jnp.pad(tokens, ((0, (Bp - B) * P_COLS), (0, 0)))
        scalars = jnp.pad(scalars, ((0, Bp - B), (0, 0)))

    rows = bt * P_COLS
    sub = min(rows, ATTN_SUB)
    # host-built additive block-diagonal mask for one attention sub-tile
    r_id = jnp.arange(sub) // P_COLS
    attn_bias = jnp.where(r_id[:, None] == r_id[None, :], 0.0, -1e30).astype(jnp.float32)

    flat_w = pack_params(params)                             # one-time layout change

    in_specs = ([pl.BlockSpec((rows, P_ROWS), lambda i: (i, 0)),
                 pl.BlockSpec((bt, 3), lambda i: (i, 0)),
                 _resident_spec(attn_bias)]
                + [_resident_spec(a) for a in flat_w])

    out = pl.pallas_call(
        fused_net_kernel,
        out_shape=jax.ShapeDtypeStruct((Bp, OUT_PAD), jnp.float32),
        grid=(Bp // bt,),
        in_specs=in_specs,
        out_specs=pl.BlockSpec((bt, OUT_PAD), lambda i: (i, 0)),
        compiler_params=pltpu.CompilerParams(
            dimension_semantics=("parallel",)),              # batch tiles are independent
    )(tokens, scalars, attn_bias, *flat_w)

    return out[:B, :1]                                       # drop lane + batch padding


# ------------------------------ deterministic init ---------------------------------
def init_params(key):
    keys = iter(jax.random.split(key, 64))

    def w(shape, scale=0.05):
        return scale * jax.random.normal(next(keys), shape, dtype=jnp.float32)

    def b(shape):
        return 0.01 * jax.random.normal(next(keys), shape, dtype=jnp.float32)

    params = {
        "emb_w": w((D_MODEL, P_ROWS)), "emb_b": b((D_MODEL,)),          # col_embedding
        "sc_w": w((D_MODEL, 3)),       "sc_b": b((D_MODEL,)),           # scalar_fc
        "fc1_w": w((2 * D_MODEL, 2 * D_MODEL)), "fc1_b": b((2 * D_MODEL,)),
        "fc2_w": w((1, 2 * D_MODEL)),           "fc2_b": b((1,)),
        "layers": [],
    }
    for _ in range(NUM_LAYERS):
        params["layers"].append((
            w((3 * D_MODEL, D_MODEL)), b((3 * D_MODEL,)),               # in_proj (qkv)
            w((D_MODEL, D_MODEL)),     b((D_MODEL,)),                   # out_proj
            jnp.ones((D_MODEL,), jnp.float32), jnp.zeros((D_MODEL,), jnp.float32),  # norm1
            w((DIM_FF, D_MODEL)),      b((DIM_FF,)),                    # linear1
            w((D_MODEL, DIM_FF)),      b((D_MODEL,)),                   # linear2
            jnp.ones((D_MODEL,), jnp.float32), jnp.zeros((D_MODEL,), jnp.float32),  # norm2
        ))
    return params


# ---------------------------------- main --------------------------------------------
if __name__ == "__main__":
    key = jax.random.PRNGKey(0)
    kx, kp = jax.random.split(key)

    B = 2
    total_features = 3 + P_ROWS * P_COLS          # 3 + 16*8 = 131
    x = jax.random.normal(kx, (B, total_features), dtype=jnp.float32)
    params = init_params(kp)

    fwd = jax.jit(transformer_net_forward)
    out = fwd(x, params)
    out = jax.block_until_ready(out)

    assert out.shape == (B, 1), out.shape
    assert bool(jnp.all(jnp.isfinite(out)))
    print("KERNEL_OK")
</pallas_src>

<mosaic_0001>
module attributes {stable_mosaic.version = 11 : i64} {
  func.func @fused_net_kernel(%arg0: i32, %arg1: memref<64x16xf32, #tpu.memory_space<vmem>>, %arg2: memref<8x3xf32, #tpu.memory_space<vmem>>, %arg3: memref<64x64xf32, #tpu.memory_space<vmem>>, %arg4: memref<16x128xbf16, #tpu.memory_space<vmem>>, %arg5: memref<1x128xf32, #tpu.memory_space<vmem>>, %arg6: memref<4x128x384xbf16, #tpu.memory_space<vmem>>, %arg7: memref<4x1x384xf32, #tpu.memory_space<vmem>>, %arg8: memref<4x128x128xbf16, #tpu.memory_space<vmem>>, %arg9: memref<4x6x128xf32, #tpu.memory_space<vmem>>, %arg10: memref<4x128x256xbf16, #tpu.memory_space<vmem>>, %arg11: memref<4x1x256xf32, #tpu.memory_space<vmem>>, %arg12: memref<4x256x128xbf16, #tpu.memory_space<vmem>>, %arg13: memref<3x128xbf16, #tpu.memory_space<vmem>>, %arg14: memref<1x128xf32, #tpu.memory_space<vmem>>, %arg15: memref<256x256xbf16, #tpu.memory_space<vmem>>, %arg16: memref<1x256xf32, #tpu.memory_space<vmem>>, %arg17: memref<256x128xbf16, #tpu.memory_space<vmem>>, %arg18: memref<1x128xf32, #tpu.memory_space<vmem>>, %arg19: memref<8x128xf32, #tpu.memory_space<vmem>>) attributes {dimension_semantics = [#tpu.dimension_semantics<parallel>], iteration_bounds = array<i64: 1>, scalar_prefetch = 0 : i64, scratch_operands = 0 : i64, tpu.core_type = #tpu.core_type<tc>, window_params = [{transform_indices = @transform_0, window_bounds = array<i64: 64, 16>}, {transform_indices = @transform_1, window_bounds = array<i64: 8, 3>}, {pipeline_mode = #tpu.pipeline_mode<synchronous>, transform_indices = @transform_2, window_bounds = array<i64: 64, 64>}, {pipeline_mode = #tpu.pipeline_mode<synchronous>, transform_indices = @transform_3, window_bounds = array<i64: 16, 128>}, {pipeline_mode = #tpu.pipeline_mode<synchronous>, transform_indices = @transform_4, window_bounds = array<i64: 1, 128>}, {pipeline_mode = #tpu.pipeline_mode<synchronous>, transform_indices = @transform_5, window_bounds = array<i64: 4, 128, 384>}, {pipeline_mode = #tpu.pipeline_mode<synchronous>, transform_indices = @transform_6, window_bounds = array<i64: 4, 1, 384>}, {pipeline_mode = #tpu.pipeline_mode<synchronous>, transform_indices = @transform_7, window_bounds = array<i64: 4, 128, 128>}, {pipeline_mode = #tpu.pipeline_mode<synchronous>, transform_indices = @transform_8, window_bounds = array<i64: 4, 6, 128>}, {pipeline_mode = #tpu.pipeline_mode<synchronous>, transform_indices = @transform_9, window_bounds = array<i64: 4, 128, 256>}, {pipeline_mode = #tpu.pipeline_mode<synchronous>, transform_indices = @transform_10, window_bounds = array<i64: 4, 1, 256>}, {pipeline_mode = #tpu.pipeline_mode<synchronous>, transform_indices = @transform_11, window_bounds = array<i64: 4, 256, 128>}, {pipeline_mode = #tpu.pipeline_mode<synchronous>, transform_indices = @transform_12, window_bounds = array<i64: 3, 128>}, {pipeline_mode = #tpu.pipeline_mode<synchronous>, transform_indices = @transform_13, window_bounds = array<i64: 1, 128>}, {pipeline_mode = #tpu.pipeline_mode<synchronous>, transform_indices = @transform_14, window_bounds = array<i64: 256, 256>}, {pipeline_mode = #tpu.pipeline_mode<synchronous>, transform_indices = @transform_15, window_bounds = array<i64: 1, 256>}, {pipeline_mode = #tpu.pipeline_mode<synchronous>, transform_indices = @transform_16, window_bounds = array<i64: 256, 128>}, {pipeline_mode = #tpu.pipeline_mode<synchronous>, transform_indices = @transform_17, window_bounds = array<i64: 1, 128>}, {transform_indices = @transform_18, window_bounds = array<i64: 8, 128>}]} {
    %c0 = arith.constant 0 : index
    %c0_0 = arith.constant 0 : index
    %0 = vector.load %arg3[%c0, %c0_0] : memref<64x64xf32, #tpu.memory_space<vmem>>, vector<64x64xf32>
    %c0_1 = arith.constant 0 : index
    %c0_2 = arith.constant 0 : index
    %1 = vector.load %arg1[%c0_1, %c0_2] : memref<64x16xf32, #tpu.memory_space<vmem>>, vector<64x16xf32>
    %2 = arith.truncf %1 : vector<64x16xf32> to vector<64x16xbf16>
    %c0_3 = arith.constant 0 : index
    %c0_4 = arith.constant 0 : index
    %3 = vector.load %arg4[%c0_3, %c0_4] : memref<16x128xbf16, #tpu.memory_space<vmem>>, vector<16x128xbf16>
    %cst = arith.constant dense<0.000000e+00> : vector<64x128xf32>
    %4 = tpu.matmul %2, %3, %cst {dimension_numbers = #tpu.dot_dimension_numbers<[1], [0], [0], [1], [0, 0, 1, 1], [], []>} : vector<64x16xbf16>, vector<16x128xbf16>, vector<64x128xf32> -> vector<64x128xf32>
    %c0_5 = arith.constant 0 : index
    %c0_6 = arith.constant 0 : index
    %5 = vector.load %arg5[%c0_5, %c0_6] : memref<1x128xf32, #tpu.memory_space<vmem>>, vector<1x128xf32>
    %6 = vector.broadcast %5 : vector<1x128xf32> to vector<64x128xf32>
    %7 = arith.addf %4, %6 : vector<64x128xf32>
    %c0_i32 = arith.constant 0 : i32
    %c4_i32 = arith.constant 4 : i32
    %8 = arith.addi %c0_i32, %c4_i32 : i32
    %c1_i32 = arith.constant 1 : i32
    %9 = scf.for %arg20 = %c0_i32 to %8 step %c1_i32 iter_args(%arg21 = %7) -> (vector<64x128xf32>)  : i32 {
      %41 = arith.index_cast %arg20 : i32 to index
      %c0_31 = arith.constant 0 : index
      %c0_32 = arith.constant 0 : index
      %42 = vector.load %arg6[%41, %c0_31, %c0_32] : memref<4x128x384xbf16, #tpu.memory_space<vmem>>, vector<1x128x384xbf16>
      %43 = vector.shape_cast %42 : vector<1x128x384xbf16> to vector<128x384xbf16>
      %44 = arith.index_cast %arg20 : i32 to index
      %c0_33 = arith.constant 0 : index
      %c0_34 = arith.constant 0 : index
      %45 = vector.load %arg7[%44, %c0_33, %c0_34] : memref<4x1x384xf32, #tpu.memory_space<vmem>>, vector<1x1x384xf32>
      %46 = vector.shape_cast %45 : vector<1x1x384xf32> to vector<1x384xf32>
      %47 = arith.index_cast %arg20 : i32 to index
      %c0_35 = arith.constant 0 : index
      %c0_36 = arith.constant 0 : index
      %48 = vector.load %arg8[%47, %c0_35, %c0_36] : memref<4x128x128xbf16, #tpu.memory_space<vmem>>, vector<1x128x128xbf16>
      %49 = vector.shape_cast %48 : vector<1x128x128xbf16> to vector<128x128xbf16>
      %50 = arith.index_cast %arg20 : i32 to index
      %c0_37 = arith.constant 0 : index
      %c0_38 = arith.constant 0 : index
      %51 = vector.load %arg9[%50, %c0_37, %c0_38] : memref<4x6x128xf32, #tpu.memory_space<vmem>>, vector<1x6x128xf32>
      %52 = vector.shape_cast %51 : vector<1x6x128xf32> to vector<6x128xf32>
      %53 = arith.index_cast %arg20 : i32 to index
      %c0_39 = arith.constant 0 : index
      %c0_40 = arith.constant 0 : index
      %54 = vector.load %arg10[%53, %c0_39, %c0_40] : memref<4x128x256xbf16, #tpu.memory_space<vmem>>, vector<1x128x256xbf16>
      %55 = vector.shape_cast %54 : vector<1x128x256xbf16> to vector<128x256xbf16>
      %56 = arith.index_cast %arg20 : i32 to index
      %c0_41 = arith.constant 0 : index
      %c0_42 = arith.constant 0 : index
      %57 = vector.load %arg11[%56, %c0_41, %c0_42] : memref<4x1x256xf32, #tpu.memory_space<vmem>>, vector<1x1x256xf32>
      %58 = vector.shape_cast %57 : vector<1x1x256xf32> to vector<1x256xf32>
      %59 = arith.index_cast %arg20 : i32 to index
      %c0_43 = arith.constant 0 : index
      %c0_44 = arith.constant 0 : index
      %60 = vector.load %arg12[%59, %c0_43, %c0_44] : memref<4x256x128xbf16, #tpu.memory_space<vmem>>, vector<1x256x128xbf16>
      %61 = vector.shape_cast %60 : vector<1x256x128xbf16> to vector<256x128xbf16>
      %62 = vector.extract_strided_slice %52 {offsets = [0, 0], sizes = [1, 128], strides = [1, 1]} : vector<6x128xf32> to vector<1x128xf32>
      %63 = vector.extract_strided_slice %52 {offsets = [1, 0], sizes = [1, 128], strides = [1, 1]} : vector<6x128xf32> to vector<1x128xf32>
      %64 = vector.extract_strided_slice %52 {offsets = [2, 0], sizes = [1, 128], strides = [1, 1]} : vector<6x128xf32> to vector<1x128xf32>
      %65 = vector.extract_strided_slice %52 {offsets = [3, 0], sizes = [1, 128], strides = [1, 1]} : vector<6x128xf32> to vector<1x128xf32>
      %66 = vector.extract_strided_slice %52 {offsets = [4, 0], sizes = [1, 128], strides = [1, 1]} : vector<6x128xf32> to vector<1x128xf32>
      %67 = vector.extract_strided_slice %52 {offsets = [5, 0], sizes = [1, 128], strides = [1, 1]} : vector<6x128xf32> to vector<1x128xf32>
      %68 = arith.truncf %arg21 : vector<64x128xf32> to vector<64x128xbf16>
      %cst_45 = arith.constant dense<0.000000e+00> : vector<64x384xf32>
      %69 = tpu.matmul %68, %43, %cst_45 {dimension_numbers = #tpu.dot_dimension_numbers<[1], [0], [0], [1], [0, 0, 1, 1], [], []>} : vector<64x128xbf16>, vector<128x384xbf16>, vector<64x384xf32> -> vector<64x384xf32>
      %70 = vector.broadcast %46 : vector<1x384xf32> to vector<64x384xf32>
      %71 = arith.addf %69, %70 : vector<64x384xf32>
      %72 = arith.truncf %71 : vector<64x384xf32> to vector<64x384xbf16>
      %73 = vector.extract_strided_slice %72 {offsets = [0, 0], sizes = [64, 16], strides = [1, 1]} : vector<64x384xbf16> to vector<64x16xbf16>
      %74 = vector.extract_strided_slice %72 {offsets = [0, 128], sizes = [64, 16], strides = [1, 1]} : vector<64x384xbf16> to vector<64x16xbf16>
      %75 = vector.extract_strided_slice %72 {offsets = [0, 256], sizes = [64, 16], strides = [1, 1]} : vector<64x384xbf16> to vector<64x16xbf16>
      %cst_46 = arith.constant dense<0.000000e+00> : vector<64x64xf32>
      %76 = tpu.matmul %73, %74, %cst_46 {dimension_numbers = #tpu.dot_dimension_numbers<[1], [1], [0], [0], [0, 0, 1, 0], [], []>} : vector<64x16xbf16>, vector<64x16xbf16>, vector<64x64xf32> -> vector<64x64xf32>
      %77 = arith.addf %76, %0 : vector<64x64xf32>
      %cst_47 = arith.constant dense<0xFF800000> : vector<64xf32>
      %78 = vector.multi_reduction <maximumf>, %77, %cst_47 [1] : vector<64x64xf32> to vector<64xf32>
      %79 = vector.shape_cast %78 : vector<64xf32> to vector<64x1xf32>
      %80 = vector.broadcast %79 : vector<64x1xf32> to vector<64x64xf32>
      %81 = arith.subf %77, %80 : vector<64x64xf32>
      %82 = math.exp %81 : vector<64x64xf32>
      %cst_48 = arith.constant dense<0.000000e+00> : vector<64xf32>
      %83 = vector.multi_reduction <add>, %82, %cst_48 [1] : vector<64x64xf32> to vector<64xf32>
      %84 = vector.shape_cast %83 : vector<64xf32> to vector<64x1xf32>
      %85 = tpu.reciprocal %84 {approx = true} : vector<64x1xf32> -> vector<64x1xf32>
      %86 = arith.truncf %82 : vector<64x64xf32> to vector<64x64xbf16>
      %cst_49 = arith.constant dense<0.000000e+00> : vector<64x16xf32>
      %87 = tpu.matmul %86, %75, %cst_49 {dimension_numbers = #tpu.dot_dimension_numbers<[1], [0], [0], [1], [0, 0, 1, 1], [], []>} : vector<64x64xbf16>, vector<64x16xbf16>, vector<64x16xf32> -> vector<64x16xf32>
      %88 = vector.broadcast %85 : vector<64x1xf32> to vector<64x16xf32>
      %89 = arith.mulf %87, %88 : vector<64x16xf32>
      %90 = arith.truncf %89 : vector<64x16xf32> to vector<64x16xbf16>
      %91 = vector.extract_strided_slice %72 {offsets = [0, 16], sizes = [64, 16], strides = [1, 1]} : vector<64x384xbf16> to vector<64x16xbf16>
      %92 = vector.extract_strided_slice %72 {offsets = [0, 144], sizes = [64, 16], strides = [1, 1]} : vector<64x384xbf16> to vector<64x16xbf16>
      %93 = vector.extract_strided_slice %72 {offsets = [0, 272], sizes = [64, 16], strides = [1, 1]} : vector<64x384xbf16> to vector<64x16xbf16>
      %cst_50 = arith.constant dense<0.000000e+00> : vector<64x64xf32>
      %94 = tpu.matmul %91, %92, %cst_50 {dimension_numbers = #tpu.dot_dimension_numbers<[1], [1], [0], [0], [0, 0, 1, 0], [], []>} : vector<64x16xbf16>, vector<64x16xbf16>, vector<64x64xf32> -> vector<64x64xf32>
      %95 = arith.addf %94, %0 : vector<64x64xf32>
      %cst_51 = arith.constant dense<0xFF800000> : vector<64xf32>
      %96 = vector.multi_reduction <maximumf>, %95, %cst_51 [1] : vector<64x64xf32> to vector<64xf32>
      %97 = vector.shape_cast %96 : vector<64xf32> to vector<64x1xf32>
      %98 = vector.broadcast %97 : vector<64x1xf32> to vector<64x64xf32>
      %99 = arith.subf %95, %98 : vector<64x64xf32>
      %100 = math.exp %99 : vector<64x64xf32>
      %cst_52 = arith.constant dense<0.000000e+00> : vector<64xf32>
      %101 = vector.multi_reduction <add>, %100, %cst_52 [1] : vector<64x64xf32> to vector<64xf32>
      %102 = vector.shape_cast %101 : vector<64xf32> to vector<64x1xf32>
      %103 = tpu.reciprocal %102 {approx = true} : vector<64x1xf32> -> vector<64x1xf32>
      %104 = arith.truncf %100 : vector<64x64xf32> to vector<64x64xbf16>
      %cst_53 = arith.constant dense<0.000000e+00> : vector<64x16xf32>
      %105 = tpu.matmul %104, %93, %cst_53 {dimension_numbers = #tpu.dot_dimension_numbers<[1], [0], [0], [1], [0, 0, 1, 1], [], []>} : vector<64x64xbf16>, vector<64x16xbf16>, vector<64x16xf32> -> vector<64x16xf32>
      %106 = vector.broadcast %103 : vector<64x1xf32> to vector<64x16xf32>
      %107 = arith.mulf %105, %106 : vector<64x16xf32>
      %108 = arith.truncf %107 : vector<64x16xf32> to vector<64x16xbf16>
      %109 = vector.extract_strided_slice %72 {offsets = [0, 32], sizes = [64, 16], strides = [1, 1]} : vector<64x384xbf16> to vector<64x16xbf16>
      %110 = vector.extract_strided_slice %72 {offsets = [0, 160], sizes = [64, 16], strides = [1, 1]} : vector<64x384xbf16> to vector<64x16xbf16>
      %111 = vector.extract_strided_slice %72 {offsets = [0, 288], sizes = [64, 16], strides = [1, 1]} : vector<64x384xbf16> to vector<64x16xbf16>
      %cst_54 = arith.constant dense<0.000000e+00> : vector<64x64xf32>
      %112 = tpu.matmul %109, %110, %cst_54 {dimension_numbers = #tpu.dot_dimension_numbers<[1], [1], [0], [0], [0, 0, 1, 0], [], []>} : vector<64x16xbf16>, vector<64x16xbf16>, vector<64x64xf32> -> vector<64x64xf32>
      %113 = arith.addf %112, %0 : vector<64x64xf32>
      %cst_55 = arith.constant dense<0xFF800000> : vector<64xf32>
      %114 = vector.multi_reduction <maximumf>, %113, %cst_55 [1] : vector<64x64xf32> to vector<64xf32>
      %115 = vector.shape_cast %114 : vector<64xf32> to vector<64x1xf32>
      %116 = vector.broadcast %115 : vector<64x1xf32> to vector<64x64xf32>
      %117 = arith.subf %113, %116 : vector<64x64xf32>
      %118 = math.exp %117 : vector<64x64xf32>
      %cst_56 = arith.constant dense<0.000000e+00> : vector<64xf32>
      %119 = vector.multi_reduction <add>, %118, %cst_56 [1] : vector<64x64xf32> to vector<64xf32>
      %120 = vector.shape_cast %119 : vector<64xf32> to vector<64x1xf32>
      %121 = tpu.reciprocal %120 {approx = true} : vector<64x1xf32> -> vector<64x1xf32>
      %122 = arith.truncf %118 : vector<64x64xf32> to vector<64x64xbf16>
      %cst_57 = arith.constant dense<0.000000e+00> : vector<64x16xf32>
      %123 = tpu.matmul %122, %111, %cst_57 {dimension_numbers = #tpu.dot_dimension_numbers<[1], [0], [0], [1], [0, 0, 1, 1], [], []>} : vector<64x64xbf16>, vector<64x16xbf16>, vector<64x16xf32> -> vector<64x16xf32>
      %124 = vector.broadcast %121 : vector<64x1xf32> to vector<64x16xf32>
      %125 = arith.mulf %123, %124 : vector<64x16xf32>
      %126 = arith.truncf %125 : vector<64x16xf32> to vector<64x16xbf16>
      %127 = vector.extract_strided_slice %72 {offsets = [0, 48], sizes = [64, 16], strides = [1, 1]} : vector<64x384xbf16> to vector<64x16xbf16>
      %128 = vector.extract_strided_slice %72 {offsets = [0, 176], sizes = [64, 16], strides = [1, 1]} : vector<64x384xbf16> to vector<64x16xbf16>
      %129 = vector.extract_strided_slice %72 {offsets = [0, 304], sizes = [64, 16], strides = [1, 1]} : vector<64x384xbf16> to vector<64x16xbf16>
      %cst_58 = arith.constant dense<0.000000e+00> : vector<64x64xf32>
      %130 = tpu.matmul %127, %128, %cst_58 {dimension_numbers = #tpu.dot_dimension_numbers<[1], [1], [0], [0], [0, 0, 1, 0], [], []>} : vector<64x16xbf16>, vector<64x16xbf16>, vector<64x64xf32> -> vector<64x64xf32>
      %131 = arith.addf %130, %0 : vector<64x64xf32>
      %cst_59 = arith.constant dense<0xFF800000> : vector<64xf32>
      %132 = vector.multi_reduction <maximumf>, %131, %cst_59 [1] : vector<64x64xf32> to vector<64xf32>
      %133 = vector.shape_cast %132 : vector<64xf32> to vector<64x1xf32>
      %134 = vector.broadcast %133 : vector<64x1xf32> to vector<64x64xf32>
      %135 = arith.subf %131, %134 : vector<64x64xf32>
      %136 = math.exp %135 : vector<64x64xf32>
      %cst_60 = arith.constant dense<0.000000e+00> : vector<64xf32>
      %137 = vector.multi_reduction <add>, %136, %cst_60 [1] : vector<64x64xf32> to vector<64xf32>
      %138 = vector.shape_cast %137 : vector<64xf32> to vector<64x1xf32>
      %139 = tpu.reciprocal %138 {approx = true} : vector<64x1xf32> -> vector<64x1xf32>
      %140 = arith.truncf %136 : vector<64x64xf32> to vector<64x64xbf16>
      %cst_61 = arith.constant dense<0.000000e+00> : vector<64x16xf32>
      %141 = tpu.matmul %140, %129, %cst_61 {dimension_numbers = #tpu.dot_dimension_numbers<[1], [0], [0], [1], [0, 0, 1, 1], [], []>} : vector<64x64xbf16>, vector<64x16xbf16>, vector<64x16xf32> -> vector<64x16xf32>
      %142 = vector.broadcast %139 : vector<64x1xf32> to vector<64x16xf32>
      %143 = arith.mulf %141, %142 : vector<64x16xf32>
      %144 = arith.truncf %143 : vector<64x16xf32> to vector<64x16xbf16>
      %145 = vector.extract_strided_slice %72 {offsets = [0, 64], sizes = [64, 16], strides = [1, 1]} : vector<64x384xbf16> to vector<64x16xbf16>
      %146 = vector.extract_strided_slice %72 {offsets = [0, 192], sizes = [64, 16], strides = [1, 1]} : vector<64x384xbf16> to vector<64x16xbf16>
      %147 = vector.extract_strided_slice %72 {offsets = [0, 320], sizes = [64, 16], strides = [1, 1]} : vector<64x384xbf16> to vector<64x16xbf16>
      %cst_62 = arith.constant dense<0.000000e+00> : vector<64x64xf32>
      %148 = tpu.matmul %145, %146, %cst_62 {dimension_numbers = #tpu.dot_dimension_numbers<[1], [1], [0], [0], [0, 0, 1, 0], [], []>} : vector<64x16xbf16>, vector<64x16xbf16>, vector<64x64xf32> -> vector<64x64xf32>
      %149 = arith.addf %148, %0 : vector<64x64xf32>
      %cst_63 = arith.constant dense<0xFF800000> : vector<64xf32>
      %150 = vector.multi_reduction <maximumf>, %149, %cst_63 [1] : vector<64x64xf32> to vector<64xf32>
      %151 = vector.shape_cast %150 : vector<64xf32> to vector<64x1xf32>
      %152 = vector.broadcast %151 : vector<64x1xf32> to vector<64x64xf32>
      %153 = arith.subf %149, %152 : vector<64x64xf32>
      %154 = math.exp %153 : vector<64x64xf32>
      %cst_64 = arith.constant dense<0.000000e+00> : vector<64xf32>
      %155 = vector.multi_reduction <add>, %154, %cst_64 [1] : vector<64x64xf32> to vector<64xf32>
      %156 = vector.shape_cast %155 : vector<64xf32> to vector<64x1xf32>
      %157 = tpu.reciprocal %156 {approx = true} : vector<64x1xf32> -> vector<64x1xf32>
      %158 = arith.truncf %154 : vector<64x64xf32> to vector<64x64xbf16>
      %cst_65 = arith.constant dense<0.000000e+00> : vector<64x16xf32>
      %159 = tpu.matmul %158, %147, %cst_65 {dimension_numbers = #tpu.dot_dimension_numbers<[1], [0], [0], [1], [0, 0, 1, 1], [], []>} : vector<64x64xbf16>, vector<64x16xbf16>, vector<64x16xf32> -> vector<64x16xf32>
      %160 = vector.broadcast %157 : vector<64x1xf32> to vector<64x16xf32>
      %161 = arith.mulf %159, %160 : vector<64x16xf32>
      %162 = arith.truncf %161 : vector<64x16xf32> to vector<64x16xbf16>
      %163 = vector.extract_strided_slice %72 {offsets = [0, 80], sizes = [64, 16], strides = [1, 1]} : vector<64x384xbf16> to vector<64x16xbf16>
      %164 = vector.extract_strided_slice %72 {offsets = [0, 208], sizes = [64, 16], strides = [1, 1]} : vector<64x384xbf16> to vector<64x16xbf16>
      %165 = vector.extract_strided_slice %72 {offsets = [0, 336], sizes = [64, 16], strides = [1, 1]} : vector<64x384xbf16> to vector<64x16xbf16>
      %cst_66 = arith.constant dense<0.000000e+00> : vector<64x64xf32>
      %166 = tpu.matmul %163, %164, %cst_66 {dimension_numbers = #tpu.dot_dimension_numbers<[1], [1], [0], [0], [0, 0, 1, 0], [], []>} : vector<64x16xbf16>, vector<64x16xbf16>, vector<64x64xf32> -> vector<64x64xf32>
      %167 = arith.addf %166, %0 : vector<64x64xf32>
      %cst_67 = arith.constant dense<0xFF800000> : vector<64xf32>
      %168 = vector.multi_reduction <maximumf>, %167, %cst_67 [1] : vector<64x64xf32> to vector<64xf32>
      %169 = vector.shape_cast %168 : vector<64xf32> to vector<64x1xf32>
      %170 = vector.broadcast %169 : vector<64x1xf32> to vector<64x64xf32>
      %171 = arith.subf %167, %170 : vector<64x64xf32>
      %172 = math.exp %171 : vector<64x64xf32>
      %cst_68 = arith.constant dense<0.000000e+00> : vector<64xf32>
      %173 = vector.multi_reduction <add>, %172, %cst_68 [1] : vector<64x64xf32> to vector<64xf32>
      %174 = vector.shape_cast %173 : vector<64xf32> to vector<64x1xf32>
      %175 = tpu.reciprocal %174 {approx = true} : vector<64x1xf32> -> vector<64x1xf32>
      %176 = arith.truncf %172 : vector<64x64xf32> to vector<64x64xbf16>
      %cst_69 = arith.constant dense<0.000000e+00> : vector<64x16xf32>
      %177 = tpu.matmul %176, %165, %cst_69 {dimension_numbers = #tpu.dot_dimension_numbers<[1], [0], [0], [1], [0, 0, 1, 1], [], []>} : vector<64x64xbf16>, vector<64x16xbf16>, vector<64x16xf32> -> vector<64x16xf32>
      %178 = vector.broadcast %175 : vector<64x1xf32> to vector<64x16xf32>
      %179 = arith.mulf %177, %178 : vector<64x16xf32>
      %180 = arith.truncf %179 : vector<64x16xf32> to vector<64x16xbf16>
      %181 = vector.extract_strided_slice %72 {offsets = [0, 96], sizes = [64, 16], strides = [1, 1]} : vector<64x384xbf16> to vector<64x16xbf16>
      %182 = vector.extract_strided_slice %72 {offsets = [0, 224], sizes = [64, 16], strides = [1, 1]} : vector<64x384xbf16> to vector<64x16xbf16>
      %183 = vector.extract_strided_slice %72 {offsets = [0, 352], sizes = [64, 16], strides = [1, 1]} : vector<64x384xbf16> to vector<64x16xbf16>
      %cst_70 = arith.constant dense<0.000000e+00> : vector<64x64xf32>
      %184 = tpu.matmul %181, %182, %cst_70 {dimension_numbers = #tpu.dot_dimension_numbers<[1], [1], [0], [0], [0, 0, 1, 0], [], []>} : vector<64x16xbf16>, vector<64x16xbf16>, vector<64x64xf32> -> vector<64x64xf32>
      %185 = arith.addf %184, %0 : vector<64x64xf32>
      %cst_71 = arith.constant dense<0xFF800000> : vector<64xf32>
      %186 = vector.multi_reduction <maximumf>, %185, %cst_71 [1] : vector<64x64xf32> to vector<64xf32>
      %187 = vector.shape_cast %186 : vector<64xf32> to vector<64x1xf32>
      %188 = vector.broadcast %187 : vector<64x1xf32> to vector<64x64xf32>
      %189 = arith.subf %185, %188 : vector<64x64xf32>
      %190 = math.exp %189 : vector<64x64xf32>
      %cst_72 = arith.constant dense<0.000000e+00> : vector<64xf32>
      %191 = vector.multi_reduction <add>, %190, %cst_72 [1] : vector<64x64xf32> to vector<64xf32>
      %192 = vector.shape_cast %191 : vector<64xf32> to vector<64x1xf32>
      %193 = tpu.reciprocal %192 {approx = true} : vector<64x1xf32> -> vector<64x1xf32>
      %194 = arith.truncf %190 : vector<64x64xf32> to vector<64x64xbf16>
      %cst_73 = arith.constant dense<0.000000e+00> : vector<64x16xf32>
      %195 = tpu.matmul %194, %183, %cst_73 {dimension_numbers = #tpu.dot_dimension_numbers<[1], [0], [0], [1], [0, 0, 1, 1], [], []>} : vector<64x64xbf16>, vector<64x16xbf16>, vector<64x16xf32> -> vector<64x16xf32>
      %196 = vector.broadcast %193 : vector<64x1xf32> to vector<64x16xf32>
      %197 = arith.mulf %195, %196 : vector<64x16xf32>
      %198 = arith.truncf %197 : vector<64x16xf32> to vector<64x16xbf16>
      %199 = vector.extract_strided_slice %72 {offsets = [0, 112], sizes = [64, 16], strides = [1, 1]} : vector<64x384xbf16> to vector<64x16xbf16>
      %200 = vector.extract_strided_slice %72 {offsets = [0, 240], sizes = [64, 16], strides = [1, 1]} : vector<64x384xbf16> to vector<64x16xbf16>
      %201 = vector.extract_strided_slice %72 {offsets = [0, 368], sizes = [64, 16], strides = [1, 1]} : vector<64x384xbf16> to vector<64x16xbf16>
      %cst_74 = arith.constant dense<0.000000e+00> : vector<64x64xf32>
      %202 = tpu.matmul %199, %200, %cst_74 {dimension_numbers = #tpu.dot_dimension_numbers<[1], [1], [0], [0], [0, 0, 1, 0], [], []>} : vector<64x16xbf16>, vector<64x16xbf16>, vector<64x64xf32> -> vector<64x64xf32>
      %203 = arith.addf %202, %0 : vector<64x64xf32>
      %cst_75 = arith.constant dense<0xFF800000> : vector<64xf32>
      %204 = vector.multi_reduction <maximumf>, %203, %cst_75 [1] : vector<64x64xf32> to vector<64xf32>
      %205 = vector.shape_cast %204 : vector<64xf32> to vector<64x1xf32>
      %206 = vector.broadcast %205 : vector<64x1xf32> to vector<64x64xf32>
      %207 = arith.subf %203, %206 : vector<64x64xf32>
      %208 = math.exp %207 : vector<64x64xf32>
      %cst_76 = arith.constant dense<0.000000e+00> : vector<64xf32>
      %209 = vector.multi_reduction <add>, %208, %cst_76 [1] : vector<64x64xf32> to vector<64xf32>
      %210 = vector.shape_cast %209 : vector<64xf32> to vector<64x1xf32>
      %211 = tpu.reciprocal %210 {approx = true} : vector<64x1xf32> -> vector<64x1xf32>
      %212 = arith.truncf %208 : vector<64x64xf32> to vector<64x64xbf16>
      %cst_77 = arith.constant dense<0.000000e+00> : vector<64x16xf32>
      %213 = tpu.matmul %212, %201, %cst_77 {dimension_numbers = #tpu.dot_dimension_numbers<[1], [0], [0], [1], [0, 0, 1, 1], [], []>} : vector<64x64xbf16>, vector<64x16xbf16>, vector<64x16xf32> -> vector<64x16xf32>
      %214 = vector.broadcast %211 : vector<64x1xf32> to vector<64x16xf32>
      %215 = arith.mulf %213, %214 : vector<64x16xf32>
      %216 = arith.truncf %215 : vector<64x16xf32> to vector<64x16xbf16>
      %217 = tpu.concatenate %90, %108, %126, %144, %162, %180, %198, %216 in 1 : vector<64x16xbf16>, vector<64x16xbf16>, vector<64x16xbf16>, vector<64x16xbf16>, vector<64x16xbf16>, vector<64x16xbf16>, vector<64x16xbf16>, vector<64x16xbf16> -> vector<64x128xbf16>
      %cst_78 = arith.constant dense<0.000000e+00> : vector<64x128xf32>
      %218 = tpu.matmul %217, %49, %cst_78 {dimension_numbers = #tpu.dot_dimension_numbers<[1], [0], [0], [1], [0, 0, 1, 1], [], []>} : vector<64x128xbf16>, vector<128x128xbf16>, vector<64x128xf32> -> vector<64x128xf32>
      %219 = vector.broadcast %62 : vector<1x128xf32> to vector<64x128xf32>
      %220 = arith.addf %218, %219 : vector<64x128xf32>
      %221 = arith.addf %arg21, %220 : vector<64x128xf32>
      %cst_79 = arith.constant dense<0.000000e+00> : vector<64xf32>
      %222 = vector.multi_reduction <add>, %221, %cst_79 [1] : vector<64x128xf32> to vector<64xf32>
      %223 = vector.shape_cast %222 : vector<64xf32> to vector<64x1xf32>
      %cst_80 = arith.constant 1.280000e+02 : f32
      %224 = vector.broadcast %cst_80 : f32 to vector<64x1xf32>
      %225 = arith.divf %223, %224 : vector<64x1xf32>
      %226 = vector.broadcast %225 : vector<64x1xf32> to vector<64x128xf32>
      %227 = arith.subf %221, %226 : vector<64x128xf32>
      %228 = arith.mulf %227, %227 : vector<64x128xf32>
      %cst_81 = arith.constant dense<0.000000e+00> : vector<64xf32>
      %229 = vector.multi_reduction <add>, %228, %cst_81 [1] : vector<64x128xf32> to vector<64xf32>
      %230 = vector.shape_cast %229 : vector<64xf32> to vector<64x1xf32>
      %cst_82 = arith.constant 1.280000e+02 : f32
      %231 = vector.broadcast %cst_82 : f32 to vector<64x1xf32>
      %232 = arith.divf %230, %231 : vector<64x1xf32>
      %cst_83 = arith.constant 9.99999974E-6 : f32
      %233 = vector.broadcast %cst_83 : f32 to vector<64x1xf32>
      %234 = arith.addf %232, %233 : vector<64x1xf32>
      %235 = math.rsqrt %234 : vector<64x1xf32>
      %236 = vector.broadcast %235 : vector<64x1xf32> to vector<64x128xf32>
      %237 = arith.mulf %227, %236 : vector<64x128xf32>
      %238 = vector.broadcast %63 : vector<1x128xf32> to vector<64x128xf32>
      %239 = arith.mulf %237, %238 : vector<64x128xf32>
      %240 = vector.broadcast %64 : vector<1x128xf32> to vector<64x128xf32>
      %241 = arith.addf %239, %240 : vector<64x128xf32>
      %242 = arith.truncf %241 : vector<64x128xf32> to vector<64x128xbf16>
      %cst_84 = arith.constant dense<0.000000e+00> : vector<64x256xf32>
      %243 = tpu.matmul %242, %55, %cst_84 {dimension_numbers = #tpu.dot_dimension_numbers<[1], [0], [0], [1], [0, 0, 1, 1], [], []>} : vector<64x128xbf16>, vector<128x256xbf16>, vector<64x256xf32> -> vector<64x256xf32>
      %244 = vector.broadcast %58 : vector<1x256xf32> to vector<64x256xf32>
      %245 = arith.addf %243, %244 : vector<64x256xf32>
      %cst_85 = arith.constant 0.000000e+00 : f32
      %246 = vector.broadcast %cst_85 : f32 to vector<64x256xf32>
      %247 = arith.maximumf %245, %246 : vector<64x256xf32>
      %248 = arith.truncf %247 : vector<64x256xf32> to vector<64x256xbf16>
      %cst_86 = arith.constant dense<0.000000e+00> : vector<64x128xf32>
      %249 = tpu.matmul %248, %61, %cst_86 {dimension_numbers = #tpu.dot_dimension_numbers<[1], [0], [0], [1], [0, 0, 1, 1], [], []>} : vector<64x256xbf16>, vector<256x128xbf16>, vector<64x128xf32> -> vector<64x128xf32>
      %250 = vector.broadcast %65 : vector<1x128xf32> to vector<64x128xf32>
      %251 = arith.addf %249, %250 : vector<64x128xf32>
      %252 = arith.addf %241, %251 : vector<64x128xf32>
      %cst_87 = arith.constant dense<0.000000e+00> : vector<64xf32>
      %253 = vector.multi_reduction <add>, %252, %cst_87 [1] : vector<64x128xf32> to vector<64xf32>
      %254 = vector.shape_cast %253 : vector<64xf32> to vector<64x1xf32>
      %cst_88 = arith.constant 1.280000e+02 : f32
      %255 = vector.broadcast %cst_88 : f32 to vector<64x1xf32>
      %256 = arith.divf %254, %255 : vector<64x1xf32>
      %257 = vector.broadcast %256 : vector<64x1xf32> to vector<64x128xf32>
      %258 = arith.subf %252, %257 : vector<64x128xf32>
      %259 = arith.mulf %258, %258 : vector<64x128xf32>
      %cst_89 = arith.constant dense<0.000000e+00> : vector<64xf32>
      %260 = vector.multi_reduction <add>, %259, %cst_89 [1] : vector<64x128xf32> to vector<64xf32>
      %261 = vector.shape_cast %260 : vector<64xf32> to vector<64x1xf32>
      %cst_90 = arith.constant 1.280000e+02 : f32
      %262 = vector.broadcast %cst_90 : f32 to vector<64x1xf32>
      %263 = arith.divf %261, %262 : vector<64x1xf32>
      %cst_91 = arith.constant 9.99999974E-6 : f32
      %264 = vector.broadcast %cst_91 : f32 to vector<64x1xf32>
      %265 = arith.addf %263, %264 : vector<64x1xf32>
      %266 = math.rsqrt %265 : vector<64x1xf32>
      %267 = vector.broadcast %266 : vector<64x1xf32> to vector<64x128xf32>
      %268 = arith.mulf %258, %267 : vector<64x128xf32>
      %269 = vector.broadcast %66 : vector<1x128xf32> to vector<64x128xf32>
      %270 = arith.mulf %268, %269 : vector<64x128xf32>
      %271 = vector.broadcast %67 : vector<1x128xf32> to vector<64x128xf32>
      %272 = arith.addf %270, %271 : vector<64x128xf32>
      scf.yield %272 : vector<64x128xf32>
    }
    %c4_i32_7 = arith.constant 4 : i32
    %10 = vector.shape_cast %9 : vector<64x128xf32> to vector<8x8x128xf32>
    %cst_8 = arith.constant dense<0.000000e+00> : vector<8x128xf32>
    %11 = vector.multi_reduction <add>, %10, %cst_8 [1] : vector<8x8x128xf32> to vector<8x128xf32>
    %cst_9 = arith.constant 8.000000e+00 : f32
    %12 = vector.broadcast %cst_9 : f32 to vector<8x128xf32>
    %13 = arith.divf %11, %12 : vector<8x128xf32>
    %c0_10 = arith.constant 0 : index
    %c0_11 = arith.constant 0 : index
    %14 = vector.load %arg2[%c0_10, %c0_11] : memref<8x3xf32, #tpu.memory_space<vmem>>, vector<8x3xf32>
    %15 = arith.truncf %14 : vector<8x3xf32> to vector<8x3xbf16>
    %c0_12 = arith.constant 0 : index
    %c0_13 = arith.constant 0 : index
    %16 = vector.load %arg13[%c0_12, %c0_13] : memref<3x128xbf16, #tpu.memory_space<vmem>>, vector<3x128xbf16>
    %cst_14 = arith.constant dense<0.000000e+00> : vector<8x128xf32>
    %17 = tpu.matmul %15, %16, %cst_14 {dimension_numbers = #tpu.dot_dimension_numbers<[1], [0], [0], [1], [0, 0, 1, 1], [], []>} : vector<8x3xbf16>, vector<3x128xbf16>, vector<8x128xf32> -> vector<8x128xf32>
    %c0_15 = arith.constant 0 : index
    %c0_16 = arith.constant 0 : index
    %18 = vector.load %arg14[%c0_15, %c0_16] : memref<1x128xf32, #tpu.memory_space<vmem>>, vector<1x128xf32>
    %19 = vector.broadcast %18 : vector<1x128xf32> to vector<8x128xf32>
    %20 = arith.addf %17, %19 : vector<8x128xf32>
    %c0_17 = arith.constant 0 : index
    %c0_18 = arith.constant 0 : index
    %21 = vector.load %arg15[%c0_17, %c0_18] : memref<256x256xbf16, #tpu.memory_space<vmem>>, vector<256x256xbf16>
    %22 = arith.truncf %13 : vector<8x128xf32> to vector<8x128xbf16>
    %23 = vector.extract_strided_slice %21 {offsets = [0, 0], sizes = [128, 256], strides = [1, 1]} : vector<256x256xbf16> to vector<128x256xbf16>
    %cst_19 = arith.constant dense<0.000000e+00> : vector<8x256xf32>
    %24 = tpu.matmul %22, %23, %cst_19 {dimension_numbers = #tpu.dot_dimension_numbers<[1], [0], [0], [1], [0, 0, 1, 1], [], []>} : vector<8x128xbf16>, vector<128x256xbf16>, vector<8x256xf32> -> vector<8x256xf32>
    %25 = arith.truncf %20 : vector<8x128xf32> to vector<8x128xbf16>
    %26 = vector.extract_strided_slice %21 {offsets = [128, 0], sizes = [128, 256], strides = [1, 1]} : vector<256x256xbf16> to vector<128x256xbf16>
    %cst_20 = arith.constant dense<0.000000e+00> : vector<8x256xf32>
    %27 = tpu.matmul %25, %26, %cst_20 {dimension_numbers = #tpu.dot_dimension_numbers<[1], [0], [0], [1], [0, 0, 1, 1], [], []>} : vector<8x128xbf16>, vector<128x256xbf16>, vector<8x256xf32> -> vector<8x256xf32>
    %28 = arith.addf %24, %27 : vector<8x256xf32>
    %c0_21 = arith.constant 0 : index
    %c0_22 = arith.constant 0 : index
    %29 = vector.load %arg16[%c0_21, %c0_22] : memref<1x256xf32, #tpu.memory_space<vmem>>, vector<1x256xf32>
    %30 = vector.broadcast %29 : vector<1x256xf32> to vector<8x256xf32>
    %31 = arith.addf %28, %30 : vector<8x256xf32>
    %cst_23 = arith.constant 0.000000e+00 : f32
    %32 = vector.broadcast %cst_23 : f32 to vector<8x256xf32>
    %33 = arith.maximumf %31, %32 : vector<8x256xf32>
    %34 = arith.truncf %33 : vector<8x256xf32> to vector<8x256xbf16>
    %c0_24 = arith.constant 0 : index
    %c0_25 = arith.constant 0 : index
    %35 = vector.load %arg17[%c0_24, %c0_25] : memref<256x128xbf16, #tpu.memory_space<vmem>>, vector<256x128xbf16>
    %cst_26 = arith.constant dense<0.000000e+00> : vector<8x128xf32>
    %36 = tpu.matmul %34, %35, %cst_26 {dimension_numbers = #tpu.dot_dimension_numbers<[1], [0], [0], [1], [0, 0, 1, 1], [], []>} : vector<8x256xbf16>, vector<256x128xbf16>, vector<8x128xf32> -> vector<8x128xf32>
    %c0_27 = arith.constant 0 : index
    %c0_28 = arith.constant 0 : index
    %37 = vector.load %arg18[%c0_27, %c0_28] : memref<1x128xf32, #tpu.memory_space<vmem>>, vector<1x128xf32>
    %38 = vector.broadcast %37 : vector<1x128xf32> to vector<8x128xf32>
    %39 = arith.addf %36, %38 : vector<8x128xf32>
    %c0_29 = arith.constant 0 : index
    %c0_30 = arith.constant 0 : index
    %40 = vector.load %arg19[%c0_29, %c0_30] : memref<8x128xf32, #tpu.memory_space<vmem>>, vector<8x128xf32>
    tpu.vector_store %arg19[%c0_29, %c0_30], %39 {strides = array<i32>} : memref<8x128xf32, #tpu.memory_space<vmem>>, vector<8x128xf32>,
    return
  }
  func.func @transform_0(%arg0: i32) -> (i32, i32) {
    %c0_i32 = arith.constant 0 : i32
    %c0_i32_0 = arith.constant 0 : i32
    return %arg0, %c0_i32 : i32, i32
  }
  func.func @transform_1(%arg0: i32) -> (i32, i32) {
    %c0_i32 = arith.constant 0 : i32
    %c0_i32_0 = arith.constant 0 : i32
    return %arg0, %c0_i32 : i32, i32
  }
  func.func @transform_2(%arg0: i32) -> (i32, i32) {
    %c0_i32 = arith.constant 0 : i32
    %c0_i32_0 = arith.constant 0 : i32
    %c0_i32_1 = arith.constant 0 : i32
    return %c0_i32, %c0_i32_0 : i32, i32
  }
  func.func @transform_3(%arg0: i32) -> (i32, i32) {
    %c0_i32 = arith.constant 0 : i32
    %c0_i32_0 = arith.constant 0 : i32
    %c0_i32_1 = arith.constant 0 : i32
    return %c0_i32, %c0_i32_0 : i32, i32
  }
  func.func @transform_4(%arg0: i32) -> (i32, i32) {
    %c0_i32 = arith.constant 0 : i32
    %c0_i32_0 = arith.constant 0 : i32
    %c0_i32_1 = arith.constant 0 : i32
    return %c0_i32, %c0_i32_0 : i32, i32
  }
  func.func @transform_5(%arg0: i32) -> (i32, i32, i32) {
    %c0_i32 = arith.constant 0 : i32
    %c0_i32_0 = arith.constant 0 : i32
    %c0_i32_1 = arith.constant 0 : i32
    %c0_i32_2 = arith.constant 0 : i32
    return %c0_i32, %c0_i32_0, %c0_i32_1 : i32, i32, i32
  }
  func.func @transform_6(%arg0: i32) -> (i32, i32, i32) {
    %c0_i32 = arith.constant 0 : i32
    %c0_i32_0 = arith.constant 0 : i32
    %c0_i32_1 = arith.constant 0 : i32
    %c0_i32_2 = arith.constant 0 : i32
    return %c0_i32, %c0_i32_0, %c0_i32_1 : i32, i32, i32
  }
  func.func @transform_7(%arg0: i32) -> (i32, i32, i32) {
    %c0_i32 = arith.constant 0 : i32
    %c0_i32_0 = arith.constant 0 : i32
    %c0_i32_1 = arith.constant 0 : i32
    %c0_i32_2 = arith.constant 0 : i32
    return %c0_i32, %c0_i32_0, %c0_i32_1 : i32, i32, i32
  }
  func.func @transform_8(%arg0: i32) -> (i32, i32, i32) {
    %c0_i32 = arith.constant 0 : i32
    %c0_i32_0 = arith.constant 0 : i32
    %c0_i32_1 = arith.constant 0 : i32
    %c0_i32_2 = arith.constant 0 : i32
    return %c0_i32, %c0_i32_0, %c0_i32_1 : i32, i32, i32
  }
  func.func @transform_9(%arg0: i32) -> (i32, i32, i32) {
    %c0_i32 = arith.constant 0 : i32
    %c0_i32_0 = arith.constant 0 : i32
    %c0_i32_1 = arith.constant 0 : i32
    %c0_i32_2 = arith.constant 0 : i32
    return %c0_i32, %c0_i32_0, %c0_i32_1 : i32, i32, i32
  }
  func.func @transform_10(%arg0: i32) -> (i32, i32, i32) {
    %c0_i32 = arith.constant 0 : i32
    %c0_i32_0 = arith.constant 0 : i32
    %c0_i32_1 = arith.constant 0 : i32
    %c0_i32_2 = arith.constant 0 : i32
    return %c0_i32, %c0_i32_0, %c0_i32_1 : i32, i32, i32
  }
  func.func @transform_11(%arg0: i32) -> (i32, i32, i32) {
    %c0_i32 = arith.constant 0 : i32
    %c0_i32_0 = arith.constant 0 : i32
    %c0_i32_1 = arith.constant 0 : i32
    %c0_i32_2 = arith.constant 0 : i32
    return %c0_i32, %c0_i32_0, %c0_i32_1 : i32, i32, i32
  }
  func.func @transform_12(%arg0: i32) -> (i32, i32) {
    %c0_i32 = arith.constant 0 : i32
    %c0_i32_0 = arith.constant 0 : i32
    %c0_i32_1 = arith.constant 0 : i32
    return %c0_i32, %c0_i32_0 : i32, i32
  }
  func.func @transform_13(%arg0: i32) -> (i32, i32) {
    %c0_i32 = arith.constant 0 : i32
    %c0_i32_0 = arith.constant 0 : i32
    %c0_i32_1 = arith.constant 0 : i32
    return %c0_i32, %c0_i32_0 : i32, i32
  }
  func.func @transform_14(%arg0: i32) -> (i32, i32) {
    %c0_i32 = arith.constant 0 : i32
    %c0_i32_0 = arith.constant 0 : i32
    %c0_i32_1 = arith.constant 0 : i32
    return %c0_i32, %c0_i32_0 : i32, i32
  }
  func.func @transform_15(%arg0: i32) -> (i32, i32) {
    %c0_i32 = arith.constant 0 : i32
    %c0_i32_0 = arith.constant 0 : i32
    %c0_i32_1 = arith.constant 0 : i32
    return %c0_i32, %c0_i32_0 : i32, i32
  }
  func.func @transform_16(%arg0: i32) -> (i32, i32) {
    %c0_i32 = arith.constant 0 : i32
    %c0_i32_0 = arith.constant 0 : i32
    %c0_i32_1 = arith.constant 0 : i32
    return %c0_i32, %c0_i32_0 : i32, i32
  }
  func.func @transform_17(%arg0: i32) -> (i32, i32) {
    %c0_i32 = arith.constant 0 : i32
    %c0_i32_0 = arith.constant 0 : i32
    %c0_i32_1 = arith.constant 0 : i32
    return %c0_i32, %c0_i32_0 : i32, i32
  }
  func.func @transform_18(%arg0: i32) -> (i32, i32) {
    %c0_i32 = arith.constant 0 : i32
    %c0_i32_0 = arith.constant 0 : i32
    return %arg0, %c0_i32 : i32, i32
  }
}

</mosaic_0001>

<bundles_post_ra>
// kernel: transformer_net_forward.1
= control target key start
LH: loop header
LB: loop body
LE: loop exit
PB: predicated region body
PF: predicated region fallthrough
CT: control target
= control target key end

     0   :  { %vm92_vm0 = vcmask 130048   ;;  %s7508_s1 = inlined_call_operand.vmem [shape: f32[8,3], index: 1, kind: input, shape index: {}]   ;;  %s7509_s2 = inlined_call_operand.vmem [shape: f32[64,64], index: 2, kind: input, shape index: {}]   ;;  %s7510_s3 = inlined_call_operand.vmem [shape: bf16[16,128], index: 3, kind: input, shape index: {}]   ;;  %s7511_s5 = inlined_call_operand.vmem [shape: bf16[4,128,384], index: 5, kind: input, shape index: {}]   ;;  %s7512_s6 = inlined_call_operand.vmem [shape: f32[4,1,384], index: 6, kind: input, shape index: {}]   ;;  %s7513_s7 = inlined_call_operand.vmem [shape: bf16[4,128,128], index: 7, kind: input, shape index: {}]   ;;  %s7514_s8 = inlined_call_operand.vmem [shape: f32[4,6,128], index: 8, kind: input, shape index: {}]   ;;  %s7515_s9 = inlined_call_operand.vmem [shape: bf16[4,128,256], index: 9, kind: input, shape index: {}]   ;;  %s7516_s10 = inlined_call_operand.vmem [shape: f32[4,1,256], index: 10, kind: input, shape index: {}]   ;;  %s7517_s11 = inlined_call_operand.vmem [shape: bf16[4,256,128], index: 11, kind: input, shape index: {}]   ;;  %s7518_s12 = inlined_call_operand.vmem [shape: bf16[3,128], index: 12, kind: input, shape index: {}]   ;;  %s7519_s13 = inlined_call_operand.vmem [shape: f32[1,128], index: 13, kind: input, shape index: {}]   ;;  %s7520_s14 = inlined_call_operand.vmem [shape: bf16[256,256], index: 14, kind: input, shape index: {}]   ;;  %s7521_s15 = inlined_call_operand.vmem [shape: f32[1,256], index: 15, kind: input, shape index: {}]   ;;  %s7522_s16 = inlined_call_operand.vmem [shape: bf16[256,128], index: 16, kind: input, shape index: {}]   ;;  %s7523_s17 = inlined_call_operand.vmem [shape: f32[1,128], index: 17, kind: input, shape index: {}]   ;;  %s7524_s18 = inlined_call_operand.vmem [shape: f32[8,128], index: 18, kind: output, shape index: {}]   ;;  %s7525_s0 = inlined_call_operand.vmem [shape: f32[64,16], index: 0, kind: input, shape index: {}]   ;;  %s7526_s4 = inlined_call_operand.vmem [shape: f32[1,128], index: 4, kind: input, shape index: {}]  }
   0x1   :  { %7566 = sst [smem:[#allocation39_spill]] %s7508_s1  ;;  %v68_v9 = vld [vmem:[%s7525_s0] sm:$0xff]  ;;  %v69_v10 = vld [vmem:[%s7525_s0 + $0x8] sm:$0xff]  ;;  %v70_v11 = vld [vmem:[%s7525_s0 + $0x10] sm:$0xff] }
   0x2   :  { %7567 = sst [smem:[#allocation40_spill]] %s7509_s2  ;;  %v76_v12 = vpack.c.bf16 %v69_v10, %v68_v9  ;;  %v71_v13 = vld [vmem:[%s7525_s0 + $0x18] sm:$0xff]  ;;  %v72_v14 = vld [vmem:[%s7525_s0 + $0x20] sm:$0xff]  ;;  %v73_v15 = vld [vmem:[%s7525_s0 + $0x28] sm:$0xff] }
   0x3   :  { %7568 = sst [smem:[#allocation41_spill]] %s7510_s3  ;;  %v77_v16 = vpack.c.bf16 %v71_v13, %v70_v11  ;;  %v78_v17 = vpack.c.bf16 %v73_v15, %v72_v14  ;;  %v74_v18 = vld [vmem:[%s7525_s0 + $0x30] sm:$0xff]  ;;  %v75_v19 = vld [vmem:[%s7525_s0 + $0x38] sm:$0xff]  ;;  %v4707_v21 = vld [vmem:[%s7526_s4] ss:$0 sm:$0xff]  ;;  %s5270_s0 = smov 0  }
   0x4   :  { %s7569_s29 = sld [smem:[#allocation40_spill]]  ;;  %v79_v20 = vpack.c.bf16 %v75_v19, %v74_v18 }
   0x5   :  { %s7578_s19 = sld [smem:[#allocation41_spill]] }
   0xa   :  { %v5183_v0 = vld [vmem:[%s7569_s29] sm:$0xff]  ;;  %v5188_v1 = vld [vmem:[%s7569_s29 + $0x8] sm:$0xff]  ;;  %v5193_v2 = vld [vmem:[%s7569_s29 + $0x10] sm:$0xff] }
   0xb   :  { %7570 = vst [vmem:[#allocation2_spill] sm:$0xff] %v5183_v0  ;;  %v5198_v3 = vld [vmem:[%s7569_s29 + $0x18] sm:$0xff]  ;;  %v5203_v4 = vld [vmem:[%s7569_s29 + $0x20] sm:$0xff]  ;;  %v5208_v5 = vld [vmem:[%s7569_s29 + $0x28] sm:$0xff] }
   0xc   :  { %7571 = vst [vmem:[#allocation3_spill] sm:$0xff] %v5188_v1  ;;  %v5213_v6 = vld [vmem:[%s7569_s29 + $0x30] sm:$0xff]  ;;  %v5218_v7 = vld [vmem:[%s7569_s29 + $0x38] sm:$0xff]  ;;  %v4505_v8 = vld [vmem:[%s7578_s19] sm:$0xff] }
   0xd   :  { %7572 = vst [vmem:[#allocation4_spill] sm:$0xff] %v5193_v2  ;;  %112 = vmatpush.bf16.msra.mxu0 %v4505_v8  ;;  %4622 = vmatpush.bf16.msra.mxu1 %v4505_v8 }
   0xe   :  { %7573 = vst [vmem:[#allocation5_spill] sm:$0xff] %v5198_v3  ;;  %4623 = vmatpush.bf16.msra.mxu2 %v4505_v8  ;;  %4624 = vmatpush.bf16.msra.mxu3 %v4505_v8 }
   0xf   :  { %7574 = vst [vmem:[#allocation6_spill] sm:$0xff] %v5203_v4 }
  0x10   :  { %7575 = vst [vmem:[#allocation7_spill] sm:$0xff] %v5208_v5  ;;  %3980 = vmatmul.msk.bf16.vlgmr.msra.gmra.mxu0 %vm92_vm0, %v76_v12  ;;  %3981 = vmatmul.msk.bf16.vlgmr.msra.gmra.mxu1 %vm92_vm0, %v77_v16 }
  0x11   :  { %7576 = vst [vmem:[#allocation8_spill] sm:$0xff] %v5213_v6  ;;  %3982 = vmatmul.msk.bf16.vlgmr.msra.gmra.mxu2 %vm92_vm0, %v78_v17  ;;  %3983 = vmatmul.msk.bf16.vlgmr.msra.gmra.mxu3 %vm92_vm0, %v79_v20 }
  0x12   :  { %7577 = vst [vmem:[#allocation9_spill] sm:$0xff] %v5218_v7 }
  0x8d   :  { %v114_v22 = vpop.f32.mrf.mxu0  ;;  %v119_v23 = vpop.f32.mrf.mxu1 }
  0x8e   :  { %v115_v24 = vadd.f32 %v4707_v21, %v114_v22   ;;  %v120_v25 = vadd.f32 %v4707_v21, %v119_v23  }
  0x94   :  { %v124_v26 = vpop.f32.mrf.mxu2  ;;  %v129_v27 = vpop.f32.mrf.mxu3 }
  0x95   :  { %v125_v28 = vadd.f32 %v4707_v21, %v124_v26   ;;  %v130_v29 = vadd.f32 %v4707_v21, %v129_v27   ;;  %v116_v30 = vpop.f32.mrf.mxu0  ;;  %v121_v31 = vpop.f32.mrf.mxu1 }
  0x96   :  { %v117_v32 = vadd.f32 %v4707_v21, %v116_v30   ;;  %v122_v33 = vadd.f32 %v4707_v21, %v121_v31  }
  0x9c   :  { %v126_v34 = vpop.f32.mrf.mxu2  ;;  %v131_v35 = vpop.f32.mrf.mxu3 }
  0x9d   :  { %v127_v36 = vadd.f32 %v4707_v21, %v126_v34   ;;  %v132_v37 = vadd.f32 %v4707_v21, %v131_v35  }
  0x9e LB: > { %v7579_v7 = vld [vmem:[#allocation9_spill] sm:$0xff]  ;;  %v7580_v6 = vld [vmem:[#allocation8_spill] sm:$0xff]  ;;  %v7581_v5 = vld [vmem:[#allocation7_spill] sm:$0xff]  ;;  %7585 = vst [vmem:[#allocation10_spill] sm:$0xff] %v5041_v37  ;;  %s4506_s4 = smul.u32 192, %s5073_s0  ;;  %s5075_s27 = smov 80   ;;  %v5061_v25 = vphi %v120_v25, %v7677_v25   ;;  %v5057_v33 = vphi %v122_v33, %v7676_v33   ;;  %v5053_v28 = vphi %v125_v28, %v7675_v28   ;;  %v5049_v36 = vphi %v127_v36, %v7674_v36   ;;  %v5045_v29 = vphi %v130_v29, %v7673_v29   ;;  %v5041_v37 = vphi %v132_v37, %v7672_v37   ;;  %s5073_s0 = sphi %s5270_s0, %s139_s0   ;;  %v5069_v24 = vphi %v115_v24, %v7679_v24   ;;  %v5065_v32 = vphi %v117_v32, %v7678_v32  }
  0x9f   : > { %v7582_v2 = vld [vmem:[#allocation4_spill] sm:$0xff]  ;;  %v7583_v1 = vld [vmem:[#allocation3_spill] sm:$0xff]  ;;  %v7584_v0 = vld [vmem:[#allocation2_spill] sm:$0xff]  ;;  %7586 = vst [vmem:[#allocation11_spill] sm:$0xff] %v5045_v29  ;;  %s183_s29 = smul.u32 3, %s5073_s0  ;;  %s5076_s28 = smov 112  }
  0xa0   : > { %7587 = vst [vmem:[#allocation12_spill] sm:$0xff] %v5049_v36  ;;  %s5303_s23 = scalar_lea.vmem %s7511_s5, %s4506_s4  ;;  %s5077_s30 = smov 64   ;;  %vm591_vm1 = vcmask 523264   ;;  %v7602_v3 = vld [vmem:[#allocation5_spill] sm:$0xff]  ;;  %v7603_v4 = vld [vmem:[#allocation6_spill] sm:$0xff]  ;;  %vm2539_vm2 = vcmask 261120  }
  0xa1   : > { %7588 = vst [vmem:[#allocation13_spill] sm:$0xff] %v5053_v28  ;;  %v4078_v38 = vld [vmem:[%s5303_s23 + $0xa8] sm:$0xf]  ;;  %v4529_v39 = vld [vmem:[%s5303_s23 + $0xb0] sm:$0xf0]  ;;  %s184_s26 = scalar_lea.vmem %s7512_s6, %s183_s29  ;;  %s5078_s1 = smov 96  }
  0xa2   : > { %7589 = vst [vmem:[#allocation14_spill] sm:$0xff] %v5057_v33  ;;  %v4528_v40 = vld [vmem:[%s5303_s23 + $0xac] sm:$0xf]  ;;  %v4079_v41 = vor.u32 %v4529_v39, %v4078_v38  ;;  %v4080_v42 = vld [vmem:[%s5303_s23 + $0xb4] sm:$0xf0]  ;;  %s5079_s19 = smov 48  }
  0xa3   : > { %7590 = vst [vmem:[#allocation15_spill] sm:$0xff] %v5061_v25  ;;  %v4086_v43 = vld [vmem:[%s5303_s23 + $0xb0] sm:$0xf]  ;;  %v4530_v44 = vld [vmem:[%s5303_s23 + $0xb8] sm:$0xf0]  ;;  %v4083_v45 = vor.u32 %v4528_v40, %v4080_v42  ;;  %s5080_s2 = smov 32  }
  0xa4   : > { %7591 = vst [vmem:[#allocation16_spill] sm:$0xff] %v5065_v32  ;;  %v4087_v46 = vor.u32 %v4530_v44, %v4086_v43  ;;  %v4066_v47 = vld [vmem:[%s5303_s23 + $0x90] sm:$0xf]  ;;  %v4526_v48 = vld [vmem:[%s5303_s23 + $0x98] sm:$0xf0]  ;;  %403 = vmatpush.bf16.msra.mxu0 %v4079_v41  ;;  %s5081_s20 = smov 16  }
  0xa5   : > { %7592 = vst [vmem:[#allocation17_spill] sm:$0xff] %v5069_v24  ;;  %v4525_v49 = vld [vmem:[%s5303_s23 + $0x94] sm:$0xf]  ;;  %v4067_v50 = vor.u32 %v4526_v48, %v4066_v47  ;;  %v4068_v51 = vld [vmem:[%s5303_s23 + $0x9c] sm:$0xf0]  ;;  %432 = vmatpush.bf16.msra.mxu1 %v4083_v45  ;;  %s4531_s21 = sshll.u32 %s5073_s0, 6 }
  0xa6   : > { %v4074_v52 = vld [vmem:[%s5303_s23 + $0x98] sm:$0xf]  ;;  %v4527_v53 = vld [vmem:[%s5303_s23 + $0xa0] sm:$0xf0]  ;;  %461 = vmatpush.bf16.msra.mxu2 %v4087_v46  ;;  %v4071_v54 = vor.u32 %v4525_v49, %v4068_v51  ;;  %v4522_v58 = vld [vmem:[%s5303_s23 + $0x7c] sm:$0xf]  ;;  %s6819_s3 = scalar_lea.vmem %s7513_s7, %s4531_s21 }
  0xa7   : > { %v4075_v55 = vor.u32 %v4527_v53, %v4074_v52  ;;  %v4054_v56 = vld [vmem:[%s5303_s23 + $0x78] sm:$0xf]  ;;  %v4523_v57 = vld [vmem:[%s5303_s23 + $0x80] sm:$0xf0]  ;;  %v4056_v59 = vld [vmem:[%s5303_s23 + $0x84] sm:$0xf0] }
  0xa8   : > { %v4062_v60 = vld [vmem:[%s5303_s23 + $0x80] sm:$0xf]  ;;  %v4524_v61 = vld [vmem:[%s5303_s23 + $0x88] sm:$0xf0]  ;;  %404 = vmatpush.bf16.msra.mxu0 %v4067_v50  ;;  %v4055_v62 = vor.u32 %v4523_v57, %v4054_v56  ;;  %v4059_v63 = vor.u32 %v4522_v58, %v4056_v59  ;;  %v4519_v11 = vld [vmem:[%s5303_s23 + $0x64] sm:$0xf] }
  0xa9   : > { %433 = vmatpush.bf16.msra.mxu1 %v4071_v54  ;;  %v4063_v8 = vor.u32 %v4524_v61, %v4062_v60  ;;  %v4042_v9 = vld [vmem:[%s5303_s23 + $0x60] sm:$0xf]  ;;  %v4520_v10 = vld [vmem:[%s5303_s23 + $0x68] sm:$0xf0]  ;;  %v4044_v12 = vld [vmem:[%s5303_s23 + $0x6c] sm:$0xf0] }
  0xaa   : > { %462 = vmatpush.bf16.msra.mxu2 %v4075_v55  ;;  %v4050_v13 = vld [vmem:[%s5303_s23 + $0x68] sm:$0xf]  ;;  %v4521_v14 = vld [vmem:[%s5303_s23 + $0x70] sm:$0xf0]  ;;  %v4043_v15 = vor.u32 %v4520_v10, %v4042_v9  ;;  %v4047_v16 = vor.u32 %v4519_v11, %v4044_v12  ;;  %v4516_v20 = vld [vmem:[%s5303_s23 + $0x4c] sm:$0xf]  ;;  %v267_v9 = vpack.c.bf16 %v5041_v37, %v5045_v29 }
  0xab   : > { %v4051_v17 = vor.u32 %v4521_v14, %v4050_v13  ;;  %v4030_v18 = vld [vmem:[%s5303_s23 + $0x48] sm:$0xf]  ;;  %v4517_v19 = vld [vmem:[%s5303_s23 + $0x50] sm:$0xf0]  ;;  %v4032_v21 = vld [vmem:[%s5303_s23 + $0x54] sm:$0xf0] }
  0xac   : > { %405 = vmatpush.bf16.msra.mxu0 %v4055_v62  ;;  %v4038_v22 = vld [vmem:[%s5303_s23 + $0x50] sm:$0xf]  ;;  %v4518_v23 = vld [vmem:[%s5303_s23 + $0x58] sm:$0xf0]  ;;  %v4031_v26 = vor.u32 %v4517_v19, %v4030_v18  ;;  %v4035_v27 = vor.u32 %v4516_v20, %v4032_v21  ;;  %v4513_v35 = vld [vmem:[%s5303_s23 + $0x34] sm:$0xf]  ;;  %v264_v62 = vpack.c.bf16 %v5065_v32, %v5069_v24 }
  0xad   : > { %434 = vmatpush.bf16.msra.mxu1 %v4059_v63  ;;  %v4039_v30 = vor.u32 %v4518_v23, %v4038_v22  ;;  %v4018_v31 = vld [vmem:[%s5303_s23 + $0x30] sm:$0xf]  ;;  %v4514_v34 = vld [vmem:[%s5303_s23 + $0x38] sm:$0xf0]  ;;  %v4020_v38 = vld [vmem:[%s5303_s23 + $0x3c] sm:$0xf0]  ;;  %v265_v63 = vpack.c.bf16 %v5057_v33, %v5061_v25 }
  0xae   : > { %463 = vmatpush.bf16.msra.mxu2 %v4063_v8  ;;  %v4026_v39 = vld [vmem:[%s5303_s23 + $0x38] sm:$0xf]  ;;  %v4515_v40 = vld [vmem:[%s5303_s23 + $0x40] sm:$0xf0]  ;;  %v4019_v41 = vor.u32 %v4514_v34, %v4018_v31  ;;  %v4023_v42 = vor.u32 %v4513_v35, %v4020_v38  ;;  %v4510_v46 = vld [vmem:[%s5303_s23 + $0x1c] sm:$0xf]  ;;  %v266_v8 = vpack.c.bf16 %v5049_v36, %v5053_v28 }
  0xaf   : > { %v4027_v43 = vor.u32 %v4515_v40, %v4026_v39  ;;  %v4006_v44 = vld [vmem:[%s5303_s23 + $0x18] sm:$0xf]  ;;  %v4511_v45 = vld [vmem:[%s5303_s23 + $0x20] sm:$0xf0]  ;;  %v4008_v47 = vld [vmem:[%s5303_s23 + $0x24] sm:$0xf0] }
  0xb0   : > { %406 = vmatpush.bf16.msra.mxu0 %v4043_v15  ;;  %v4014_v48 = vld [vmem:[%s5303_s23 + $0x20] sm:$0xf]  ;;  %v4512_v49 = vld [vmem:[%s5303_s23 + $0x28] sm:$0xf0]  ;;  %v4007_v50 = vor.u32 %v4511_v45, %v4006_v44  ;;  %v4011_v51 = vor.u32 %v4510_v46, %v4008_v47  ;;  %v4507_v55 = vld [vmem:[%s5303_s23 + $0x4] sm:$0xf] }
  0xb1   : > { %435 = vmatpush.bf16.msra.mxu1 %v4047_v16  ;;  %v4015_v52 = vor.u32 %v4512_v49, %v4014_v48  ;;  %v3994_v53 = vld [vmem:[%s5303_s23] sm:$0xf]  ;;  %v4508_v54 = vld [vmem:[%s5303_s23 + $0x8] sm:$0xf0]  ;;  %v3996_v56 = vld [vmem:[%s5303_s23 + $0xc] sm:$0xf0] }
  0xb2   : > { %464 = vmatpush.bf16.msra.mxu2 %v4051_v17  ;;  %v4002_v57 = vld [vmem:[%s5303_s23 + $0x8] sm:$0xf]  ;;  %v4509_v58 = vld [vmem:[%s5303_s23 + $0x10] sm:$0xf0]  ;;  %v3995_v59 = vor.u32 %v4508_v54, %v3994_v53  ;;  %v3999_v60 = vor.u32 %v4507_v55, %v3996_v56  ;;  %v185_v10 = vld [vmem:[%s184_s26] sm:$0x7] }
  0xb3   : > { %v4003_v61 = vor.u32 %v4509_v58, %v4002_v57  ;;  %v5365_v13 = vperm.slane %v185_v10, 0  ;;  %v5367_v14 = vperm.slane %v185_v10, 1  ;;  %vm2548_vm3 = vcmask 392192   ;;  %s3987_s23 = sshll.u32 %s5073_s0, 3  ;;  %s4540_s26 = sshll.u32 %s5073_s0, 7 }
  0xb4   : > { %407 = vmatpush.bf16.msra.mxu0 %v4031_v26  ;;  %vm2565_vm4 = vcmask 654336   ;;  %vm2574_vm5 = vcmask 785408   ;;  %vm2583_vm6 = vcmask 916480   ;;  %s6913_s25 = scalar_lea.vmem %s7514_s8, %s3987_s23 }
  0xb5   : > { %436 = vmatpush.bf16.msra.mxu1 %v4035_v27 }
  0xb6   : > { %465 = vmatpush.bf16.msra.mxu2 %v4039_v30 }
  0xb8   : > { %408 = vmatpush.bf16.msra.mxu0 %v4019_v41  ;;  %v5383_v41 = vperm.slane %v185_v10, 2 }
  0xb9   : > { %437 = vmatpush.bf16.msra.mxu1 %v4023_v42 }
  0xba   : > { %466 = vmatpush.bf16.msra.mxu2 %v4027_v43 }
  0xbc   : > { %409 = vmatpush.bf16.msra.mxu0 %v4007_v50 }
  0xbd   : > { %438 = vmatpush.bf16.msra.mxu1 %v4011_v51 }
  0xbe   : > { %467 = vmatpush.bf16.msra.mxu2 %v4015_v52 }
  0xc0   : > { %410 = vmatpush.bf16.msra.mxu0 %v3995_v59 }
  0xc1   : > { %439 = vmatpush.bf16.msra.mxu1 %v3999_v60 }
  0xc2   : > { %468 = vmatpush.bf16.msra.mxu2 %v4003_v61 }
  0xc3   : > { %411 = vmatmul.bf16.vlgmr.msra.gmra.mxu0 %v264_v62 }
  0xc4   : > { %440 = vmatmul.bf16.vlgmr.msra.gmra.mxu1 %v264_v62 }
  0xc5   : > { %469 = vmatmul.bf16.vlgmr.msra.gmra.mxu2 %v264_v62 }
  0xd3   : > { %416 = vmatmul.bf16.gmra.mxu0 %v265_v63 }
  0xd4   : > { %445 = vmatmul.bf16.gmra.mxu1 %v265_v63 }
  0xd5   : > { %474 = vmatmul.bf16.gmra.mxu2 %v265_v63 }
  0xe3   : > { %421 = vmatmul.bf16.gmra.mxu0 %v266_v8 }
  0xe4   : > { %450 = vmatmul.bf16.gmra.mxu1 %v266_v8 }
  0xe5   : > { %479 = vmatmul.bf16.gmra.mxu2 %v266_v8 }
  0xf3   : > { %426 = vmatmul.bf16.gmra.mxu0 %v267_v9 }
  0xf4   : > { %455 = vmatmul.bf16.gmra.mxu1 %v267_v9 }
  0xf5   : > { %484 = vmatmul.bf16.gmra.mxu2 %v267_v9 }
 0x140   : > { %v412_v11 = vpop.f32.mrf.mxu0 }
 0x141   : > { %v441_v12 = vpop.f32.mrf.mxu1  ;;  %v413_v15 = vadd.f32 %v412_v11, %v5365_v13 }
 0x142   : > { %v442_v16 = vadd.f32 %v441_v12, %v5367_v14 }
 0x144   : > { %v490_v21 = vpack.c.bf16 %v442_v16, %v413_v15 }
 0x146   : > { %v514_v26 = vunpack.c.l.b16 %v490_v21  ;;  %v526_v27 = vunpack.c.h.b16 %v490_v21 }
 0x148   : > { %v470_v17 = vpop.f32.mrf.mxu2  ;;  %v414_v18 = vpop.f32.mrf.mxu0 }
 0x149   : > { %v415_v19 = vadd.f32 %v414_v18, %v5365_v13  ;;  %v443_v20 = vpop.f32.mrf.mxu1  ;;  %v471_v44 = vadd.f32 %v470_v17, %v5383_v41 }
 0x14a   : > { %v444_v22 = vadd.f32 %v443_v20, %v5367_v14 }
 0x14b   : > { %v491_v47 = vpack.c.bf16 %v471_v44, %v471_v44 }
 0x14c   : > { %v492_v23 = vpack.c.bf16 %v444_v22, %v415_v19 }
 0x14d   : > { %v684_v51 = vunpack.c.l.b16 %v491_v47 }
 0x14e   : > { %v515_v30 = vunpack.c.l.b16 %v492_v23  ;;  %v527_v31 = vunpack.c.h.b16 %v492_v23 }
 0x150   : > { %v472_v34 = vpop.f32.mrf.mxu2  ;;  %v5373_v35 = vpack.c.b16 %v515_v30, %v514_v26  ;;  %v5375_v38 = vpack.c.b16 %v527_v31, %v526_v27  ;;  %v417_v39 = vpop.f32.mrf.mxu0 }
 0x151   : > { %v446_v40 = vpop.f32.mrf.mxu1  ;;  %v473_v46 = vadd.f32 %v472_v34, %v5383_v41  ;;  %v418_v52 = vadd.f32 %v417_v39, %v5365_v13 }
 0x152   : > { %1209 = vrot.lane.b32.xlu0 %v5375_v38, %s5075_s27  ;;  %765 = vrot.lane.b32.xlu1 %v5375_v38, %s5076_s28  ;;  %v447_v55 = vadd.f32 %v446_v40, %v5367_v14 }
 0x153   : > { %757 = vrot.lane.b32.xlu2 %v5373_v35, %s5076_s28  ;;  %v493_v48 = vpack.c.bf16 %v473_v46, %v473_v46 }
 0x154   : > { %v494_v59 = vpack.c.bf16 %v447_v55, %v418_v52 }
 0x155   : > { %v685_v54 = vunpack.c.l.b16 %v493_v48 }
 0x156   : > { %v528_v8 = vunpack.c.h.b16 %v494_v59  ;;  %v516_v16 = vunpack.c.l.b16 %v494_v59 }
 0x157   : > { %v5407_v58 = vpack.c.b16 %v685_v54, %v684_v51 }
 0x158   : > { %v5385_v42 = vpop.f32.mrf.mxu2  ;;  %v419_v43 = vpop.f32.mrf.mxu0 }
 0x159   : > { %v448_v45 = vpop.f32.mrf.mxu1  ;;  %v420_v56 = vadd.f32 %v419_v43, %v5365_v13  ;;  %7593 = vst [vmem:[#allocation18_spill] sm:$0xff] %v5407_v58 }
 0x15a   : > { %1431 = vrot.lane.b32.xlu0 %v5375_v38, %s5077_s30  ;;  %979 = vrot.lane.b32.xlu1 %v5373_v35, %s5078_s1  ;;  %v449_v57 = vadd.f32 %v448_v45, %v5367_v14 }
 0x15b   : > { %987 = vrot.lane.b32.xlu2 %v5375_v38, %s5078_s1 }
 0x15c   : > { %v496_v60 = vpack.c.bf16 %v449_v57, %v420_v56 }
 0x15e   : > { %v529_v9 = vunpack.c.h.b16 %v496_v60  ;;  %v517_v17 = vunpack.c.l.b16 %v496_v60 }
 0x160   : > { %v5395_v49 = vpop.f32.mrf.mxu2  ;;  %v422_v50 = vpop.f32.mrf.mxu0  ;;  %v5415_v10 = vpack.c.b16 %v529_v9, %v528_v8  ;;  %v5429_v27 = vpack.c.b16 %v517_v17, %v516_v16 }
 0x161   : > { %v451_v53 = vpop.f32.mrf.mxu1  ;;  %v423_v20 = vadd.f32 %v422_v50, %v5365_v13  ;;  %v478_v54 = vadd.f32 %v5395_v49, %v5383_v41 }
 0x162   : > { %1645 = vrot.lane.b32.xlu0 %v5373_v35, %s5079_s19  ;;  %1653 = vrot.lane.b32.xlu1 %v5375_v38, %s5079_s19  ;;  %v452_v21 = vadd.f32 %v451_v53, %v5367_v14 }
 0x163   : > { %1201 = vrot.lane.b32.xlu2 %v5373_v35, %s5075_s27 }
 0x164   : > { %v498_v44 = vpack.c.bf16 %v452_v21, %v423_v20 }
 0x166   : > { %v530_v55 = vunpack.c.h.b16 %v498_v44 }
 0x168   : > { %v480_v61 = vpop.f32.mrf.mxu2  ;;  %v424_v62 = vpop.f32.mrf.mxu0 }
 0x169   : > { %v453_v63 = vpop.f32.mrf.mxu1  ;;  %v425_v22 = vadd.f32 %v424_v62, %v5365_v13  ;;  %v481_v45 = vadd.f32 %v480_v61, %v5383_v41 }
 0x16a   : > { %1875 = vrot.lane.b32.xlu0 %v5375_v38, %s5080_s2  ;;  %910 = vrot.lane.b32.xlu1 %v5407_v58, %s5076_s28  ;;  %v454_v23 = vadd.f32 %v453_v63, %v5367_v14 }
 0x16b   : > { %1423 = vrot.lane.b32.xlu2 %v5373_v35, %s5077_s30  ;;  %v499_v56 = vpack.c.bf16 %v481_v45, %v481_v45 }
 0x16c   : > { %v500_v46 = vpack.c.bf16 %v454_v23, %v425_v22  ;;  %v554_v23 = vsel %vm92_vm0, %v5415_v10, 0 }
 0x16e   : > { %v531_v57 = vunpack.c.h.b16 %v500_v46 }
 0x170   : > { %v482_v11 = vpop.f32.mrf.mxu2  ;;  %v427_v12 = vpop.f32.mrf.mxu0 }
 0x171   : > { %v456_v15 = vpop.f32.mrf.mxu1  ;;  %v428_v18 = vadd.f32 %v427_v12, %v5365_v13  ;;  %v688_v12 = vunpack.c.l.b16 %v499_v56 }
 0x172   : > { %1867 = vrot.lane.b32.xlu0 %v5373_v35, %s5080_s2  ;;  %767 = vrot.lane.b32.xlu1 %v5415_v10, %s5076_s28  ;;  %v457_v19 = vadd.f32 %v456_v15, %v5367_v14  ;;  %v536_v15 = vpack.c.b16 %v531_v57, %v530_v55 }
 0x173   : > { %2097 = vrot.lane.b32.xlu2 %v5375_v38, %s5081_s20 }
 0x174   : > { %v502_v30 = vpack.c.bf16 %v457_v19, %v428_v18  ;;  %v557_v21 = vsel %vm92_vm0, %v536_v15, 0 }
 0x176   : > { %v520_v47 = vunpack.c.l.b16 %v502_v30  ;;  %v532_v48 = vunpack.c.h.b16 %v502_v30  ;;  %v518_v30 = vunpack.c.l.b16 %v498_v44 }
 0x178   : > { %v485_v26 = vpop.f32.mrf.mxu2  ;;  %v429_v31 = vpop.f32.mrf.mxu0 }
 0x179   : > { %v430_v34 = vadd.f32 %v429_v31, %v5365_v13  ;;  %v458_v39 = vpop.f32.mrf.mxu1  ;;  %v486_v40 = vadd.f32 %v485_v26, %v5383_v41  ;;  %v483_v13 = vadd.f32 %v482_v11, %v5383_v41  ;;  %v497_v11 = vpack.c.bf16 %v478_v54, %v478_v54 }
 0x17a   : > { %v459_v43 = vadd.f32 %v458_v39, %v5367_v14  ;;  %1211 = vrot.lane.b32.xlu1 %v5415_v10, %s5075_s27  ;;  %981 = vrot.lane.b32.xlu0 %v5429_v27, %s5078_s1  ;;  %v476_v14 = vadd.f32 %v5385_v42, %v5383_v41  ;;  %v551_v26 = vsel %vm92_vm0, %v5375_v38, 0  ;;  %v519_v31 = vunpack.c.l.b16 %v500_v46 }
 0x17b   : > { %2089 = vrot.lane.b32.xlu2 %v5373_v35, %s5081_s20  ;;  %v503_v51 = vpack.c.bf16 %v486_v40, %v486_v40  ;;  %v501_v60 = vpack.c.bf16 %v483_v13, %v483_v13  ;;  %v687_v19 = vunpack.c.l.b16 %v497_v11 }
 0x17c   : > { %v504_v50 = vpack.c.bf16 %v459_v43, %v430_v34  ;;  %v495_v49 = vpack.c.bf16 %v476_v14, %v476_v14  ;;  %v524_v34 = vpack.c.b16 %v519_v31, %v518_v30 }
 0x17d   : > { %v690_v8 = vunpack.c.l.b16 %v503_v51 }
 0x17e   : > { %v521_v52 = vunpack.c.l.b16 %v504_v50  ;;  %v533_v53 = vunpack.c.h.b16 %v504_v50  ;;  %v686_v18 = vunpack.c.l.b16 %v495_v49 }
 0x180   : > { %v487_v59 = vpop.f32.mrf.mxu2  ;;  %v5446_v61 = vpack.c.b16 %v521_v52, %v520_v47  ;;  %v5448_v62 = vpack.c.b16 %v533_v53, %v532_v48  ;;  %v5471_v22 = vpack.c.b16 %v687_v19, %v686_v18 }
 0x181   : > { %v488_v63 = vadd.f32 %v487_v59, %v5383_v41  ;;  %v689_v41 = vunpack.c.l.b16 %v501_v60 }
 0x182   : > { %1203 = vrot.lane.b32.xlu1 %v5429_v27, %s5075_s27  ;;  %1433 = vrot.lane.b32.xlu0 %v5415_v10, %s5077_s30  ;;  %v560_v42 = vsel %vm92_vm0, %v5448_v62, 0  ;;  %7596 = vst [vmem:[#allocation21_spill] sm:$0xff] %v5471_v22 }
 0x183   : > { %v505_v9 = vpack.c.bf16 %v488_v63, %v488_v63  ;;  %759 = vrot.lane.b32.xlu2 %v5429_v27, %s5076_s28  ;;  %566 = vmatpush.bf16.xpose.msra.mxu3 %v560_v42  ;;  %v5461_v20 = vpack.c.b16 %v689_v41, %v688_v12 }
 0x185   : > { %v691_v16 = vunpack.c.l.b16 %v505_v9  ;;  %7595 = vst [vmem:[#allocation20_spill] sm:$0xff] %v5461_v20 }
 0x187   : > { %v5459_v17 = vpack.c.b16 %v691_v16, %v690_v8 }
 0x189   : > { %7594 = vst [vmem:[#allocation19_spill] sm:$0xff] %v5459_v17  ;;  %716 = vmatpush.bf16.msrb.mxu0 %v5459_v17 }
 0x18a   : > { %1425 = vrot.lane.b32.xlu1 %v5429_v27, %s5077_s30  ;;  %1869 = vrot.lane.b32.xlu0 %v5429_v27, %s5080_s2 }
 0x18b   : > { %989 = vrot.lane.b32.xlu2 %v5415_v10, %s5078_s1  ;;  %567 = vmatpush.bf16.xpose.msra.mxu3 %v557_v21 }
 0x18d   : > { %717 = vmatpush.bf16.msrb.mxu0 %v5461_v20 }
 0x191   : > { %718 = vmatpush.bf16.msrb.mxu0 %v5471_v22 }
 0x192   : > { %912 = vrot.lane.b32.xlu1 %v5471_v22, %s5076_s28  ;;  %769 = vrot.lane.b32.xlu0 %v536_v15, %s5076_s28 }
 0x193   : > { %1655 = vrot.lane.b32.xlu2 %v5415_v10, %s5079_s19  ;;  %568 = vmatpush.bf16.xpose.msra.mxu3 %v554_v23 }
 0x195   : > { %719 = vmatpush.bf16.msrb.mxu0 %v5407_v58 }
 0x19a   : > { %1356 = vrot.lane.b32.xlu1 %v5471_v22, %s5075_s27  ;;  %991 = vrot.lane.b32.xlu0 %v536_v15, %s5078_s1 }
 0x19b   : > { %1647 = vrot.lane.b32.xlu2 %v5429_v27, %s5079_s19  ;;  %569 = vmatpush.bf16.xpose.msra.mxu3 %v551_v26 }
 0x1a2   : > { %1435 = vrot.lane.b32.xlu0 %v536_v15, %s5077_s30  ;;  %761 = vrot.lane.b32.xlu1 %v524_v34, %s5076_s28 }
 0x1a3   : > { %1877 = vrot.lane.b32.xlu2 %v5415_v10, %s5080_s2  ;;  %4088 = vmatmul.msk.bf16.vlgmr.msra.gmra.mxu3 %vm92_vm0, %v5373_v35 }
 0x1aa   : > { %1427 = vrot.lane.b32.xlu0 %v524_v34, %s5077_s30  ;;  %1213 = vrot.lane.b32.xlu1 %v536_v15, %s5075_s27 }
 0x1ab   : > { %2099 = vrot.lane.b32.xlu2 %v5415_v10, %s5081_s20 }
 0x1ad   : > { %v5500_v38 = vpop.permute.xlu2 %757 }
 0x1b2   : > { %2093 = vrot.lane.b32.xlu0 %v524_v34, %s5081_s20  ;;  %1205 = vrot.lane.b32.xlu1 %v524_v34, %s5075_s27 }
 0x1b3   : > { %2091 = vrot.lane.b32.xlu2 %v5429_v27, %s5081_s20  ;;  %4089 = vmatmul.msk.bf16.gmra.mxu3 %vm92_vm0, %v5429_v27 }
 0x1b5   : > { %v5508_v35 = vpop.permute.xlu2 %987 }
 0x1ba   : > { %1358 = vrot.lane.b32.xlu0 %v5461_v20, %s5075_s27  ;;  %1657 = vrot.lane.b32.xlu1 %v536_v15, %s5079_s19 }
 0x1bb   : > { %983 = vrot.lane.b32.xlu2 %v524_v34, %s5078_s1 }
 0x1bd   : > { %v5514_v10 = vpop.permute.xlu2 %1201 }
 0x1c2   : > { %1879 = vrot.lane.b32.xlu1 %v536_v15, %s5080_s2  ;;  %771 = vrot.lane.b32.xlu0 %v5448_v62, %s5076_s28 }
 0x1c3   : > { %1649 = vrot.lane.b32.xlu2 %v524_v34, %s5079_s19  ;;  %4090 = vmatmul.msk.bf16.gmra.mxu3 %vm92_vm0, %v524_v34 }
 0x1c4   : > { %v5521_v27 = vpop.permute.xlu0 %1209  ;;  %v5523_v39 = vpop.permute.xlu1 %765 }
 0x1c5   : > { %v5525_v40 = vpop.permute.xlu2 %1423 }
 0x1ca   : > { %1871 = vrot.lane.b32.xlu1 %v524_v34, %s5080_s2  ;;  %993 = vrot.lane.b32.xlu0 %v5448_v62, %s5078_s1 }
 0x1cb   : > { %2101 = vrot.lane.b32.xlu2 %v536_v15, %s5081_s20 }
 0x1cc   : > { %v5531_v43 = vpop.permute.xlu0 %1431  ;;  %v5533_v44 = vpop.permute.xlu1 %979 }
 0x1cd   : > { %v5535_v45 = vpop.permute.xlu2 %2097 }
 0x1d2   : > { %1207 = vrot.lane.b32.xlu1 %v5446_v61, %s5075_s27  ;;  %763 = vrot.lane.b32.xlu0 %v5446_v61, %s5076_s28 }
 0x1d3   : > { %914 = vrot.lane.b32.xlu2 %v5461_v20, %s5076_s28  ;;  %4091 = vmatmul.msk.bf16.gmra.mxu3 %vm92_vm0, %v5446_v61 }
 0x1d4   : > { %v5545_v46 = vpop.permute.xlu0 %1645  ;;  %v5547_v13 = vpop.permute.xlu1 %1653 }
 0x1d5   : > { %v5549_v47 = vpop.permute.xlu2 %2089 }
 0x1d6   : > { %7597 = vst [vmem:[#allocation22_spill] sm:$0xff] %v5549_v47 }
 0x1da   : > { %1881 = vrot.lane.b32.xlu1 %v5448_v62, %s5080_s2  ;;  %1437 = vrot.lane.b32.xlu0 %v5448_v62, %s5077_s30 }
 0x1db   : > { %1215 = vrot.lane.b32.xlu2 %v5448_v62, %s5075_s27 }
 0x1dc   : > { %v5557_v48 = vpop.permute.xlu0 %1875  ;;  %v5559_v50 = vpop.permute.xlu1 %910 }
 0x1dd   : > { %v5561_v14 = vpop.permute.xlu2 %759 }
 0x1e2   : > { %1429 = vrot.lane.b32.xlu1 %v5446_v61, %s5077_s30  ;;  %2103 = vrot.lane.b32.xlu0 %v5448_v62, %s5081_s20 }
 0x1e3   : > { %1659 = vrot.lane.b32.xlu2 %v5448_v62, %s5079_s19 }
 0x1e4   : > { %v5569_v51 = vpop.permute.xlu0 %1867  ;;  %v5571_v52 = vpop.permute.xlu1 %767 }
 0x1e5   : > { %v5573_v53 = vpop.permute.xlu2 %989 }
 0x1ea   : > { %1873 = vrot.lane.b32.xlu1 %v5446_v61, %s5080_s2  ;;  %2095 = vrot.lane.b32.xlu0 %v5446_v61, %s5081_s20 }
 0x1eb   : > { %985 = vrot.lane.b32.xlu2 %v5446_v61, %s5078_s1 }
 0x1ec   : > { %v5581_v54 = vpop.permute.xlu1 %1211  ;;  %v5583_v55 = vpop.permute.xlu0 %981 }
 0x1ed   : > { %v5585_v56 = vpop.permute.xlu2 %1655 }
 0x1f2   : > { %1354 = vrot.lane.b32.xlu1 %v5407_v58, %s5075_s27  ;;  %916 = vrot.lane.b32.xlu0 %v5459_v17, %s5076_s28 }
 0x1f3   : > { %1651 = vrot.lane.b32.xlu2 %v5446_v61, %s5079_s19 }
 0x1f4   : > { %v5593_v57 = vpop.permute.xlu1 %1203  ;;  %v5595_v59 = vpop.permute.xlu0 %1433 }
 0x1f5   : > { %v5597_v60 = vpop.permute.xlu2 %1647 }
 0x1fa   : > { %1132 = vrot.lane.b32.xlu1 %v5407_v58, %s5078_s1  ;;  %1138 = vrot.lane.b32.xlu0 %v5459_v17, %s5078_s1 }
 0x1fb   : > { %1360 = vrot.lane.b32.xlu2 %v5459_v17, %s5075_s27 }
 0x1fc   : > { %v5605_v62 = vpop.permute.xlu1 %1425  ;;  %v5607_v63 = vpop.permute.xlu0 %1869 }
 0x1fd   : > { %v5609_v61 = vpop.permute.xlu2 %1877 }
 0x202   : > { %1802 = vrot.lane.b32.xlu1 %v5461_v20, %s5079_s19  ;;  %1582 = vrot.lane.b32.xlu0 %v5459_v17, %s5077_s30 }
 0x203   : > { %1136 = vrot.lane.b32.xlu2 %v5461_v20, %s5078_s1 }
 0x204   : > { %v5617_v8 = vpop.permute.xlu1 %912  ;;  %v770_v9 = vpop.permute.xlu0 %769 }
 0x205   : > { %v5619_v42 = vpop.permute.xlu2 %2099 }
 0x20a   : > { %1800 = vrot.lane.b32.xlu1 %v5471_v22, %s5079_s19 }
 0x20b   : > { %1134 = vrot.lane.b32.xlu2 %v5471_v22, %s5078_s1 }
 0x20c   : > { %v5625_v49 = vpop.permute.xlu1 %1356  ;;  %v992_v11 = vpop.permute.xlu0 %991 }
 0x20d   : > { %v5627_v12 = vpop.permute.xlu2 %2091 }
 0x20e   : > { %7598 = vst [vmem:[#allocation23_spill] sm:$0xff] %v5627_v12 }
 0x212   : > { %1580 = vrot.lane.b32.xlu1 %v5461_v20, %s5077_s30 }
 0x213   : > { %1804 = vrot.lane.b32.xlu2 %v5459_v17, %s5079_s19 }
 0x214   : > { %v5633_v15 = vpop.permute.xlu0 %1435  ;;  %v5635_v41 = vpop.permute.xlu1 %761 }
 0x215   : > { %v5637_v16 = vpop.permute.xlu2 %983 }
 0x21a   : > { %1798 = vrot.lane.b32.xlu1 %v5407_v58, %s5079_s19 }
 0x21b   : > { %1576 = vrot.lane.b32.xlu2 %v5407_v58, %s5077_s30 }
 0x21c   : > { %v5643_v18 = vpop.permute.xlu0 %1427  ;;  %v5645_v19 = vpop.permute.xlu1 %1213 }
 0x21d   : > { %v5647_v21 = vpop.permute.xlu2 %1649 }
 0x21e   : > { %7599 = vst [vmem:[#allocation24_spill] sm:$0xff] %v5647_v21 }
 0x222   : > { %1578 = vrot.lane.b32.xlu1 %v5471_v22, %s5077_s30 }
 0x224   : > { %v5651_v23 = vpop.permute.xlu0 %2093  ;;  %v5653_v26 = vpop.permute.xlu1 %1205 }
 0x225   : > { %7600 = vst [vmem:[#allocation25_spill] sm:$0xff] %v5651_v23  ;;  %v5655_v30 = vpop.permute.xlu2 %2101  ;;  %v792_v23 = vsel %vm92_vm0, %v770_v9, 0  ;;  %v1014_v9 = vsel %vm92_vm0, %v992_v11, 0 }
 0x226   : > { %v571_v31 = vpop.f32.mrf.mxu3 }
 0x22c   : > { %v5657_v34 = vpop.permute.xlu0 %1358  ;;  %v5659_v37 = vpop.permute.xlu1 %1657 }
 0x22d   : > { %v5661_v36 = vpop.permute.xlu2 %914 }
 0x22e   : > { %v573_v29 = vpop.f32.mrf.mxu3 }
 0x22f   : > { %v5664_v28 = vadd.f32 %v573_v29, %v7583_v1 }
 0x231   : > { %v595_v33 = vsel %vm591_vm1, %v5664_v28, -inf }
 0x232   : > { %596 = vmax.xlane.f32.xlu0 %v595_v33  ;;  %v5676_v33 = vadd.f32 %v571_v31, %v7584_v0 }
 0x234   : > { %v5668_v25 = vpop.permute.xlu1 %1879  ;;  %v772_v32 = vpop.permute.xlu0 %771 }
 0x235   : > { %v795_v24 = vsel %vm92_vm0, %v772_v32, 0  ;;  %v1216_v58 = vpop.permute.xlu2 %1215  ;;  %v592_v32 = vsel %vm591_vm1, %v5676_v33, -inf }
 0x236   : > { %v576_v22 = vpop.f32.mrf.mxu3  ;;  %801 = vmatpush.bf16.xpose.msrb.mxu1 %v795_v24 }
 0x23c   : > { %v994_v20 = vpop.permute.xlu0 %993  ;;  %v5671_v17 = vpop.permute.xlu1 %1871 }
 0x23d   : > { %7601 = vst [vmem:[#allocation26_spill] sm:$0xff] %v5671_v17  ;;  %v1017_v29 = vsel %vm92_vm0, %v994_v20, 0  ;;  %v5678_v47 = vpop.permute.xlu2 %1659  ;;  %v789_v17 = vsel %vm92_vm0, %v5571_v52, 0 }
 0x23e   : > { %v578_v12 = vpop.f32.mrf.mxu3  ;;  %802 = vmatpush.bf16.xpose.msrb.mxu1 %v792_v23  ;;  %1023 = vmatpush.bf16.xpose.msrb.mxu3 %v1017_v29  ;;  %v5688_v23 = vadd.f32 %v576_v22, %v7582_v2 }
 0x23f   : > { %v5691_v31 = vadd.f32 %v578_v12, %v7602_v3  ;;  %v786_v12 = vsel %vm92_vm0, %v5523_v39, 0 }
 0x240   : > { %v598_v52 = vsel %vm591_vm1, %v5688_v23, -inf }
 0x244   : > { %593 = vmax.xlane.f32.xlu2 %v592_v32  ;;  %v5682_v24 = vpop.permute.xlu0 %763  ;;  %v5693_v29 = vpop.permute.xlu1 %1207 }
 0x245   : > { %v5704_v11 = vpop.permute.xlu2 %985 }
 0x246   : > { %v581_v20 = vpop.f32.mrf.mxu3  ;;  %803 = vmatpush.bf16.xpose.msrb.mxu1 %v789_v17  ;;  %1024 = vmatpush.bf16.xpose.msrb.mxu3 %v1014_v9  ;;  %v601_v17 = vsel %vm591_vm1, %v5691_v31, -inf  ;;  %v1011_v9 = vsel %vm92_vm0, %v5573_v53, 0 }
 0x247   : > { %v5696_v32 = vadd.f32 %v581_v20, %v7603_v4  ;;  %v1239_v20 = vsel %vm92_vm0, %v1216_v58, 0  ;;  %v1008_v58 = vsel %vm92_vm0, %v5508_v35, 0 }
 0x249   : > { %v604_v21 = vsel %vm591_vm1, %v5696_v32, -inf }
 0x24a   : > { %605 = vmax.xlane.f32.xlu0 %v604_v21 }
 0x24c   : > { %599 = vmax.xlane.f32.xlu2 %v598_v52  ;;  %602 = vmax.xlane.f32.xlu1 %v601_v17  ;;  %v1438_v22 = vpop.permute.xlu0 %1437  ;;  %v1882_v52 = vpop.permute.xlu1 %1881 }
 0x24d   : > { %v1461_v39 = vsel %vm92_vm0, %v1438_v22, 0 }
 0x24e   : > { %v583_v21 = vpop.f32.mrf.mxu3  ;;  %804 = vmatpush.bf16.xpose.msrb.mxu1 %v786_v12  ;;  %1025 = vmatpush.bf16.xpose.msrb.mxu3 %v1011_v9  ;;  %v1236_v12 = vsel %vm92_vm0, %v5645_v19, 0  ;;  %v5725_v9 = vpop.permute.xlu2 %1651  ;;  %v1233_v19 = vsel %vm92_vm0, %v5581_v54, 0  ;;  %v1455_v54 = vsel %vm92_vm0, %v5595_v59, 0 }
 0x24f   : > { %v5712_v4 = vadd.f32 %v583_v21, %v7581_v5 }
 0x251   : > { %v607_v17 = vsel %vm591_vm1, %v5712_v4, -inf }
 0x254   : > { %608 = vmax.xlane.f32.xlu1 %v607_v17  ;;  %v5716_v3 = vpop.permute.xlu0 %2103  ;;  %v5732_v21 = vpop.permute.xlu1 %1429  ;;  %v1458_v17 = vsel %vm92_vm0, %v5633_v15, 0  ;;  %v1683_v15 = vsel %vm92_vm0, %v5678_v47, 0  ;;  %v1680_v47 = vsel %vm92_vm0, %v5659_v37, 0 }
 0x255   : > { %4096 = vmatmul.msk.bf16.vlgmr.msrb.gmra.mxu1 %vm92_vm0, %v5500_v38 }
 0x256   : > { %1245 = vmatpush.bf16.xpose.msra.mxu1 %v1239_v20  ;;  %v586_v53 = vpop.f32.mrf.mxu3  ;;  %1026 = vmatpush.bf16.xpose.msrb.mxu3 %v1008_v58 }
 0x257   : > { %v5728_v20 = vadd.f32 %v586_v53, %v7580_v6 }
 0x259   : > { %v610_v38 = vsel %vm591_vm1, %v5728_v20, -inf }
 0x25a   : > { %611 = vmax.xlane.f32.xlu0 %v610_v38 }
 0x25c   : > { %v5734_v35 = vpop.permute.xlu0 %2095  ;;  %v5747_v38 = vpop.permute.xlu1 %1873 }
 0x25d   : > { %4104 = vmatmul.msk.bf16.vlgmr.msrb.gmra.mxu3 %vm92_vm0, %v5533_v44  ;;  %v1230_v44 = vsel %vm92_vm0, %v5521_v27, 0  ;;  %v1452_v27 = vsel %vm92_vm0, %v5531_v43, 0  ;;  %v1677_v43 = vsel %vm92_vm0, %v5585_v56, 0 }
 0x25e   : > { %1246 = vmatpush.bf16.xpose.msra.mxu1 %v1236_v12  ;;  %1467 = vmatpush.bf16.xpose.msra.mxu3 %v1461_v39  ;;  %v588_v22 = vpop.f32.mrf.mxu3  ;;  %v1361_v39 = vpop.permute.xlu2 %1360 }
 0x25f   : > { %v5743_v58 = vadd.f32 %v588_v22, %v7579_v7 }
 0x261   : > { %v613_v53 = vsel %vm591_vm1, %v5743_v58, -inf }
 0x262   : > { %614 = vmax.xlane.f32.xlu2 %v613_v53 }
 0x264   : > { %v917_v12 = vpop.permute.xlu0 %916  ;;  %v1355_v59 = vpop.permute.xlu1 %1354 }
 0x265   : > { %4097 = vmatmul.msk.bf16.gmra.mxu1 %vm92_vm0, %v5561_v14  ;;  %938 = vmatpush.bf16.msrb.mxu2 %v917_v12  ;;  %v1905_v14 = vsel %vm92_vm0, %v1882_v52, 0 }
 0x266   : > { %1247 = vmatpush.bf16.xpose.msra.mxu1 %v1233_v19  ;;  %1468 = vmatpush.bf16.xpose.msra.mxu3 %v1458_v17  ;;  %v1137_v22 = vpop.permute.xlu2 %1136 }
 0x269   : > { %939 = vmatpush.bf16.msrb.mxu2 %v5661_v36 }
 0x26c   : > { %v1139_v19 = vpop.permute.xlu0 %1138  ;;  %v1133_v37 = vpop.permute.xlu1 %1132 }
 0x26d   : > { %940 = vmatpush.bf16.msrb.mxu2 %v5617_v8  ;;  %4105 = vmatmul.msk.bf16.gmra.mxu3 %vm92_vm0, %v5583_v55  ;;  %v1902_v55 = vsel %vm92_vm0, %v5668_v25, 0  ;;  %v1899_v8 = vsel %vm92_vm0, %v5609_v61, 0  ;;  %v1896_v25 = vsel %vm92_vm0, %v5557_v48, 0  ;;  %v2124_v48 = vsel %vm92_vm0, %v5655_v30, 0 }
 0x26e   : > { %1248 = vmatpush.bf16.xpose.msra.mxu1 %v1230_v44  ;;  %1469 = vmatpush.bf16.xpose.msra.mxu3 %v1455_v54  ;;  %v1135_v36 = vpop.permute.xlu2 %1134 }
 0x26f   : > { %1160 = vmatpush.bf16.msra.mxu0 %v1139_v19 }
 0x271   : > { %941 = vmatpush.bf16.msrb.mxu2 %v5559_v50  ;;  %v1674_v50 = vsel %vm92_vm0, %v5547_v13, 0  ;;  %v2127_v13 = vsel %vm92_vm0, %v5716_v3, 0  ;;  %v2121_v3 = vsel %vm92_vm0, %v5619_v42, 0 }
 0x273   : > { %1161 = vmatpush.bf16.msra.mxu0 %v1137_v22 }
 0x274   : > { %v5787_v56 = vpop.permute.xlu1 %1802 }
 0x275   : > { %1382 = vmatpush.bf16.msra.mxu2 %v1361_v39  ;;  %4098 = vmatmul.msk.bf16.gmra.mxu1 %vm92_vm0, %v5635_v41 }
 0x276   : > { %1689 = vmatpush.bf16.xpose.msrb.mxu1 %v1683_v15  ;;  %1470 = vmatpush.bf16.xpose.msra.mxu3 %v1452_v27  ;;  %v5799_v41 = vpop.permute.xlu2 %1804 }
 0x277   : > { %1162 = vmatpush.bf16.msra.mxu0 %v1135_v36 }
 0x279   : > { %1383 = vmatpush.bf16.msra.mxu2 %v5657_v34 }
 0x27b   : > { %1163 = vmatpush.bf16.msra.mxu0 %v1133_v37 }
 0x27c   : > { %v5793_v61 = vpop.permute.xlu1 %1800 }
 0x27d   : > { %1384 = vmatpush.bf16.msra.mxu2 %v5625_v49  ;;  %4106 = vmatmul.msk.bf16.gmra.mxu3 %vm92_vm0, %v5637_v16 }
 0x27e   : > { %1690 = vmatpush.bf16.xpose.msrb.mxu1 %v1680_v47  ;;  %1911 = vmatpush.bf16.xpose.msrb.mxu3 %v1905_v14  ;;  %v1577_v30 = vpop.permute.xlu2 %1576 }
 0x281   : > { %1385 = vmatpush.bf16.msra.mxu2 %v1355_v59 }
 0x284   : > { %v1581_v49 = vpop.permute.xlu1 %1580 }
 0x285   : > { %4099 = vmatmul.msk.bf16.gmra.mxu1 %vm92_vm0, %v5682_v24 }
 0x286   : > { %1691 = vmatpush.bf16.xpose.msrb.mxu1 %v1677_v43  ;;  %1912 = vmatpush.bf16.xpose.msrb.mxu3 %v1902_v55 }
 0x28c   : > { %v5805_v16 = vpop.permute.xlu1 %1798 }
 0x28d   : > { %4107 = vmatmul.msk.bf16.gmra.mxu3 %vm92_vm0, %v5704_v11 }
 0x28e   : > { %1692 = vmatpush.bf16.xpose.msrb.mxu1 %v1674_v50  ;;  %1913 = vmatpush.bf16.xpose.msrb.mxu3 %v1899_v8 }
 0x295   : > { %4112 = vmatmul.msk.bf16.vlgmr.msra.gmra.mxu1 %vm92_vm0, %v5514_v10  ;;  %v1583_v10 = vpop.permute.xlu0 %1582 }
 0x296   : > { %1914 = vmatpush.bf16.xpose.msrb.mxu3 %v1896_v25  ;;  %2133 = vmatpush.bf16.xpose.msra.mxu1 %v2127_v13 }
 0x29d   : > { %4120 = vmatmul.msk.bf16.vlgmr.msra.gmra.mxu3 %vm92_vm0, %v5525_v40  ;;  %v2118_v40 = vsel %vm92_vm0, %v5535_v45, 0 }
 0x29e   : > { %2134 = vmatpush.bf16.xpose.msra.mxu1 %v2124_v48 }
 0x2a5   : > { %4113 = vmatmul.msk.bf16.gmra.mxu1 %vm92_vm0, %v5593_v57  ;;  %v597_v34 = vpop.xlane.xlu0 %596  ;;  %v1579_v57 = vpop.permute.xlu1 %1578 }
 0x2a6   : > { %2135 = vmatpush.bf16.xpose.msra.mxu1 %v2121_v3  ;;  %v617_v24 = vsub.f32 %v5664_v28, %v597_v34 }
 0x2a8   : > { %v626_v42 = vmul.f32 1.442695, %v617_v24 }
 0x2aa   : > { %4708 = vpow2.f32 %v626_v42 }
 0x2ad   : > { %4121 = vmatmul.msk.bf16.gmra.mxu3 %vm92_vm0, %v5605_v62 }
 0x2ae   : > { %2136 = vmatpush.bf16.xpose.msra.mxu1 %v2118_v40 }
 0x2b0   : > { %v5817_v39 = vpop.eup %4708 }
 0x2b1   : > { %7604 = vst [vmem:[#allocation27_spill] sm:$0xff] %v5817_v39 }
 0x2b5   : > { %4114 = vmatmul.msk.bf16.gmra.mxu1 %vm92_vm0, %v5653_v26 }
 0x2b7   : > { %v594_v11 = vpop.xlane.xlu2 %593 }
 0x2b8   : > { %v616_v52 = vsub.f32 %v5676_v33, %v594_v11 }
 0x2ba   : > { %v624_v17 = vmul.f32 1.442695, %v616_v52 }
 0x2bc   : > { %4710 = vpow2.f32 %v624_v17 }
 0x2bd   : > { %4122 = vmatmul.msk.bf16.gmra.mxu3 %vm92_vm0, %v5643_v18  ;;  %v606_v54 = vpop.xlane.xlu0 %605 }
 0x2be   : > { %v620_v27 = vsub.f32 %v5696_v32, %v606_v54 }
 0x2bf   : > { %v600_v45 = vpop.xlane.xlu2 %599  ;;  %v603_v62 = vpop.xlane.xlu1 %602 }
 0x2c0   : > { %v618_v28 = vsub.f32 %v5688_v23, %v600_v45  ;;  %v619_v26 = vsub.f32 %v5691_v31, %v603_v62 }
 0x2c2   : > { %v5820_v53 = vpop.eup %4710  ;;  %v628_v33 = vmul.f32 1.442695, %v618_v28  ;;  %v630_v18 = vmul.f32 1.442695, %v619_v26  ;;  %v7613_v28 = vld [vmem:[#allocation24_spill] sm:$0xff]  ;;  %v7614_v26 = vld [vmem:[#allocation6_spill] sm:$0xff] }
 0x2c3   : > { %7605 = vst [vmem:[#allocation28_spill] sm:$0xff] %v5820_v53  ;;  %v672_v12 = vpack.c.bf16 %v5817_v39, %v5820_v53 }
 0x2c4   : > { %4712 = vpow2.f32 %v628_v33 }
 0x2c5   : > { %4092 = vmatmul.msk.bf16.vlgmr.msrb.gmra.mxu0 %vm591_vm1, %v672_v12  ;;  %4115 = vmatmul.msk.bf16.gmra.mxu1 %vm92_vm0, %v5693_v29  ;;  %4714 = vpow2.f32 %v630_v18 }
 0x2c6   : > { %1604 = vmatpush.bf16.msrb.mxu0 %v1583_v10 }
 0x2c7   : > { %v609_v31 = vpop.xlane.xlu1 %608 }
 0x2c8   : > { %v621_v15 = vsub.f32 %v5712_v4, %v609_v31  ;;  %v632_v4 = vmul.f32 1.442695, %v620_v27 }
 0x2ca   : > { %1605 = vmatpush.bf16.msrb.mxu0 %v1581_v49  ;;  %v5830_v23 = vpop.eup %4712  ;;  %v634_v14 = vmul.f32 1.442695, %v621_v15 }
 0x2cb   : > { %7606 = vst [vmem:[#allocation29_spill] sm:$0xff] %v5830_v23  ;;  %v5832_v44 = vpop.eup %4714 }
 0x2cc   : > { %7607 = vst [vmem:[#allocation30_spill] sm:$0xff] %v5832_v44  ;;  %v673_v19 = vpack.c.bf16 %v5832_v44, %v5830_v23  ;;  %4716 = vpow2.f32 %v634_v14 }
 0x2cd   : > { %4123 = vmatmul.msk.bf16.gmra.mxu3 %vm92_vm0, %v5732_v21  ;;  %4718 = vpow2.f32 %v632_v4  ;;  %v612_v55 = vpop.xlane.xlu0 %611 }
 0x2ce   : > { %1606 = vmatpush.bf16.msrb.mxu0 %v1579_v57  ;;  %v622_v49 = vsub.f32 %v5728_v20, %v612_v55 }
 0x2d0   : > { %v636_v10 = vmul.f32 1.442695, %v622_v49 }
 0x2d2   : > { %1607 = vmatpush.bf16.msrb.mxu0 %v1577_v30  ;;  %v806_v22 = vpop.f32.mrf.mxu1  ;;  %v5853_v36 = vpop.eup %4716 }
 0x2d3   : > { %v5836_v29 = vadd.f32 %v806_v22, %v7584_v0  ;;  %7608 = vst [vmem:[#allocation31_spill] sm:$0xff] %v5853_v36  ;;  %v5858_v50 = vpop.eup %4718  ;;  %v7615_v22 = vld [vmem:[#allocation26_spill] sm:$0xff] }
 0x2d4   : > { %7609 = vst [vmem:[#allocation32_spill] sm:$0xff] %v5858_v50 }
 0x2d5   : > { %4093 = vmatmul.msk.bf16.gmra.mxu0 %vm591_vm1, %v673_v19  ;;  %4128 = vmatmul.msk.bf16.vlgmr.msrb.gmra.mxu1 %vm92_vm0, %v5545_v46  ;;  %v826_v21 = vsel %vm591_vm1, %v5836_v29, -inf  ;;  %v615_v46 = vpop.xlane.xlu2 %614 }
 0x2d6   : > { %827 = vmax.xlane.f32.xlu0 %v826_v21  ;;  %v623_v8 = vsub.f32 %v5743_v58, %v615_v46 }
 0x2d8   : > { %v638_v3 = vmul.f32 1.442695, %v623_v8 }
 0x2da   : > { %v808_v59 = vpop.f32.mrf.mxu1  ;;  %4720 = vpow2.f32 %v638_v3 }
 0x2db   : > { %v5847_v47 = vadd.f32 %v808_v59, %v7583_v1  ;;  %4722 = vpow2.f32 %v636_v10 }
 0x2dd   : > { %4136 = vmatmul.msk.bf16.vlgmr.msrb.gmra.mxu3 %vm92_vm0, %v5569_v51  ;;  %v829_v32 = vsel %vm591_vm1, %v5847_v47, -inf  ;;  %v674_v51 = vpack.c.bf16 %v5853_v36, %v5858_v50 }
 0x2de   : > { %830 = vmax.xlane.f32.xlu1 %v829_v32 }
 0x2e0   : > { %v1028_v43 = vpop.f32.mrf.mxu3  ;;  %v5884_v57 = vpop.eup %4720 }
 0x2e1   : > { %v5856_v37 = vadd.f32 %v1028_v43, %v7584_v0  ;;  %7611 = vst [vmem:[#allocation33_spill] sm:$0xff] %v5884_v57  ;;  %v5889_v52 = vpop.eup %4722 }
 0x2e2   : > { %v811_v25 = vpop.f32.mrf.mxu1  ;;  %7612 = vst [vmem:[#allocation34_spill] sm:$0xff] %v5889_v52 }
 0x2e3   : > { %v5862_v13 = vadd.f32 %v811_v25, %v7582_v2  ;;  %v1048_v48 = vsel %vm591_vm1, %v5856_v37, -inf }
 0x2e4   : > { %1049 = vmax.xlane.f32.xlu2 %v1048_v48 }
 0x2e5   : > { %4094 = vmatmul.msk.bf16.gmra.mxu0 %vm591_vm1, %v674_v51  ;;  %4129 = vmatmul.msk.bf16.gmra.mxu1 %vm92_vm0, %v5597_v60  ;;  %v832_v58 = vsel %vm591_vm1, %v5862_v13, -inf  ;;  %v7610_v60 = vld [vmem:[#allocation5_spill] sm:$0xff] }
 0x2e6   : > { %833 = vmax.xlane.f32.xlu1 %v832_v58  ;;  %v7616_v58 = vld [vmem:[#allocation22_spill] sm:$0xff] }
 0x2e8   : > { %v1030_v40 = vpop.f32.mrf.mxu3 }
 0x2e9   : > { %v5875_v30 = vadd.f32 %v1030_v40, %v7583_v1 }
 0x2ea   : > { %v813_v34 = vpop.f32.mrf.mxu1 }
 0x2eb   : > { %v1051_v20 = vsel %vm591_vm1, %v5875_v30, -inf  ;;  %v5882_v24 = vadd.f32 %v813_v34, %v7610_v60 }
 0x2ec   : > { %1052 = vmax.xlane.f32.xlu0 %v1051_v20 }
 0x2ed   : > { %4137 = vmatmul.msk.bf16.gmra.mxu3 %vm92_vm0, %v5607_v63  ;;  %v835_v62 = vsel %vm591_vm1, %v5882_v24, -inf  ;;  %v675_v63 = vpack.c.bf16 %v5884_v57, %v5889_v52 }
 0x2f0   : > { %v1033_v42 = vpop.f32.mrf.mxu3 }
 0x2f1   : > { %v5887_v11 = vadd.f32 %v1033_v42, %v7582_v2 }
 0x2f2   : > { %v816_v17 = vpop.f32.mrf.mxu1 }
 0x2f3   : > { %v1054_v45 = vsel %vm591_vm1, %v5887_v11, -inf  ;;  %v5901_v12 = vadd.f32 %v816_v17, %v7614_v26 }
 0x2f4   : > { %1055 = vmax.xlane.f32.xlu1 %v1054_v45  ;;  %836 = vmax.xlane.f32.xlu0 %v835_v62 }
 0x2f5   : > { %4095 = vmatmul.msk.bf16.gmra.mxu0 %vm591_vm1, %v675_v63  ;;  %4130 = vmatmul.msk.bf16.gmra.mxu1 %vm92_vm0, %v7613_v28  ;;  %v838_v54 = vsel %vm591_vm1, %v5901_v12, -inf }
 0x2f8   : > { %v1035_v33 = vpop.f32.mrf.mxu3 }
 0x2f9   : > { %v5904_v18 = vadd.f32 %v1035_v33, %v7610_v60 }
 0x2fa   : > { %v818_v31 = vpop.f32.mrf.mxu1 }
 0x2fb   : > { %v1057_v15 = vsel %vm591_vm1, %v5904_v18, -inf  ;;  %v5913_v19 = vadd.f32 %v818_v31, %v7581_v5 }
 0x2fc   : > { %839 = vmax.xlane.f32.xlu1 %v838_v54  ;;  %1058 = vmax.xlane.f32.xlu0 %v1057_v15  ;;  %v7617_v54 = vld [vmem:[#allocation23_spill] sm:$0xff] }
 0x2fd   : > { %4138 = vmatmul.msk.bf16.gmra.mxu3 %vm92_vm0, %v7615_v22  ;;  %v841_v4 = vsel %vm591_vm1, %v5913_v19, -inf }
 0x300   : > { %v1038_v27 = vpop.f32.mrf.mxu3 }
 0x301   : > { %v5916_v21 = vadd.f32 %v1038_v27, %v7614_v26 }
 0x302   : > { %v821_v14 = vpop.f32.mrf.mxu1 }
 0x303   : > { %v1060_v59 = vsel %vm591_vm1, %v5916_v21, -inf  ;;  %v5932_v8 = vadd.f32 %v821_v14, %v7580_v6 }
 0x304   : > { %842 = vmax.xlane.f32.xlu1 %v841_v4  ;;  %1061 = vmax.xlane.f32.xlu0 %v1060_v59 }
 0x305   : > { %4131 = vmatmul.msk.bf16.gmra.mxu1 %vm92_vm0, %v5725_v9  ;;  %v844_v49 = vsel %vm591_vm1, %v5932_v8, -inf }
 0x308   : > { %v1040_v32 = vpop.f32.mrf.mxu3 }
 0x309   : > { %v5925_v46 = vadd.f32 %v1040_v32, %v7581_v5 }
 0x30a   : > { %v823_v43 = vpop.f32.mrf.mxu1 }
 0x30b   : > { %v1063_v55 = vsel %vm591_vm1, %v5925_v46, -inf }
 0x30c   : > { %1064 = vmax.xlane.f32.xlu2 %v1063_v55 }
 0x30d   : > { %4139 = vmatmul.msk.bf16.gmra.mxu3 %vm92_vm0, %v5747_v38  ;;  %v5944_v38 = vadd.f32 %v823_v43, %v7579_v7 }
 0x30f   : > { %v847_v20 = vsel %vm591_vm1, %v5944_v38, -inf }
 0x310   : > { %v1043_v25 = vpop.f32.mrf.mxu3 }
 0x311   : > { %v5935_v51 = vadd.f32 %v1043_v25, %v7580_v6 }
 0x312   : > { %v1250_v9 = vpop.f32.mrf.mxu1 }
 0x313   : > { %v1066_v48 = vsel %vm591_vm1, %v5935_v51, -inf  ;;  %v5947_v3 = vadd.f32 %v1250_v9, %v7584_v0  ;;  %v7618_v9 = vld [vmem:[#allocation25_spill] sm:$0xff] }
 0x314   : > { %1067 = vmax.xlane.f32.xlu1 %v1066_v48  ;;  %845 = vmax.xlane.f32.xlu2 %v844_v49 }
 0x315   : > { %4144 = vmatmul.msk.bf16.vlgmr.msra.gmra.mxu1 %vm92_vm0, %v7616_v58  ;;  %v1270_v42 = vsel %vm591_vm1, %v5947_v3, -inf }
 0x318   : > { %v1045_v10 = vpop.f32.mrf.mxu3 }
 0x319   : > { %v5950_v40 = vadd.f32 %v1045_v10, %v7579_v7 }
 0x31a   : > { %v1252_v34 = vpop.f32.mrf.mxu1 }
 0x31b   : > { %v1069_v17 = vsel %vm591_vm1, %v5950_v40, -inf  ;;  %v5959_v45 = vadd.f32 %v1252_v34, %v7583_v1 }
 0x31c   : > { %848 = vmax.xlane.f32.xlu1 %v847_v20  ;;  %1271 = vmax.xlane.f32.xlu2 %v1270_v42 }
 0x31d   : > { %1070 = vmax.xlane.f32.xlu0 %v1069_v17  ;;  %v1273_v33 = vsel %vm591_vm1, %v5959_v45, -inf }
 0x320   : > { %v1472_v62 = vpop.f32.mrf.mxu3 }
 0x321   : > { %v5962_v63 = vadd.f32 %v1472_v62, %v7584_v0 }
 0x322   : > { %v1255_v28 = vpop.f32.mrf.mxu1 }
 0x323   : > { %v1492_v31 = vsel %vm591_vm1, %v5962_v63, -inf  ;;  %v5971_v15 = vadd.f32 %v1255_v28, %v7582_v2 }
 0x324   : > { %1274 = vmax.xlane.f32.xlu1 %v1273_v33  ;;  %1493 = vmax.xlane.f32.xlu2 %v1492_v31 }
 0x325   : > { %4145 = vmatmul.msk.bf16.gmra.mxu1 %vm92_vm0, %v7617_v54  ;;  %v1276_v4 = vsel %vm591_vm1, %v5971_v15, -inf }
 0x328   : > { %v1474_v22 = vpop.f32.mrf.mxu3 }
 0x329   : > { %v5974_v27 = vadd.f32 %v1474_v22, %v7583_v1 }
 0x32a   : > { %v1257_v14 = vpop.f32.mrf.mxu1 }
 0x32b   : > { %v1495_v59 = vsel %vm591_vm1, %v5974_v27, -inf  ;;  %v5988_v48 = vadd.f32 %v1257_v14, %v7610_v60 }
 0x32c   : > { %1277 = vmax.xlane.f32.xlu2 %v1276_v4  ;;  %1496 = vmax.xlane.f32.xlu0 %v1495_v59 }
 0x32d   : > { %v1279_v20 = vsel %vm591_vm1, %v5988_v48, -inf }
 0x330   : > { %v1477_v32 = vpop.f32.mrf.mxu3 }
 0x331   : > { %v5981_v43 = vadd.f32 %v1477_v32, %v7582_v2 }
 0x332   : > { %v1260_v55 = vpop.f32.mrf.mxu1 }
 0x333   : > { %v1498_v25 = vsel %vm591_vm1, %v5981_v43, -inf  ;;  %v5998_v42 = vadd.f32 %v1260_v55, %v7614_v26 }
 0x334   : > { %1499 = vmax.xlane.f32.xlu0 %v1498_v25 }
 0x335   : > { %4146 = vmatmul.msk.bf16.gmra.mxu1 %vm92_vm0, %v7618_v9  ;;  %v1282_v28 = vsel %vm591_vm1, %v5998_v42, -inf }
 0x338   : > { %v1479_v49 = vpop.f32.mrf.mxu3 }
 0x339   : > { %v5991_v58 = vadd.f32 %v1479_v49, %v7610_v60 }
 0x33a   : > { %v1262_v10 = vpop.f32.mrf.mxu1 }
 0x33b   : > { %v1501_v34 = vsel %vm591_vm1, %v5991_v58, -inf  ;;  %v6021_v25 = vadd.f32 %v1262_v10, %v7581_v5 }
 0x33c   : > { %1502 = vmax.xlane.f32.xlu2 %v1501_v34  ;;  %1280 = vmax.xlane.f32.xlu0 %v1279_v20 }
 0x340   : > { %v1482_v17 = vpop.f32.mrf.mxu3 }
 0x341   : > { %v6005_v33 = vadd.f32 %v1482_v17, %v7614_v26  ;;  %v1285_v17 = vsel %vm591_vm1, %v6021_v25, -inf }
 0x342   : > { %v1265_v62 = vpop.f32.mrf.mxu1 }
 0x343   : > { %v1504_v32 = vsel %vm591_vm1, %v6005_v33, -inf }
 0x344   : > { %1283 = vmax.xlane.f32.xlu0 %v1282_v28 }
 0x345   : > { %4147 = vmatmul.msk.bf16.gmra.mxu1 %vm92_vm0, %v5734_v35 }
 0x348   : > { %v1484_v31 = vpop.f32.mrf.mxu3 }
 0x349   : > { %v6008_v54 = vadd.f32 %v1484_v31, %v7581_v5  ;;  %v828_v22 = vpop.xlane.xlu0 %827 }
 0x34a   : > { %v1267_v14 = vpop.f32.mrf.mxu1  ;;  %v850_v35 = vsub.f32 %v5836_v29, %v828_v22  ;;  %v6029_v29 = vadd.f32 %v1265_v62, %v7580_v6 }
 0x34b   : > { %v6011_v4 = vadd.f32 %v1267_v14, %v7579_v7  ;;  %v1507_v59 = vsel %vm591_vm1, %v6008_v54, -inf }
 0x34c   : > { %1508 = vmax.xlane.f32.xlu1 %v1507_v59  ;;  %1505 = vmax.xlane.f32.xlu0 %v1504_v32  ;;  %v858_v9 = vmul.f32 1.442695, %v850_v35 }
 0x34d   : > { %v1291_v55 = vsel %vm591_vm1, %v6011_v4, -inf }
 0x34e   : > { %1292 = vmax.xlane.f32.xlu2 %v1291_v55  ;;  %4724 = vpow2.f32 %v858_v9 }
 0x350   : > { %v1487_v32 = vpop.f32.mrf.mxu3 }
 0x351   : > { %v831_v49 = vpop.xlane.xlu1 %830  ;;  %v6043_v62 = vadd.f32 %v1487_v32, %v7580_v6 }
 0x352   : > { %v851_v34 = vsub.f32 %v5847_v47, %v831_v49  ;;  %v6024_v20 = vpop.f32.mrf.mxu1  ;;  %v1288_v47 = vsel %vm591_vm1, %v6029_v29, -inf }
 0x354   : > { %v860_v28 = vmul.f32 1.442695, %v851_v34  ;;  %1286 = vmax.xlane.f32.xlu0 %v1285_v17  ;;  %v6033_v10 = vpop.eup %4724  ;;  %v1510_v17 = vsel %vm591_vm1, %v6043_v62, -inf }
 0x356   : > { %4726 = vpow2.f32 %v860_v28 }
 0x357   : > { %v1050_v31 = vpop.xlane.xlu2 %1049 }
 0x358   : > { %v1072_v14 = vsub.f32 %v5856_v37, %v1050_v31 }
 0x359   : > { %v834_v9 = vpop.xlane.xlu1 %833 }
 0x35a   : > { %v6031_v22 = vpop.f32.mrf.mxu1  ;;  %v1080_v55 = vmul.f32 1.442695, %v1072_v14  ;;  %v852_v28 = vsub.f32 %v5862_v13, %v834_v9  ;;  %v7619_v14 = vld [vmem:[#allocation19_spill] sm:$0xff] }
 0x35c   : > { %v6038_v59 = vpop.eup %4726  ;;  %1289 = vmax.xlane.f32.xlu0 %v1288_v47  ;;  %4728 = vpow2.f32 %v1080_v55  ;;  %v862_v47 = vmul.f32 1.442695, %v852_v28 }
 0x35d   : > { %v906_v35 = vpack.c.bf16 %v6038_v59, %v6033_v10 }
 0x35f   : > { %4100 = vmatmul.msk.bf16.vlgmr.msrb.gmra.mxu2 %vm591_vm1, %v906_v35  ;;  %v1053_v49 = vpop.xlane.xlu0 %1052 }
 0x360   : > { %1826 = vmatpush.bf16.msrb.mxu2 %v5799_v41  ;;  %v1073_v37 = vsub.f32 %v5875_v30, %v1053_v49 }
 0x362   : > { %v1082_v34 = vmul.f32 1.442695, %v1073_v37  ;;  %v6051_v31 = vpop.f32.mrf.mxu1  ;;  %v6060_v13 = vpop.eup %4728 }
 0x364   : > { %4730 = vpow2.f32 %v1082_v34  ;;  %1827 = vmatpush.bf16.msrb.mxu2 %v5787_v56  ;;  %1511 = vmax.xlane.f32.xlu0 %v1510_v17 }
 0x365   : > { %2026 = vrot.lane.b32.xlu1 %v7619_v14, %s5080_s2  ;;  %4732 = vpow2.f32 %v862_v47 }
 0x366   : > { %2248 = vrot.lane.b32.xlu2 %v7619_v14, %s5081_s20 }
 0x367   : > { %v1056_v41 = vpop.xlane.xlu1 %1055  ;;  %v837_v30 = vpop.xlane.xlu0 %836 }
 0x368   : > { %1828 = vmatpush.bf16.msrb.mxu2 %v5793_v61  ;;  %v853_v32 = vsub.f32 %v5882_v24, %v837_v30  ;;  %v1074_v9 = vsub.f32 %v5887_v11, %v1056_v41 }
 0x36a   : > { %v6062_v35 = vpop.eup %4730  ;;  %v864_v55 = vmul.f32 1.442695, %v853_v32  ;;  %v6069_v49 = vpop.f32.mrf.mxu1  ;;  %v1084_v37 = vmul.f32 1.442695, %v1074_v9 }
 0x36b   : > { %v1128_v56 = vpack.c.bf16 %v6062_v35, %v6060_v13  ;;  %v6072_v17 = vpop.eup %4732  ;;  %v6185_v23 = vadd.f32 %v6069_v49, %v7610_v60 }
 0x36c   : > { %1829 = vmatpush.bf16.msrb.mxu2 %v5805_v16  ;;  %4734 = vpow2.f32 %v864_v55  ;;  %v7620_v55 = vld [vmem:[#allocation20_spill] sm:$0xff] }
 0x36d   : > { %4108 = vmatmul.msk.bf16.vlgmr.msra.gmra.mxu0 %vm591_vm1, %v1128_v56  ;;  %4736 = vpow2.f32 %v1084_v37 }
 0x36f   : > { %v840_v61 = vpop.xlane.xlu1 %839  ;;  %v1059_v24 = vpop.xlane.xlu0 %1058 }
 0x370   : > { %v1075_v34 = vsub.f32 %v5904_v18, %v1059_v24  ;;  %v854_v30 = vsub.f32 %v5901_v12, %v840_v61  ;;  %v1489_v24 = vpop.f32.mrf.mxu3 }
 0x372   : > { %v1086_v28 = vmul.f32 1.442695, %v1075_v34  ;;  %v6074_v14 = vpop.eup %4734  ;;  %v866_v11 = vmul.f32 1.442695, %v854_v30  ;;  %v6080_v47 = vpop.f32.mrf.mxu1 }
 0x373   : > { %v907_v16 = vpack.c.bf16 %v6074_v14, %v6072_v17  ;;  %v6085_v56 = vpop.eup %4736 }
 0x374   : > { %4738 = vpow2.f32 %v1086_v28 }
 0x375   : > { %4101 = vmatmul.msk.bf16.gmra.mxu2 %vm591_vm1, %v907_v16  ;;  %4740 = vpow2.f32 %v866_v11 }
 0x377   : > { %v843_v41 = vpop.xlane.xlu1 %842  ;;  %v1062_v32 = vpop.xlane.xlu0 %1061 }
 0x378   : > { %v855_v18 = vsub.f32 %v5913_v19, %v843_v41  ;;  %2246 = vrot.lane.b32.xlu0 %v7620_v55, %s5081_s20  ;;  %v1076_v61 = vsub.f32 %v5916_v21, %v1062_v32 }
 0x37a   : > { %v868_v12 = vmul.f32 1.442695, %v855_v18  ;;  %v6087_v9 = vpop.eup %4738  ;;  %v1088_v19 = vmul.f32 1.442695, %v1076_v61  ;;  %v6098_v41 = vpop.f32.mrf.mxu1 }
 0x37b   : > { %v1129_v37 = vpack.c.bf16 %v6087_v9, %v6085_v56  ;;  %v6094_v30 = vpop.eup %4740  ;;  %v1916_v18 = vpop.f32.mrf.mxu3 }
 0x37c   : > { %4742 = vpow2.f32 %v868_v12 }
 0x37d   : > { %4109 = vmatmul.msk.bf16.gmra.mxu0 %vm591_vm1, %v1129_v37  ;;  %4744 = vpow2.f32 %v1088_v19  ;;  %v6108_v37 = vadd.f32 %v1489_v24, %v7579_v7 }
 0x37f   : > { %v1065_v34 = vpop.xlane.xlu2 %1064  ;;  %v1513_v57 = vsel %vm591_vm1, %v6108_v37, -inf }
 0x380   : > { %v1077_v28 = vsub.f32 %v5925_v46, %v1065_v34  ;;  %v6111_v34 = vadd.f32 %v1916_v18, %v7584_v0 }
 0x382   : > { %v6096_v16 = vpop.eup %4742  ;;  %v1090_v11 = vmul.f32 1.442695, %v1077_v28  ;;  %v1936_v24 = vsel %vm591_vm1, %v6111_v34, -inf }
 0x383   : > { %7621 = vst [vmem:[#allocation24_spill] sm:$0xff] %v6096_v16  ;;  %v908_v21 = vpack.c.bf16 %v6096_v16, %v6094_v30  ;;  %v6103_v61 = vpop.eup %4744 }
 0x384   : > { %4746 = vpow2.f32 %v1090_v11  ;;  %v6116_v11 = vpop.f32.mrf.mxu1 }
 0x385   : > { %4102 = vmatmul.msk.bf16.gmra.mxu2 %vm591_vm1, %v908_v21 }
 0x387   : > { %v1068_v32 = vpop.xlane.xlu1 %1067  ;;  %v846_v12 = vpop.xlane.xlu2 %845 }
 0x388   : > { %v856_v19 = vsub.f32 %v5932_v8, %v846_v12  ;;  %v1078_v21 = vsub.f32 %v5935_v51, %v1068_v32  ;;  %v6128_v51 = vadd.f32 %v6024_v20, %v7584_v0 }
 0x38a   : > { %v6105_v46 = vpop.eup %4746  ;;  %v870_v52 = vmul.f32 1.442695, %v856_v19  ;;  %v1092_v36 = vmul.f32 1.442695, %v1078_v21 }
 0x38b   : > { %v1130_v28 = vpack.c.bf16 %v6105_v46, %v6103_v61 }
 0x38c   : > { %4748 = vpow2.f32 %v870_v52  ;;  %v6130_v19 = vpop.f32.mrf.mxu1 }
 0x38d   : > { %4110 = vmatmul.msk.bf16.gmra.mxu0 %vm591_vm1, %v1130_v28 }
 0x38f   : > { %1514 = vmax.xlane.f32.xlu1 %v1513_v57  ;;  %v849_v18 = vpop.xlane.xlu1 %848  ;;  %1937 = vmax.xlane.f32.xlu2 %v1936_v24  ;;  %v1272_v8 = vpop.xlane.xlu2 %1271  ;;  %v1714_v57 = vsel %vm591_vm1, %v6128_v51, -inf }
 0x390   : > { %v857_v12 = vsub.f32 %v5944_v38, %v849_v18  ;;  %v1071_v50 = vpop.xlane.xlu0 %1070 }
 0x391   : > { %v1079_v44 = vsub.f32 %v5950_v40, %v1071_v50 }
 0x392   : > { %v872_v32 = vmul.f32 1.442695, %v857_v12  ;;  %v6134_v21 = vpop.eup %4748  ;;  %v6149_v12 = vadd.f32 %v6031_v22, %v7583_v1  ;;  %v1918_v22 = vpop.f32.mrf.mxu3 }
 0x393   : > { %v1094_v28 = vmul.f32 1.442695, %v1079_v44  ;;  %7622 = vst [vmem:[#allocation26_spill] sm:$0xff] %v6134_v21  ;;  %v1294_v44 = vsub.f32 %v5947_v3, %v1272_v8 }
 0x394   : > { %4750 = vpow2.f32 %v872_v32  ;;  %v6155_v8 = vpop.f32.mrf.mxu1 }
 0x395   : > { %4752 = vpow2.f32 %v1092_v36 }
 0x396   : > { %4754 = vpow2.f32 %v1094_v28  ;;  %v1302_v28 = vmul.f32 1.442695, %v1294_v44 }
 0x397   : > { %1715 = vmax.xlane.f32.xlu1 %v1714_v57  ;;  %v1275_v38 = vpop.xlane.xlu1 %1274  ;;  %v1494_v50 = vpop.xlane.xlu2 %1493 }
 0x398   : > { %v1295_v20 = vsub.f32 %v5959_v45, %v1275_v38  ;;  %v1516_v18 = vsub.f32 %v5962_v63, %v1494_v50  ;;  %v1717_v63 = vsel %vm591_vm1, %v6149_v12, -inf }
 0x39a   : > { %v6136_v40 = vpop.eup %4750  ;;  %v1304_v32 = vmul.f32 1.442695, %v1295_v20  ;;  %v1524_v57 = vmul.f32 1.442695, %v1516_v18  ;;  %v6161_v20 = vadd.f32 %v1918_v22, %v7583_v1 }
 0x39b   : > { %7623 = vst [vmem:[#allocation22_spill] sm:$0xff] %v6136_v40  ;;  %v6139_v24 = vpop.eup %4752  ;;  %v909_v36 = vpack.c.bf16 %v6136_v40, %v6134_v21 }
 0x39c   : > { %7624 = vst [vmem:[#allocation23_spill] sm:$0xff] %v6139_v24  ;;  %v6144_v52 = vpop.eup %4754  ;;  %4756 = vpow2.f32 %v1304_v32  ;;  %v1939_v32 = vsel %vm591_vm1, %v6161_v20, -inf }
 0x39d   : > { %7625 = vst [vmem:[#allocation25_spill] sm:$0xff] %v6144_v52  ;;  %4103 = vmatmul.msk.bf16.gmra.mxu2 %vm591_vm1, %v909_v36  ;;  %v1131_v45 = vpack.c.bf16 %v6144_v52, %v6139_v24  ;;  %4758 = vpow2.f32 %v1302_v28  ;;  %v7626_v36 = vld [vmem:[#allocation18_spill] sm:$0xff]  ;;  %v6173_v28 = vpop.f32.mrf.mxu1 }
 0x39e   : > { %4760 = vpow2.f32 %v1524_v57 }
 0x39f   : > { %4111 = vmatmul.msk.bf16.gmra.mxu0 %vm591_vm1, %v1131_v45  ;;  %v1497_v3 = vpop.xlane.xlu0 %1496  ;;  %v1278_v44 = vpop.xlane.xlu2 %1277 }
 0x3a0   : > { %v1517_v38 = vsub.f32 %v5974_v27, %v1497_v3  ;;  %v1296_v57 = vsub.f32 %v5971_v15, %v1278_v44 }
 0x3a2   : > { %v1526_v50 = vmul.f32 1.442695, %v1517_v38  ;;  %1718 = vmax.xlane.f32.xlu0 %v1717_v63  ;;  %v6165_v45 = vpop.eup %4756  ;;  %v1306_v52 = vmul.f32 1.442695, %v1296_v57 }
 0x3a3   : > { %v6167_v27 = vpop.eup %4758 }
 0x3a4   : > { %4762 = vpow2.f32 %v1526_v50  ;;  %v6171_v3 = vpop.eup %4760  ;;  %v1350_v63 = vpack.c.bf16 %v6165_v45, %v6167_v27 }
 0x3a5   : > { %4764 = vpow2.f32 %v1306_v52  ;;  %v6195_v57 = vpop.f32.mrf.mxu1 }
 0x3a7   : > { %2020 = vrot.lane.b32.xlu2 %v7626_v36, %s5080_s2  ;;  %v1500_v18 = vpop.xlane.xlu0 %1499 }
 0x3a8   : > { %v1518_v22 = vsub.f32 %v5981_v43, %v1500_v18  ;;  %v7627_v43 = vld [vmem:[#allocation21_spill] sm:$0xff]  ;;  %v1723_v18 = vsel %vm591_vm1, %v6185_v23, -inf }
 0x3aa   : > { %1940 = vmax.xlane.f32.xlu0 %v1939_v32  ;;  %v6176_v38 = vpop.eup %4762  ;;  %v1528_v21 = vmul.f32 1.442695, %v1518_v22 }
 0x3ab   : > { %v1572_v50 = vpack.c.bf16 %v6176_v38, %v6171_v3 }
 0x3ac   : > { %4766 = vpow2.f32 %v1528_v21 }
 0x3ad   : > { %4116 = vmatmul.msk.bf16.vlgmr.msra.gmra.mxu2 %vm591_vm1, %v1350_v63  ;;  %v6199_v63 = vadd.f32 %v6080_v47, %v7614_v26 }
 0x3af   : > { %4124 = vmatmul.msk.bf16.vlgmr.msrb.gmra.mxu0 %vm591_vm1, %v1572_v50  ;;  %v1503_v15 = vpop.xlane.xlu2 %1502  ;;  %v1281_v44 = vpop.xlane.xlu0 %1280  ;;  %v1726_v52 = vsel %vm591_vm1, %v6199_v63, -inf }
 0x3b0   : > { %v1519_v32 = vsub.f32 %v5991_v58, %v1503_v15  ;;  %v1297_v24 = vsub.f32 %v5988_v48, %v1281_v44  ;;  %2244 = vrot.lane.b32.xlu1 %v7627_v43, %s5081_s20  ;;  %v6201_v58 = vpop.eup %4764  ;;  %v6219_v15 = vpop.f32.mrf.mxu1 }
 0x3b2   : > { %v1530_v49 = vmul.f32 1.442695, %v1519_v32  ;;  %v1308_v40 = vmul.f32 1.442695, %v1297_v24  ;;  %1724 = vmax.xlane.f32.xlu0 %v1723_v18  ;;  %v6203_v22 = vpop.eup %4766 }
 0x3b3   : > { %7628 = vst [vmem:[#allocation19_spill] sm:$0xff] %v6203_v22 }
 0x3b4   : > { %4768 = vpow2.f32 %v1530_v49 }
 0x3b5   : > { %4770 = vpow2.f32 %v1308_v40  ;;  %v6217_v40 = vadd.f32 %v6098_v41, %v7581_v5 }
 0x3b7   : > { %v1284_v48 = vpop.xlane.xlu0 %1283  ;;  %v1729_v39 = vsel %vm591_vm1, %v6217_v40, -inf }
 0x3b8   : > { %v1298_v41 = vsub.f32 %v5998_v42, %v1284_v48 }
 0x3ba   : > { %v6207_v50 = vpop.eup %4768  ;;  %1727 = vmax.xlane.f32.xlu0 %v1726_v52 }
 0x3bb   : > { %v6209_v21 = vpop.eup %4770  ;;  %v1573_v24 = vpack.c.bf16 %v6207_v50, %v6203_v22 }
 0x3bc   : > { %v1351_v47 = vpack.c.bf16 %v6209_v21, %v6201_v58 }
 0x3be   : > { %4117 = vmatmul.msk.bf16.gmra.mxu2 %vm591_vm1, %v1351_v47  ;;  %v6230_v47 = vadd.f32 %v6116_v11, %v7580_v6 }
 0x3bf   : > { %4125 = vmatmul.msk.bf16.gmra.mxu0 %vm591_vm1, %v1573_v24  ;;  %v1509_v44 = vpop.xlane.xlu1 %1508  ;;  %v1506_v32 = vpop.xlane.xlu0 %1505  ;;  %v1310_v24 = vmul.f32 1.442695, %v1298_v41 }
 0x3c0   : > { %v1521_v18 = vsub.f32 %v6008_v54, %v1509_v44  ;;  %v1520_v49 = vsub.f32 %v6005_v33, %v1506_v32  ;;  %v2148_v54 = vpop.f32.mrf.mxu1  ;;  %v1732_v32 = vsel %vm591_vm1, %v6230_v47, -inf }
 0x3c1   : > { %v1293_v52 = vpop.xlane.xlu2 %1292  ;;  %v6240_v42 = vadd.f32 %v2148_v54, %v7614_v26 }
 0x3c2   : > { %v1534_v53 = vmul.f32 1.442695, %v1521_v18  ;;  %v1532_v16 = vmul.f32 1.442695, %v1520_v49  ;;  %1730 = vmax.xlane.f32.xlu0 %v1729_v39  ;;  %v1921_v39 = vpop.f32.mrf.mxu3 }
 0x3c3   : > { %v2170_v48 = vsel %vm591_vm1, %v6240_v42, -inf }
 0x3c4   : > { %4772 = vpow2.f32 %v1534_v53 }
 0x3c5   : > { %4774 = vpow2.f32 %v1532_v16  ;;  %v6246_v16 = vadd.f32 %v6155_v8, %v7584_v0 }
 0x3c6   : > { %4776 = vpow2.f32 %v1310_v24 }
 0x3c7   : > { %v1287_v22 = vpop.xlane.xlu0 %1286  ;;  %v2158_v41 = vsel %vm591_vm1, %v6246_v16, -inf }
 0x3c8   : > { %v1299_v33 = vsub.f32 %v6021_v25, %v1287_v22 }
 0x3c9   : > { %v2249_v44 = vpop.permute.xlu2 %2248 }
 0x3ca   : > { %v6235_v18 = vpop.eup %4772  ;;  %v1312_v49 = vmul.f32 1.442695, %v1299_v33  ;;  %1733 = vmax.xlane.f32.xlu0 %v1732_v32  ;;  %2270 = vmatpush.bf16.msra.mxu2 %v2249_v44  ;;  %v1923_v33 = vpop.f32.mrf.mxu3  ;;  %v1301_v44 = vsub.f32 %v6011_v4, %v1293_v52  ;;  %v6263_v32 = vadd.f32 %v6051_v31, %v7582_v2 }
 0x3cb   : > { %v6237_v53 = vpop.eup %4774  ;;  %v6276_v52 = vadd.f32 %v1923_v33, %v7610_v60  ;;  %v6290_v33 = vadd.f32 %v6219_v15, %v7610_v60 }
 0x3cc   : > { %4778 = vpow2.f32 %v1312_v49  ;;  %v1574_v25 = vpack.c.bf16 %v6235_v18, %v6237_v53  ;;  %v6251_v22 = vpop.eup %4776  ;;  %v6266_v49 = vadd.f32 %v1921_v39, %v7582_v2  ;;  %v1720_v4 = vsel %vm591_vm1, %v6263_v32, -inf }
 0x3ce   : > { %v1942_v31 = vsel %vm591_vm1, %v6266_v49, -inf }
 0x3cf   : > { %4126 = vmatmul.msk.bf16.gmra.mxu0 %vm591_vm1, %v1574_v25  ;;  %v1290_v11 = vpop.xlane.xlu0 %1289 }
 0x3d0   : > { %2171 = vmax.xlane.f32.xlu2 %v2170_v48  ;;  %v1300_v54 = vsub.f32 %v6029_v29, %v1290_v11  ;;  %v877_v29 = vsel %vm591_vm1, %v6038_v59, 0.0  ;;  %v1316_v11 = vmul.f32 1.442695, %v1301_v44  ;;  %v1318_v59 = vsel %vm591_vm1, %v6167_v27, 0.0 }
 0x3d1   : > { %v1543_v27 = vsel %vm591_vm1, %v6176_v38, 0.0 }
 0x3d2   : > { %v6255_v24 = vpop.eup %4778  ;;  %2159 = vmax.xlane.f32.xlu0 %v2158_v41  ;;  %v1314_v25 = vmul.f32 1.442695, %v1300_v54  ;;  %v1926_v39 = vpop.f32.mrf.mxu3  ;;  %v1945_v54 = vsel %vm591_vm1, %v6276_v52, -inf }
 0x3d3   : > { %v1352_v8 = vpack.c.bf16 %v6255_v24, %v6251_v22 }
 0x3d4   : > { %4780 = vpow2.f32 %v1314_v25 }
 0x3d5   : > { %4118 = vmatmul.msk.bf16.gmra.mxu2 %vm591_vm1, %v1352_v8  ;;  %4782 = vpow2.f32 %v1316_v11 }
 0x3d7   : > { %v2027_v48 = vpop.permute.xlu1 %2026  ;;  %v1512_v44 = vpop.xlane.xlu0 %1511 }
 0x3d8   : > { %878 = vadd.xlane.f32.xlu2 %v877_v29  ;;  %2048 = vmatpush.bf16.msra.mxu0 %v2027_v48  ;;  %v2167_v29 = vsel %vm591_vm1, %v6290_v33, -inf }
 0x3da   : > { %1721 = vmax.xlane.f32.xlu1 %v1720_v4  ;;  %1943 = vmax.xlane.f32.xlu0 %v1942_v31  ;;  %v6280_v41 = vpop.eup %4780  ;;  %v6295_v48 = vpop.f32.mrf.mxu3  ;;  %v6300_v4 = vadd.f32 %v1926_v39, %v7614_v26  ;;  %v1522_v39 = vsub.f32 %v6043_v62, %v1512_v44 }
 0x3db   : > { %v6284_v8 = vpop.eup %4782  ;;  %v2150_v31 = vpop.f32.mrf.mxu1 }
 0x3dc   : > { %v1353_v25 = vpack.c.bf16 %v6284_v8, %v6280_v41  ;;  %v1948_v60 = vsel %vm591_vm1, %v6300_v4, -inf  ;;  %v6314_v26 = vadd.f32 %v2150_v31, %v7581_v5 }
 0x3e0   : > { %1319 = vadd.xlane.f32.xlu2 %v1318_v59 }
 0x3e2   : > { %1946 = vmax.xlane.f32.xlu0 %v1945_v54  ;;  %v1931_v15 = vpop.f32.mrf.mxu3 }
 0x3e3   : > { %v6307_v38 = vadd.f32 %v1931_v15, %v7580_v6  ;;  %v2153_v54 = vpop.f32.mrf.mxu1 }
 0x3e5   : > { %4119 = vmatmul.msk.bf16.gmra.mxu2 %vm591_vm1, %v1353_v25  ;;  %v1954_v59 = vsel %vm591_vm1, %v6307_v38, -inf  ;;  %v1536_v25 = vmul.f32 1.442695, %v1522_v39 }
 0x3e7   : > { %4784 = vpow2.f32 %v1536_v25  ;;  %v6342_v25 = vpop.f32.mrf.mxu0 }
 0x3e8   : > { %1544 = vadd.xlane.f32.xlu2 %v1543_v27  ;;  %7629 = vst [vmem:[#allocation20_spill] sm:$0xff] %v6342_v25 }
 0x3ea   : > { %2168 = vmax.xlane.f32.xlu0 %v2167_v29  ;;  %v2247_v11 = vpop.permute.xlu0 %2246 }
 0x3eb   : > { %2271 = vmatpush.bf16.msra.mxu2 %v2247_v11 }
 0x3ed   : > { %v6328_v31 = vpop.eup %4784 }
 0x3f2   : > { %1949 = vmax.xlane.f32.xlu0 %v1948_v60 }
 0x3f3   : > { %2024 = vrot.lane.b32.xlu1 %v7620_v55, %s5080_s2  ;;  %v2173_v55 = vsel %vm591_vm1, %v6314_v26, -inf }
 0x3fa   : > { %1955 = vmax.xlane.f32.xlu0 %v1954_v59 }
 0x3fb   : > { %2242 = vrot.lane.b32.xlu1 %v7626_v36, %s5081_s20  ;;  %v6324_v36 = vadd.f32 %v2153_v54, %v7580_v6  ;;  %v7641_v6 = vld [vmem:[#allocation23_spill] sm:$0xff] }
 0x3fd   : > { %v2176_v44 = vsel %vm591_vm1, %v6324_v36, -inf }
 0x402   : > { %v1515_v27 = vpop.xlane.xlu1 %1514  ;;  %v1938_v29 = vpop.xlane.xlu2 %1937  ;;  %2174 = vmax.xlane.f32.xlu0 %v2173_v55  ;;  %v874_v55 = vsel %vm591_vm1, %v6033_v10, 0.0 }
 0x403   : > { %v1523_v11 = vsub.f32 %v6108_v37, %v1515_v27  ;;  %v1960_v60 = vsub.f32 %v6111_v34, %v1938_v29  ;;  %2022 = vrot.lane.b32.xlu1 %v7627_v43, %s5080_s2 }
 0x405   : > { %v1538_v15 = vmul.f32 1.442695, %v1523_v11  ;;  %v1968_v62 = vmul.f32 1.442695, %v1960_v60  ;;  %v1102_v60 = vsel %vm591_vm1, %v6085_v56, 0.0 }
 0x407   : > { %4786 = vpow2.f32 %v1538_v15 }
 0x408   : > { %4788 = vpow2.f32 %v1968_v62  ;;  %v1099_v62 = vsel %vm591_vm1, %v6062_v35, 0.0 }
 0x40a   : > { %2177 = vmax.xlane.f32.xlu0 %v2176_v44  ;;  %v1716_v59 = vpop.xlane.xlu1 %1715  ;;  %v6353_v44 = vpop.f32.mrf.mxu0 }
 0x40b   : > { %v1738_v54 = vsub.f32 %v6128_v51, %v1716_v59 }
 0x40d   : > { %v6330_v37 = vpop.eup %4786  ;;  %v1746_v27 = vmul.f32 1.442695, %v1738_v54  ;;  %v6363_v54 = vadd.f32 %v6130_v19, %v7579_v7 }
 0x40e   : > { %v6332_v34 = vpop.eup %4788  ;;  %v1575_v43 = vpack.c.bf16 %v6330_v37, %v6328_v31 }
 0x40f   : > { %v1984_v39 = vsel %vm591_vm1, %v6332_v34, 0.0  ;;  %4790 = vpow2.f32 %v1746_v27  ;;  %v1735_v27 = vsel %vm591_vm1, %v6363_v54, -inf }
 0x410   : > { %1985 = vadd.xlane.f32.xlu2 %v1984_v39  ;;  %4127 = vmatmul.msk.bf16.gmra.mxu0 %vm591_vm1, %v1575_v43  ;;  %v1540_v43 = vsel %vm591_vm1, %v6171_v3, 0.0 }
 0x412   : > { %875 = vadd.xlane.f32.xlu0 %v874_v55  ;;  %v6365_v55 = vpop.f32.mrf.mxu0 }
 0x413   : > { %7630 = vst [vmem:[#allocation18_spill] sm:$0xff] %v6365_v55 }
 0x415   : > { %v1719_v29 = vpop.xlane.xlu0 %1718  ;;  %v6351_v10 = vpop.eup %4790 }
 0x416   : > { %v1739_v11 = vsub.f32 %v6149_v12, %v1719_v29  ;;  %v1327_v12 = vsel %vm591_vm1, %v6209_v21, 0.0  ;;  %v6374_v29 = vadd.f32 %v6173_v28, %v7583_v1 }
 0x418   : > { %v1748_v15 = vmul.f32 1.442695, %v1739_v11  ;;  %1103 = vadd.xlane.f32.xlu2 %v1102_v60  ;;  %v883_v11 = vsel %vm591_vm1, %v6074_v14, 0.0  ;;  %v2161_v60 = vsel %vm591_vm1, %v6374_v29, -inf }
 0x41a   : > { %4792 = vpow2.f32 %v1748_v15  ;;  %1100 = vadd.xlane.f32.xlu0 %v1099_v62  ;;  %v6378_v19 = vpop.f32.mrf.mxu0  ;;  %v6384_v62 = vadd.f32 %v6195_v57, %v7582_v2  ;;  %v1549_v57 = vsel %vm591_vm1, %v6207_v50, 0.0 }
 0x41b   : > { %7631 = vst [vmem:[#allocation21_spill] sm:$0xff] %v6378_v19 }
 0x41c   : > { %v2164_v28 = vsel %vm591_vm1, %v6384_v62, -inf }
 0x41d   : > { %v6349_v51 = vpop.xlane.xlu0 %1940 }
 0x420   : > { %v4793_v59 = vpop.eup %4792  ;;  %1328 = vadd.xlane.f32.xlu2 %v1327_v12  ;;  %v1324_v12 = vsel %vm591_vm1, %v6201_v58, 0.0 }
 0x421   : > { %v1794_v56 = vpack.c.bf16 %v4793_v59, %v6351_v10  ;;  %v1765_v21 = vsel %vm591_vm1, %v4793_v59, 0.0 }
 0x422   : > { %v2245_v39 = vpop.permute.xlu1 %2244  ;;  %1541 = vadd.xlane.f32.xlu0 %v1540_v43  ;;  %v6390_v14 = vpop.f32.mrf.mxu0 }
 0x423   : > { %4132 = vmatmul.msk.bf16.vlgmr.msrb.gmra.mxu2 %vm591_vm1, %v1794_v56  ;;  %7632 = vst [vmem:[#allocation35_spill] sm:$0xff] %v6390_v14  ;;  %v6396_v56 = vadd.f32 %v6295_v48, %v7581_v5  ;;  %v1933_v43 = vpop.f32.mrf.mxu3 }
 0x424   : > { %2272 = vmatpush.bf16.msra.mxu2 %v2245_v39 }
 0x425   : > { %v1725_v35 = vpop.xlane.xlu0 %1724  ;;  %v1951_v58 = vsel %vm591_vm1, %v6396_v56, -inf }
 0x42a   : > { %1766 = vadd.xlane.f32.xlu0 %v1765_v21  ;;  %v6402_v21 = vpop.f32.mrf.mxu0 }
 0x42b   : > { %7633 = vst [vmem:[#allocation36_spill] sm:$0xff] %v6402_v21 }
 0x42d   : > { %1736 = vmax.xlane.f32.xlu1 %v1735_v27  ;;  %v6370_v3 = vpop.xlane.xlu0 %1727  ;;  %v6405_v27 = vadd.f32 %v1933_v43, %v7579_v7 }
 0x42f   : > { %v1957_v48 = vsel %vm591_vm1, %v6405_v27, -inf }
 0x432   : > { %884 = vadd.xlane.f32.xlu0 %v883_v11  ;;  %v1741_v11 = vsub.f32 %v6185_v23, %v1725_v35  ;;  %v6415_v2 = vpop.f32.mrf.mxu0 }
 0x433   : > { %7634 = vst [vmem:[#allocation37_spill] sm:$0xff] %v6415_v2 }
 0x435   : > { %2162 = vmax.xlane.f32.xlu1 %v2161_v60  ;;  %v1731_v15 = vpop.xlane.xlu0 %1730  ;;  %v2155_v60 = vpop.f32.mrf.mxu1 }
 0x436   : > { %v6413_v0 = vadd.f32 %v2155_v60, %v7579_v7  ;;  %v1743_v60 = vsub.f32 %v6217_v40, %v1731_v15  ;;  %v7642_v7 = vld [vmem:[#allocation26_spill] sm:$0xff] }
 0x438   : > { %v2179_v23 = vsel %vm591_vm1, %v6413_v0, -inf  ;;  %v1756_v40 = vmul.f32 1.442695, %v1743_v60 }
 0x43a   : > { %1325 = vadd.xlane.f32.xlu0 %v1324_v12  ;;  %v1752_v12 = vmul.f32 1.442695, %v1741_v11 }
 0x43c   : > { %4794 = vpow2.f32 %v1752_v12 }
 0x43d   : > { %2165 = vmax.xlane.f32.xlu1 %v2164_v28  ;;  %v6392_v59 = vpop.xlane.xlu0 %1733 }
 0x442   : > { %1550 = vadd.xlane.f32.xlu0 %v1549_v57 }
 0x445   : > { %1952 = vmax.xlane.f32.xlu1 %v1951_v58  ;;  %v2160_v39 = vpop.xlane.xlu0 %2159 }
 0x44d   : > { %1958 = vmax.xlane.f32.xlu1 %v1957_v48  ;;  %v1722_v50 = vpop.xlane.xlu1 %1721  ;;  %v1944_v28 = vpop.xlane.xlu0 %1943 }
 0x44e   : > { %v1740_v57 = vsub.f32 %v6263_v32, %v1722_v50  ;;  %v1962_v58 = vsub.f32 %v6266_v49, %v1944_v28  ;;  %v6420_v32 = vpop.eup %4794  ;;  %v2182_v28 = vsub.f32 %v6246_v16, %v2160_v39  ;;  %v1096_v16 = vsel %vm591_vm1, %v6060_v13, 0.0 }
 0x44f   : > { %v1961_v13 = vsub.f32 %v6161_v20, %v6349_v51 }
 0x450   : > { %v1750_v1 = vmul.f32 1.442695, %v1740_v57  ;;  %v1972_v43 = vmul.f32 1.442695, %v1962_v58  ;;  %v1742_v57 = vsub.f32 %v6199_v63, %v6370_v3  ;;  %v6432_v58 = vpop.f32.mrf.mxu0  ;;  %v2190_v15 = vmul.f32 1.442695, %v2182_v28  ;;  %v6439_v63 = vpop.f32.mrf.mxu2 }
 0x451   : > { %7635 = vst [vmem:[#allocation38_spill] sm:$0xff] %v6432_v58  ;;  %v1970_v28 = vmul.f32 1.442695, %v1961_v13 }
 0x452   : > { %4796 = vpow2.f32 %v1750_v1  ;;  %v1754_v39 = vmul.f32 1.442695, %v1742_v57 }
 0x453   : > { %4798 = vpow2.f32 %v1972_v43 }
 0x455   : > { %2180 = vmax.xlane.f32.xlu1 %v2179_v23  ;;  %v1947_v35 = vpop.xlane.xlu0 %1946  ;;  %v1108_v23 = vsel %vm591_vm1, %v6103_v61, 0.0  ;;  %v886_v61 = vsel %vm591_vm1, %v6094_v30, 0.0 }
 0x456   : > { %v1963_v11 = vsub.f32 %v6276_v52, %v1947_v35 }
 0x458   : > { %v4797_v49 = vpop.eup %4796  ;;  %v1974_v48 = vmul.f32 1.442695, %v1963_v11  ;;  %v6445_v35 = vpop.f32.mrf.mxu0  ;;  %v1321_v11 = vsel %vm591_vm1, %v6165_v45, 0.0  ;;  %v1762_v45 = vsel %vm591_vm1, %v6351_v10, 0.0 }
 0x459   : > { %v6423_v50 = vpop.eup %4798  ;;  %v1768_v1 = vsel %vm591_vm1, %v4797_v49, 0.0  ;;  %v1795_v12 = vpack.c.bf16 %v6420_v32, %v4797_v49  ;;  %v6460_v51 = vpop.f32.mrf.mxu2 }
 0x45a   : > { %4800 = vpow2.f32 %v1974_v48  ;;  %1769 = vadd.xlane.f32.xlu2 %v1768_v1  ;;  %v1990_v52 = vsel %vm591_vm1, %v6423_v50, 0.0 }
 0x45b   : > { %1991 = vadd.xlane.f32.xlu0 %v1990_v52  ;;  %4133 = vmatmul.msk.bf16.gmra.mxu2 %vm591_vm1, %v1795_v12  ;;  %4802 = vpow2.f32 %v1756_v40 }
 0x45c   : > { %4804 = vpow2.f32 %v2190_v15  ;;  %v1111_v15 = vsel %vm591_vm1, %v6105_v46, 0.0 }
 0x45d   : > { %1097 = vadd.xlane.f32.xlu1 %v1096_v16  ;;  %4806 = vpow2.f32 %v1754_v39  ;;  %v2169_v30 = vpop.xlane.xlu0 %2168  ;;  %v1333_v39 = vsel %vm591_vm1, %v6255_v24, 0.0  ;;  %v880_v24 = vsel %vm591_vm1, %v6072_v17, 0.0 }
 0x45e   : > { %4808 = vpow2.f32 %v1970_v28  ;;  %v2185_v16 = vsub.f32 %v6290_v33, %v2169_v30 }
 0x460   : > { %v6437_v43 = vpop.eup %4800  ;;  %v6465_v57 = vpop.f32.mrf.mxu0 }
 0x461   : > { %v1993_v3 = vsel %vm591_vm1, %v6437_v43, 0.0  ;;  %v6451_v60 = vpop.eup %4802 }
 0x462   : > { %1994 = vadd.xlane.f32.xlu2 %v1993_v3  ;;  %v6453_v48 = vpop.eup %4804  ;;  %v6472_v3 = vpop.f32.mrf.mxu2 }
 0x463   : > { %1109 = vadd.xlane.f32.xlu0 %v1108_v23  ;;  %v4807_v1 = vpop.eup %4806  ;;  %v2206_v20 = vsel %vm591_vm1, %v6453_v48, 0.0  ;;  %v2196_v23 = vmul.f32 1.442695, %v2185_v16  ;;  %v1771_v16 = vsel %vm591_vm1, %v6420_v32, 0.0 }
 0x464   : > { %v1796_v12 = vpack.c.bf16 %v6451_v60, %v4807_v1  ;;  %v4809_v40 = vpop.eup %4808  ;;  %v1774_v46 = vsel %vm591_vm1, %v4807_v1, 0.0 }
 0x465   : > { %v2025_v49 = vpop.permute.xlu1 %2024  ;;  %1322 = vadd.xlane.f32.xlu1 %v1321_v11  ;;  %v1987_v10 = vsel %vm591_vm1, %v4809_v40, 0.0  ;;  %4810 = vpow2.f32 %v2196_v23  ;;  %v2016_v33 = vpack.c.bf16 %v4809_v40, %v6332_v34  ;;  %v1105_v34 = vsel %vm591_vm1, %v6087_v9, 0.0 }
 0x466   : > { %2049 = vmatpush.bf16.msra.mxu0 %v2025_v49  ;;  %v2021_v49 = vpop.permute.xlu2 %2020 }
 0x468   : > { %v6475_v11 = vpop.f32.mrf.mxu0 }
 0x46a   : > { %887 = vadd.xlane.f32.xlu2 %v886_v61  ;;  %v6481_v28 = vpop.f32.mrf.mxu2 }
 0x46b   : > { %2207 = vadd.xlane.f32.xlu0 %v2206_v20  ;;  %4134 = vmatmul.msk.bf16.gmra.mxu2 %vm591_vm1, %v1796_v12  ;;  %v6484_v61 = vpop.eup %4810 }
 0x46c   : > { %v2215_v20 = vsel %vm591_vm1, %v6484_v61, 0.0 }
 0x46d   : > { %v2243_v52 = vpop.permute.xlu1 %2242  ;;  %1763 = vadd.xlane.f32.xlu1 %v1762_v45  ;;  %v2017_v45 = vpack.c.bf16 %v6437_v43, %v6423_v50  ;;  %v7637_v50 = vld [vmem:[#allocation24_spill] sm:$0xff] }
 0x46e   : > { %2273 = vmatpush.bf16.msra.mxu2 %v2243_v52  ;;  %v7636_v52 = vld [vmem:[#allocation19_spill] sm:$0xff]  ;;  %v889_v43 = vsel %vm591_vm1, %v7637_v50, 0.0 }
 0x46f   : > { %v1546_v30 = vsel %vm591_vm1, %v7636_v52, 0.0 }
 0x470   : > { %v6486_v12 = vpop.f32.mrf.mxu0 }
 0x472   : > { %1112 = vadd.xlane.f32.xlu2 %v1111_v15  ;;  %v6492_v1 = vpop.f32.mrf.mxu2 }
 0x473   : > { %1334 = vadd.xlane.f32.xlu0 %v1333_v39  ;;  %v1744_v39 = vsub.f32 %v6230_v47, %v6392_v59 }
 0x475   : > { %v2023_v13 = vpop.permute.xlu1 %2022  ;;  %1988 = vadd.xlane.f32.xlu1 %v1987_v10  ;;  %v1950_v10 = vpop.xlane.xlu0 %1949 }
 0x476   : > { %2050 = vmatpush.bf16.msra.mxu0 %v2023_v13  ;;  %v1758_v13 = vmul.f32 1.442695, %v1744_v39 }
 0x478   : > { %v6494_v17 = vpop.f32.mrf.mxu0  ;;  %4812 = vpow2.f32 %v1758_v13 }
 0x47a   : > { %2051 = vmatpush.bf16.msra.mxu0 %v2021_v49  ;;  %v6501_v40 = vpop.f32.mrf.mxu2 }
 0x47b   : > { %1775 = vadd.xlane.f32.xlu0 %v1774_v46 }
 0x47d   : > { %4140 = vmatmul.msk.bf16.vlgmr.msra.gmra.mxu0 %vm591_vm1, %v2016_v33  ;;  %881 = vadd.xlane.f32.xlu1 %v880_v24  ;;  %v1330_v24 = vsel %vm591_vm1, %v6251_v22, 0.0  ;;  %v1956_v47 = vpop.xlane.xlu0 %1955 }
 0x480   : > { %v6505_v9 = vpop.f32.mrf.mxu0 }
 0x482   : > { %v6507_v15 = vpop.f32.mrf.mxu2 }
 0x483   : > { %2216 = vadd.xlane.f32.xlu0 %v2215_v20 }
 0x485   : > { %1106 = vadd.xlane.f32.xlu1 %v1105_v34  ;;  %v2175_v39 = vpop.xlane.xlu0 %2174 }
 0x488   : > { %v6513_v23 = vpop.f32.mrf.mxu0 }
 0x48a   : > { %v6516_v32 = vpop.f32.mrf.mxu2 }
 0x48d   : > { %1547 = vadd.xlane.f32.xlu1 %v1546_v30  ;;  %4141 = vmatmul.msk.bf16.gmra.mxu0 %vm591_vm1, %v2017_v45  ;;  %v6523_v45 = vpop.eup %4812 }
 0x490   : > { %v6520_v20 = vpop.f32.mrf.mxu0 }
 0x495   : > { %1772 = vadd.xlane.f32.xlu1 %v1771_v16  ;;  %v6529_v16 = vpop.f32.mrf.mxu2 }
 0x498   : > { %v6533_v13 = vpop.f32.mrf.mxu0 }
 0x49d   : > { %890 = vadd.xlane.f32.xlu1 %v889_v43 }
 0x4a0   : > { %v1737_v49 = vpop.xlane.xlu1 %1736 }
 0x4a1   : > { %v1745_v46 = vsub.f32 %v6363_v54, %v1737_v49  ;;  %v1964_v49 = vsub.f32 %v6300_v4, %v1950_v10 }
 0x4a3   : > { %v1760_v33 = vmul.f32 1.442695, %v1745_v46 }
 0x4a5   : > { %4814 = vpow2.f32 %v1760_v33  ;;  %1331 = vadd.xlane.f32.xlu1 %v1330_v24  ;;  %v6537_v33 = vpop.f32.mrf.mxu2  ;;  %v2172_v24 = vpop.xlane.xlu2 %2171 }
 0x4a8   : > { %v2163_v59 = vpop.xlane.xlu1 %2162 }
 0x4a9   : > { %v2183_v34 = vsub.f32 %v6374_v29, %v2163_v59  ;;  %v1976_v59 = vmul.f32 1.442695, %v1964_v49 }
 0x4ab   : > { %v6525_v52 = vpop.eup %4814  ;;  %v2192_v54 = vmul.f32 1.442695, %v2183_v34 }
 0x4ac   : > { %v1797_v30 = vpack.c.bf16 %v6525_v52, %v6523_v45 }
 0x4ad   : > { %4816 = vpow2.f32 %v2192_v54  ;;  %v6550_v49 = vpop.f32.mrf.mxu2 }
 0x4ae   : > { %4135 = vmatmul.msk.bf16.gmra.mxu2 %vm591_vm1, %v1797_v30 }
 0x4b0   : > { %v2166_v22 = vpop.xlane.xlu1 %2165 }
 0x4b1   : > { %v2184_v50 = vsub.f32 %v6384_v62, %v2166_v22  ;;  %v2186_v62 = vsub.f32 %v6240_v42, %v2172_v24  ;;  %v6541_v22 = vpop.xlane.xlu0 %2177  ;;  %v2187_v24 = vsub.f32 %v6314_v26, %v2175_v39 }
 0x4b3   : > { %v4817_v43 = vpop.eup %4816  ;;  %v2194_v29 = vmul.f32 1.442695, %v2184_v50  ;;  %v1552_v50 = vsel %vm591_vm1, %v6237_v53, 0.0  ;;  %v1555_v53 = vsel %vm591_vm1, %v6235_v18, 0.0  ;;  %v2200_v26 = vmul.f32 1.442695, %v2187_v24 }
 0x4b4   : > { %v2209_v46 = vsel %vm591_vm1, %v4817_v43, 0.0  ;;  %v2238_v4 = vpack.c.bf16 %v4817_v43, %v6453_v48 }
 0x4b5   : > { %4818 = vpow2.f32 %v2194_v29  ;;  %2210 = vadd.xlane.f32.xlu2 %v2209_v46  ;;  %v6547_v29 = vpop.f32.mrf.mxu0 }
 0x4b6   : > { %4820 = vpow2.f32 %v1976_v59 }
 0x4b8   : > { %v1953_v34 = vpop.xlane.xlu1 %1952 }
 0x4b9   : > { %v1965_v54 = vsub.f32 %v6396_v56, %v1953_v34  ;;  %v2198_v56 = vmul.f32 1.442695, %v2186_v62  ;;  %v6560_v62 = vpop.xlane.xlu0 %875 }
 0x4bb   : > { %v4819_v30 = vpop.eup %4818  ;;  %v1978_v5 = vmul.f32 1.442695, %v1965_v54  ;;  %v1966_v54 = vsub.f32 %v6307_v38, %v1956_v47 }
 0x4bc   : > { %v2212_v10 = vsel %vm591_vm1, %v4819_v30, 0.0  ;;  %v4821_v46 = vpop.eup %4820 }
 0x4bd   : > { %4822 = vpow2.f32 %v1978_v5  ;;  %2213 = vadd.xlane.f32.xlu1 %v2212_v10  ;;  %1553 = vadd.xlane.f32.xlu2 %v1552_v50  ;;  %v1777_v5 = vsel %vm591_vm1, %v6451_v60, 0.0  ;;  %v1980_v10 = vmul.f32 1.442695, %v1966_v54  ;;  %v6565_v60 = vpop.xlane.xlu2 %878  ;;  %v6567_v50 = vpop.f32.mrf.mxu2  ;;  %v1996_v47 = vsel %vm591_vm1, %v4821_v46, 0.0 }
 0x4be   : > { %4148 = vmatmul.msk.bf16.vlgmr.msra.gmra.mxu2 %vm591_vm1, %v2238_v4  ;;  %4824 = vpow2.f32 %v2198_v56  ;;  %v2239_v56 = vpack.c.bf16 %v6484_v61, %v4819_v30  ;;  %v7639_v30 = vld [vmem:[#allocation27_spill] sm:$0xff] }
 0x4bf   : > { %4826 = vpow2.f32 %v2200_v26  ;;  %v643_v54 = vsel %vm591_vm1, %v7639_v30, 0.0  ;;  %v1114_v30 = vsel %vm591_vm1, %v7641_v6, 0.0 }
 0x4c0   : > { %v1959_v42 = vpop.xlane.xlu1 %1958 }
 0x4c1   : > { %v1967_v43 = vsub.f32 %v6405_v27, %v1959_v42  ;;  %v6563_v27 = vpop.f32.mrf.mxu0  ;;  %v7638_v42 = vld [vmem:[#allocation28_spill] sm:$0xff] }
 0x4c2   : > { %v640_v24 = vsel %vm591_vm1, %v7638_v42, 0.0 }
 0x4c3   : > { %v4823_v48 = vpop.eup %4822  ;;  %v1982_v39 = vmul.f32 1.442695, %v1967_v43 }
 0x4c4   : > { %v1999_v59 = vsel %vm591_vm1, %v4823_v48, 0.0  ;;  %v2018_v34 = vpack.c.bf16 %v4823_v48, %v4821_v46  ;;  %v4825_v4 = vpop.eup %4824  ;;  %v6575_v48 = vpop.xlane.xlu0 %1100 }
 0x4c5   : > { %1556 = vadd.xlane.f32.xlu1 %v1555_v53  ;;  %1778 = vadd.xlane.f32.xlu2 %v1777_v5  ;;  %4828 = vpow2.f32 %v1982_v39  ;;  %v2218_v38 = vsel %vm591_vm1, %v4825_v4, 0.0  ;;  %v4827_v43 = vpop.eup %4826  ;;  %v6583_v61 = vpop.xlane.xlu2 %1319 }
 0x4c6   : > { %2000 = vadd.xlane.f32.xlu0 %v1999_v59  ;;  %4142 = vmatmul.msk.bf16.gmra.mxu0 %vm591_vm1, %v2018_v34  ;;  %4830 = vpow2.f32 %v1980_v10  ;;  %v6581_v34 = vpop.f32.mrf.mxu2  ;;  %v2221_v26 = vsel %vm591_vm1, %v4827_v43, 0.0  ;;  %v7640_v10 = vld [vmem:[#allocation22_spill] sm:$0xff]  ;;  %v2240_v58 = vpack.c.bf16 %v4827_v43, %v4825_v4  ;;  %v1339_v4 = vsel %vm591_vm1, %v6284_v8, 0.0 }
 0x4c7   : > { %v1780_v8 = vsel %vm591_vm1, %v6523_v45, 0.0  ;;  %v1783_v45 = vsel %vm591_vm1, %v6525_v52, 0.0 }
 0x4c8   : > { %v2181_v18 = vpop.xlane.xlu1 %2180 }
 0x4c9   : > { %v6579_v59 = vpop.f32.mrf.mxu0 }
 0x4cb   : > { %v4829_v5 = vpop.eup %4828 }
 0x4cc   : > { %v4831_v46 = vpop.eup %4830 }
 0x4cd   : > { %2219 = vadd.xlane.f32.xlu2 %v2218_v38  ;;  %1997 = vadd.xlane.f32.xlu1 %v1996_v47  ;;  %v2019_v39 = vpack.c.bf16 %v4829_v5, %v4831_v46  ;;  %v895_v38 = vsel %vm591_vm1, %v7640_v10, 0.0  ;;  %v1545_v10 = vpop.xlane.xlu2 %1544 }
 0x4ce   : > { %641 = vadd.xlane.f32.xlu0 %v640_v24  ;;  %4149 = vmatmul.msk.bf16.gmra.mxu2 %vm591_vm1, %v2239_v56  ;;  %v1542_v56 = vpop.xlane.xlu0 %1541  ;;  %v2189_v24 = vsub.f32 %v6413_v0, %v2181_v18  ;;  %v6600_v2 = vpop.f32.mrf.mxu2 }
 0x4d0   : > { %v6577_v53 = vpop.xlane.xlu1 %1097  ;;  %v2204_v0 = vmul.f32 1.442695, %v2189_v24 }
 0x4d1   : > { %v6593_v42 = vpop.f32.mrf.mxu0 }
 0x4d2   : > { %4832 = vpow2.f32 %v2204_v0 }
 0x4d5   : > { %644 = vadd.xlane.f32.xlu2 %v643_v54  ;;  %2222 = vadd.xlane.f32.xlu1 %v2221_v26  ;;  %v892_v54 = vsel %vm591_vm1, %v7642_v7, 0.0  ;;  %v2188_v26 = vsub.f32 %v6324_v36, %v6541_v22  ;;  %v7643_v36 = vld [vmem:[#allocation25_spill] sm:$0xff] }
 0x4d6   : > { %896 = vadd.xlane.f32.xlu0 %v895_v38  ;;  %4143 = vmatmul.msk.bf16.gmra.mxu0 %vm591_vm1, %v2019_v39  ;;  %v1336_v39 = vsel %vm591_vm1, %v6280_v41, 0.0  ;;  %v6609_v7 = vpop.xlane.xlu0 %1766  ;;  %v1117_v22 = vsel %vm591_vm1, %v7643_v36, 0.0  ;;  %v1561_v41 = vsel %vm591_vm1, %v6330_v37, 0.0  ;;  %v6619_v38 = vpop.f32.mrf.mxu2  ;;  %v2002_v37 = vsel %vm591_vm1, %v4831_v46, 0.0 }
 0x4d7   : > { %v2202_v6 = vmul.f32 1.442695, %v2188_v26  ;;  %v1558_v26 = vsel %vm591_vm1, %v6328_v31, 0.0  ;;  %v2005_v31 = vsel %vm591_vm1, %v4829_v5, 0.0 }
 0x4d8   : > { %v6591_v47 = vpop.xlane.xlu1 %1322  ;;  %v4833_v24 = vpop.eup %4832 }
 0x4d9   : > { %v6615_v43 = vpop.f32.mrf.mxu0  ;;  %4834 = vpow2.f32 %v2202_v6  ;;  %v2227_v46 = vsel %vm591_vm1, %v4833_v24, 0.0 }
 0x4da   : > { %4836 = vrcp.f32 %v6560_v62 }
 0x4db   : > { %4838 = vrcp.f32 %v6565_v60  ;;  %v7644_v60 = vld [vmem:[#allocation29_spill] sm:$0xff] }
 0x4dc   : > { %4840 = vrcp.f32 %v1542_v56 }
 0x4dd   : > { %1115 = vadd.xlane.f32.xlu2 %v1114_v30  ;;  %893 = vadd.xlane.f32.xlu1 %v892_v54  ;;  %4842 = vrcp.f32 %v1545_v10 }
 0x4de   : > { %1337 = vadd.xlane.f32.xlu0 %v1336_v39  ;;  %4150 = vmatmul.msk.bf16.gmra.mxu2 %vm591_vm1, %v2240_v58  ;;  %v1986_v58 = vpop.xlane.xlu2 %1985  ;;  %v6627_v6 = vpop.xlane.xlu0 %884  ;;  %4844 = vrcp.f32 %v6577_v53  ;;  %v7645_v53 = vld [vmem:[#allocation30_spill] sm:$0xff] }
 0x4df   : > { %v4835_v30 = vpop.eup %4834  ;;  %v6633_v36 = vpop.f32.mrf.mxu2  ;;  %4846 = vrcp.f32 %v6575_v48 }
 0x4e0   : > { %v6607_v18 = vpop.xlane.xlu1 %1763  ;;  %v2241_v39 = vpack.c.bf16 %v4833_v24, %v4835_v30  ;;  %v2224_v24 = vsel %vm591_vm1, %v4835_v30, 0.0  ;;  %4848 = vrcp.f32 %v1986_v58 }
 0x4e1   : > { %v6625_v0 = vpop.f32.mrf.mxu0 }
 0x4e5   : > { %1340 = vadd.xlane.f32.xlu2 %v1339_v4  ;;  %1118 = vadd.xlane.f32.xlu1 %v1117_v22 }
 0x4e6   : > { %1562 = vadd.xlane.f32.xlu0 %v1561_v41  ;;  %v6631_v4 = vpop.xlane.xlu2 %1103 }
 0x4e7   : > { %v1831_v62 = vpop.f32.mrf.mxu2 }
 0x4e8   : > { %v1989_v54 = vpop.xlane.xlu1 %1988 }
 0x4e9   : > { %v6643_v41 = vpop.f32.mrf.mxu0  ;;  %4850 = vrcp.f32 %v1989_v54 }
 0x4ea   : > { %4852 = vrcp.f32 %v6607_v18 }
 0x4eb   : > { %4854 = vrcp.f32 %v6591_v47 }
 0x4ec   : > { %4856 = vrcp.f32 %v6583_v61 }
 0x4ed   : > { %1781 = vadd.xlane.f32.xlu2 %v1780_v8  ;;  %1559 = vadd.xlane.f32.xlu1 %v1558_v26  ;;  %v6645_v8 = vpop.xlane.xlu0 %1325  ;;  %v4837_v26 = vpop.eup %4836  ;;  %4858 = vrcp.f32 %v6609_v7 }
 0x4ee   : > { %2003 = vadd.xlane.f32.xlu0 %v2002_v37  ;;  %4151 = vmatmul.msk.bf16.gmra.mxu2 %vm591_vm1, %v2241_v39  ;;  %v6647_v39 = vpop.xlane.xlu2 %1328  ;;  %v4839_v5 = vpop.eup %4838  ;;  %v963_v52 = vmul.f32 %v4837_v26, %v6439_v63  ;;  %v646_v37 = vsel %vm591_vm1, %v7644_v60, 0.0 }
 0x4ef   : > { %v4841_v56 = vpop.eup %4840  ;;  %v1833_v10 = vpop.f32.mrf.mxu2 }
 0x4f0   : > { %v6641_v22 = vpop.xlane.xlu1 %881  ;;  %v4843_v30 = vpop.eup %4842 }
 0x4f1   : > { %v1630_v14 = vmul.f32 %v4843_v30, %v6547_v29  ;;  %4860 = vrcp.f32 %v6641_v22 }
 0x4f2   : > { %4862 = vrcp.f32 %v6627_v6 }
 0x4f5   : > { %2006 = vadd.xlane.f32.xlu2 %v2005_v31  ;;  %1784 = vadd.xlane.f32.xlu1 %v1783_v45  ;;  %v964_v31 = vmul.f32 %v4839_v5, %v6460_v51  ;;  %v6658_v63 = vpop.xlane.xlu0 %1550  ;;  %v1629_v51 = vmul.f32 %v4841_v56, %v6533_v13  ;;  %v649_v5 = vsel %vm591_vm1, %v7645_v53, 0.0  ;;  %v1638_v53 = vpack.c.bf16 %v1630_v14, %v1630_v14 }
 0x4f6   : > { %2228 = vadd.xlane.f32.xlu0 %v2227_v46  ;;  %v971_v46 = vpack.c.bf16 %v963_v52, %v963_v52  ;;  %v6660_v60 = vpop.xlane.xlu2 %1769 }
 0x4f7   : > { %v972_v26 = vpack.c.bf16 %v964_v31, %v964_v31  ;;  %v1637_v55 = vpack.c.bf16 %v1629_v51, %v1629_v51  ;;  %v6677_v47 = vpop.f32.mrf.mxu2  ;;  %v2424_v51 = vunpack.c.l.b16 %v1638_v53 }
 0x4f8   : > { %v6656_v21 = vpop.xlane.xlu1 %1106 }
 0x4f9   : > { %v2340_v52 = vunpack.c.l.b16 %v972_v26  ;;  %v2423_v30 = vunpack.c.l.b16 %v1637_v55  ;;  %4864 = vrcp.f32 %v6656_v21 }
 0x4fa   : > { %v2053_v45 = vpop.f32.mrf.mxu0  ;;  %4866 = vrcp.f32 %v6631_v4 }
 0x4fb   : > { %v2431_v19 = vpack.c.b16 %v2424_v51, %v2423_v30  ;;  %4868 = vrcp.f32 %v6645_v8 }
 0x4fc   : > { %4870 = vrcp.f32 %v6647_v39 }
 0x4fd   : > { %647 = vadd.xlane.f32.xlu2 %v646_v37  ;;  %2225 = vadd.xlane.f32.xlu1 %v2224_v24  ;;  %v4845_v37 = vpop.eup %4844  ;;  %v2339_v24 = vunpack.c.l.b16 %v971_v46  ;;  %v6671_v46 = vpop.xlane.xlu0 %1991 }
 0x4fe   : > { %v4847_v48 = vpop.eup %4846  ;;  %v1185_v31 = vmul.f32 %v4845_v37, %v6445_v35  ;;  %v6679_v61 = vpop.xlane.xlu2 %1994 }
 0x4ff   : > { %v2347_v58 = vpack.c.b16 %v2340_v52, %v2339_v24  ;;  %v1186_v13 = vmul.f32 %v4847_v48, %v6465_v57  ;;  %v4849_v56 = vpop.eup %4848 }
 0x500   : > { %v6674_v29 = vpop.xlane.xlu1 %1547  ;;  %v4851_v35 = vpop.eup %4850  ;;  %v1193_v18 = vpack.c.bf16 %v1185_v31, %v1185_v31 }
 0x501   : > { %v4853_v26 = vpop.eup %4852  ;;  %v1194_v24 = vpack.c.bf16 %v1186_v13, %v1186_v13  ;;  %4872 = vrcp.f32 %v6674_v29 }
 0x502   : > { %v2055_v54 = vpop.f32.mrf.mxu0  ;;  %v4855_v37 = vpop.eup %4854  ;;  %v2367_v48 = vunpack.c.l.b16 %v1193_v18  ;;  %v1851_v7 = vmul.f32 %v4853_v26, %v1831_v62  ;;  %4874 = vrcp.f32 %v6658_v63 }
 0x503   : > { %v2074_v57 = vmul.f32 %v4851_v35, %v2055_v54  ;;  %v4857_v14 = vpop.eup %4856  ;;  %v2368_v25 = vunpack.c.l.b16 %v1194_v24  ;;  %v6688_v26 = vpop.f32.mrf.mxu2 }
 0x504   : > { %v4859_v52 = vpop.eup %4858  ;;  %v1407_v54 = vmul.f32 %v4857_v14, %v6529_v16  ;;  %v1859_v13 = vpack.c.bf16 %v1851_v7, %v1851_v7 }
 0x505   : > { %650 = vadd.xlane.f32.xlu1 %v649_v5  ;;  %v2073_v5 = vmul.f32 %v4849_v56, %v2053_v45  ;;  %v2082_v31 = vpack.c.bf16 %v2074_v57, %v2074_v57  ;;  %v1852_v55 = vmul.f32 %v4859_v52, %v1833_v10  ;;  %v6686_v45 = vpop.xlane.xlu0 %1109  ;;  %v2375_v62 = vpack.c.b16 %v2368_v25, %v2367_v48  ;;  %v4861_v18 = vpop.eup %4860 }
 0x506   : > { %v1415_v6 = vpack.c.bf16 %v1407_v54, %v1407_v54  ;;  %v6691_v10 = vpop.xlane.xlu2 %887  ;;  %v4863_v30 = vpop.eup %4862  ;;  %v2451_v57 = vunpack.c.l.b16 %v1859_v13  ;;  %v965_v25 = vmul.f32 %v4861_v18, %v6472_v3 }
 0x507   : > { %v2081_v35 = vpack.c.bf16 %v2073_v5, %v2073_v5  ;;  %v2480_v22 = vunpack.c.l.b16 %v2082_v31  ;;  %v966_v5 = vmul.f32 %v4863_v30, %v6481_v28  ;;  %v4865_v52 = vpop.eup %4864 }
 0x508   : > { %v1773_v53 = vpop.xlane.xlu1 %1772  ;;  %v2395_v51 = vunpack.c.l.b16 %v1415_v6  ;;  %v973_v48 = vpack.c.bf16 %v965_v25, %v965_v25  ;;  %v4867_v3 = vpop.eup %4866  ;;  %v1188_v54 = vmul.f32 %v4865_v52, %v6486_v12 }
 0x509   : > { %v2479_v16 = vunpack.c.l.b16 %v2081_v35  ;;  %v974_v21 = vpack.c.bf16 %v966_v5, %v966_v5  ;;  %v1187_v35 = vmul.f32 %v4867_v3, %v6475_v11  ;;  %4876 = vrcp.f32 %v1773_v53 }
 0x50a   : > { %2351 = vrot.lane.b32.xlu0 %v2347_v58, %s5081_s20  ;;  %v1408_v58 = vmul.f32 %v4855_v37, %v6537_v33  ;;  %v1860_v33 = vpack.c.bf16 %v1852_v55, %v1852_v55  ;;  %v2341_v55 = vunpack.c.l.b16 %v973_v48  ;;  %4878 = vrcp.f32 %v6660_v60 }
 0x50b   : > { %v2487_v37 = vpack.c.b16 %v2480_v22, %v2479_v16  ;;  %v1841_v4 = vpop.f32.mrf.mxu2  ;;  %v2342_v13 = vunpack.c.l.b16 %v974_v21  ;;  %v4869_v22 = vpop.eup %4868  ;;  %v1195_v18 = vpack.c.bf16 %v1187_v35, %v1187_v35 }
 0x50c   : > { %v1416_v56 = vpack.c.bf16 %v1408_v58, %v1408_v58  ;;  %v2452_v24 = vunpack.c.l.b16 %v1860_v33  ;;  %v4871_v33 = vpop.eup %4870  ;;  %v1409_v8 = vmul.f32 %v4869_v22, %v6550_v49 }
 0x50d   : > { %v6698_v58 = vpop.xlane.xlu0 %2207  ;;  %v2369_v30 = vunpack.c.l.b16 %v1195_v18 }
 0x50e   : > { %v2459_v14 = vpack.c.b16 %v2452_v24, %v2451_v57  ;;  %v6705_v28 = vpop.xlane.xlu2 %1112  ;;  %v1410_v57 = vmul.f32 %v4871_v33, %v6567_v50 }
 0x510   : > { %v6701_v31 = vpop.xlane.xlu1 %890  ;;  %v1418_v24 = vpack.c.bf16 %v1410_v57, %v1410_v57 }
 0x512   : > { %2435 = vrot.lane.b32.xlu0 %v2431_v19, %s5077_s30  ;;  %v2396_v19 = vunpack.c.l.b16 %v1416_v56  ;;  %v2348_v56 = vpack.c.b16 %v2342_v13, %v2341_v55 }
 0x513   : > { %v1843_v11 = vpop.f32.mrf.mxu2 }
 0x514   : > { %v2403_v7 = vpack.c.b16 %v2396_v19, %v2395_v51  ;;  %v1417_v19 = vpack.c.bf16 %v1409_v8, %v1409_v8 }
 0x515   : > { %2379 = vrot.lane.b32.xlu2 %v2375_v62, %s5080_s2  ;;  %v1196_v62 = vpack.c.bf16 %v1188_v54, %v1188_v54  ;;  %v6711_v6 = vpop.xlane.xlu0 %1334 }
 0x516   : > { %v2397_v29 = vunpack.c.l.b16 %v1417_v19 }
 0x517   : > { %v2370_v16 = vunpack.c.l.b16 %v1196_v62 }
 0x518   : > { %v6715_v12 = vpop.xlane.xlu1 %1331 }
 0x519   : > { %v2376_v25 = vpack.c.b16 %v2370_v16, %v2369_v30 }
 0x51a   : > { %2491 = vrot.lane.b32.xlu0 %v2487_v37, %s5078_s1  ;;  %v4873_v37 = vpop.eup %4872 }
 0x51b   : > { %v4875_v51 = vpop.eup %4874  ;;  %v1631_v49 = vmul.f32 %v4873_v37, %v6563_v27 }
 0x51c   : > { %v1632_v50 = vmul.f32 %v4875_v51, %v6579_v59  ;;  %v4877_v3 = vpop.eup %4876 }
 0x51d   : > { %2463 = vrot.lane.b32.xlu2 %v2459_v14, %s5075_s27  ;;  %v1776_v63 = vpop.xlane.xlu0 %1775  ;;  %v1639_v52 = vpack.c.bf16 %v1631_v49, %v1631_v49  ;;  %v1854_v55 = vmul.f32 %v4877_v3, %v6688_v26  ;;  %v4879_v13 = vpop.eup %4878 }
 0x51e   : > { %2407 = vrot.lane.b32.xlu1 %v2403_v7, %s5079_s19  ;;  %v2398_v7 = vunpack.c.l.b16 %v1418_v24  ;;  %4880 = vrcp.f32 %v1776_v63  ;;  %v1640_v53 = vpack.c.bf16 %v1632_v50, %v1632_v50  ;;  %v1853_v60 = vmul.f32 %v4879_v13, %v6677_v47  ;;  %v2058_v47 = vpop.f32.mrf.mxu0  ;;  %v7647_v50 = vld [vmem:[#allocation32_spill] sm:$0xff] }
 0x51f   : > { %v2425_v27 = vunpack.c.l.b16 %v1639_v52  ;;  %v1862_v22 = vpack.c.bf16 %v1854_v55, %v1854_v55  ;;  %v652_v52 = vsel %vm591_vm1, %v7647_v50, 0.0 }
 0x520   : > { %v2404_v21 = vpack.c.b16 %v2398_v7, %v2397_v29  ;;  %v2426_v59 = vunpack.c.l.b16 %v1640_v53  ;;  %v1861_v8 = vpack.c.bf16 %v1853_v60, %v1853_v60  ;;  %v7646_v29 = vld [vmem:[#allocation31_spill] sm:$0xff] }
 0x521   : > { %v2454_v16 = vunpack.c.l.b16 %v1862_v22 }
 0x522   : > { %v2432_v18 = vpack.c.b16 %v2426_v59, %v2425_v27  ;;  %v2453_v24 = vunpack.c.l.b16 %v1861_v8 }
 0x524   : > { %v2460_v49 = vpack.c.b16 %v2454_v16, %v2453_v24 }
 0x526   : > { %2353 = vrot.lane.b32.xlu1 %v2348_v56, %s5081_s20  ;;  %v4881_v56 = vpop.eup %4880 }
 0x527   : > { %v1855_v33 = vmul.f32 %v4881_v56, %v1841_v4  ;;  %v655_v4 = vsel %vm591_vm1, %v7646_v29, 0.0  ;;  %v2060_v56 = vpop.f32.mrf.mxu0 }
 0x528   : > { %v2211_v39 = vpop.xlane.xlu2 %2210 }
 0x529   : > { %v1863_v19 = vpack.c.bf16 %v1855_v33, %v1855_v33 }
 0x52e   : > { %2381 = vrot.lane.b32.xlu1 %v2376_v25, %s5080_s2 }
 0x530   : > { %v6721_v5 = vpop.xlane.xlu1 %2213  ;;  %v6723_v14 = vpop.xlane.xlu2 %1553 }
 0x531   : > { %v6725_v48 = vpop.f32.mrf.mxu2 }
 0x536   : > { %2409 = vrot.lane.b32.xlu1 %v2404_v21, %s5079_s19 }
 0x538   : > { %v6731_v54 = vpop.xlane.xlu1 %1556  ;;  %v1779_v35 = vpop.xlane.xlu2 %1778 }
 0x539   : > { %v6733_v62 = vpop.f32.mrf.mxu2  ;;  %4882 = vrcp.f32 %v1779_v35 }
 0x53a   : > { %4884 = vrcp.f32 %v6698_v58  ;;  %v6744_v58 = vunpack.c.l.b16 %v1863_v19 }
 0x53b   : > { %4886 = vrcp.f32 %v2211_v39 }
 0x53c   : > { %4888 = vrcp.f32 %v6679_v61 }
 0x53d   : > { %4890 = vrcp.f32 %v6671_v46 }
 0x53e   : > { %2437 = vrot.lane.b32.xlu1 %v2432_v18, %s5077_s30  ;;  %4892 = vrcp.f32 %v6701_v31  ;;  %v2217_v18 = vpop.xlane.xlu0 %2216 }
 0x53f   : > { %v4883_v26 = vpop.eup %4882  ;;  %4894 = vrcp.f32 %v6721_v5 }
 0x540   : > { %v6738_v30 = vpop.xlane.xlu2 %2219  ;;  %v6740_v57 = vpop.xlane.xlu1 %1997  ;;  %v1856_v25 = vmul.f32 %v4883_v26, %v1843_v11  ;;  %4896 = vrcp.f32 %v6691_v10 }
 0x541   : > { %v2275_v37 = vpop.f32.mrf.mxu2  ;;  %v4885_v63 = vpop.eup %4884  ;;  %4898 = vrcp.f32 %v2217_v18 }
 0x542   : > { %v1864_v51 = vpack.c.bf16 %v1856_v25, %v1856_v25  ;;  %v2295_v21 = vmul.f32 %v4885_v63, %v2275_v37  ;;  %v4887_v53 = vpop.eup %4886  ;;  %4900 = vrcp.f32 %v6705_v28 }
 0x543   : > { %v4889_v22 = vpop.eup %4888  ;;  %4902 = vrcp.f32 %v6686_v45 }
 0x544   : > { %656 = vadd.xlane.f32.xlu0 %v655_v4  ;;  %v6746_v7 = vunpack.c.l.b16 %v1864_v51  ;;  %v2303_v55 = vpack.c.bf16 %v2295_v21, %v2295_v21  ;;  %v2076_v33 = vmul.f32 %v4889_v22, %v2060_v56  ;;  %v4891_v16 = vpop.eup %4890  ;;  %4904 = vrcp.f32 %v6715_v12 }
 0x545   : > { %v2075_v19 = vmul.f32 %v4891_v16, %v2058_v47  ;;  %v4893_v31 = vpop.eup %4892  ;;  %4906 = vrcp.f32 %v6711_v6 }
 0x546   : > { %653 = vadd.xlane.f32.xlu2 %v652_v52  ;;  %2465 = vrot.lane.b32.xlu1 %v2460_v49, %s5075_s27  ;;  %v2461_v39 = vpack.c.b16 %v6746_v7, %v6744_v58  ;;  %v2507_v59 = vunpack.c.l.b16 %v2303_v55  ;;  %v2084_v25 = vpack.c.bf16 %v2076_v33, %v2076_v33  ;;  %v4895_v37 = vpop.eup %4894  ;;  %v2001_v29 = vpop.xlane.xlu0 %2000  ;;  %v968_v4 = vmul.f32 %v4893_v31, %v6501_v40 }
 0x547   : > { %v2083_v24 = vpack.c.bf16 %v2075_v19, %v2075_v19  ;;  %v4897_v5 = vpop.eup %4896 }
 0x548   : > { %v6753_v11 = vpop.xlane.xlu2 %644  ;;  %v6755_v3 = vpop.xlane.xlu1 %2222  ;;  %v2482_v49 = vunpack.c.l.b16 %v2084_v25  ;;  %v967_v52 = vmul.f32 %v4897_v5, %v6492_v1  ;;  %v976_v55 = vpack.c.bf16 %v968_v4, %v968_v4 }
 0x549   : > { %v2277_v27 = vpop.f32.mrf.mxu2  ;;  %v4899_v47 = vpop.eup %4898  ;;  %v2481_v21 = vunpack.c.l.b16 %v2083_v24 }
 0x54a   : > { %v2296_v35 = vmul.f32 %v4887_v53, %v2277_v27  ;;  %v975_v56 = vpack.c.bf16 %v967_v52, %v967_v52  ;;  %v2344_v22 = vunpack.c.l.b16 %v976_v55  ;;  %v2063_v4 = vpop.f32.mrf.mxu0 }
 0x54c   : > { %v2304_v13 = vpack.c.bf16 %v2296_v35, %v2296_v35  ;;  %v2488_v35 = vpack.c.b16 %v2482_v49, %v2481_v21  ;;  %v2343_v16 = vunpack.c.l.b16 %v975_v56 }
 0x54e   : > { %v2508_v60 = vunpack.c.l.b16 %v2304_v13  ;;  %v4901_v13 = vpop.eup %4900  ;;  %v2349_v31 = vpack.c.b16 %v2344_v22, %v2343_v16 }
 0x54f   : > { %v1190_v45 = vmul.f32 %v4901_v13, %v6505_v9 }
 0x550   : > { %v2515_v8 = vpack.c.b16 %v2508_v60, %v2507_v59  ;;  %v6761_v26 = vpop.xlane.xlu2 %1115  ;;  %v6763_v61 = vpop.xlane.xlu1 %893 }
 0x551   : > { %v2280_v46 = vpop.f32.mrf.mxu2  ;;  %v4903_v60 = vpop.eup %4902  ;;  %v1198_v19 = vpack.c.bf16 %v1190_v45, %v1190_v45  ;;  %v7648_v45 = vld [vmem:[#allocation34_spill] sm:$0xff] }
 0x552   : > { %2519 = vrot.lane.b32.xlu1 %v2515_v8, %s5076_s28  ;;  %v2297_v51 = vmul.f32 %v4895_v37, %v2280_v46  ;;  %v1189_v8 = vmul.f32 %v4903_v60, %v6494_v17  ;;  %v6782_v46 = vpop.xlane.xlu0 %641  ;;  %v4905_v12 = vpop.eup %4904  ;;  %v658_v22 = vsel %vm591_vm1, %v7648_v45, 0.0 }
 0x553   : > { %v4907_v9 = vpop.eup %4906  ;;  %v2372_v37 = vunpack.c.l.b16 %v1198_v19  ;;  %v1411_v24 = vmul.f32 %v4905_v12, %v6581_v34  ;;  %v2065_v13 = vpop.f32.mrf.mxu0 }
 0x554   : > { %v2305_v53 = vpack.c.bf16 %v2297_v51, %v2297_v51  ;;  %v1197_v25 = vpack.c.bf16 %v1189_v8, %v1189_v8  ;;  %v1412_v17 = vmul.f32 %v4907_v9, %v6600_v2 }
 0x555   : > { %v1419_v49 = vpack.c.bf16 %v1411_v24, %v1411_v24 }
 0x556   : > { %v2509_v40 = vunpack.c.l.b16 %v2305_v53  ;;  %v2371_v5 = vunpack.c.l.b16 %v1197_v25  ;;  %v1420_v21 = vpack.c.bf16 %v1412_v17, %v1412_v17 }
 0x558   : > { %v6769_v63 = vpop.xlane.xlu2 %1340  ;;  %v6771_v10 = vpop.xlane.xlu1 %1118 }
 0x559   : > { %v2282_v50 = vpop.f32.mrf.mxu2 }
 0x55a   : > { %v2298_v27 = vmul.f32 %v4899_v47, %v2282_v50  ;;  %v897_v47 = vpop.xlane.xlu0 %896  ;;  %v2377_v50 = vpack.c.b16 %v2372_v37, %v2371_v5 }
 0x55c   : > { %v2306_v28 = vpack.c.bf16 %v2298_v27, %v2298_v27  ;;  %v2399_v27 = vunpack.c.l.b16 %v1419_v49  ;;  %v4538_v49 = vld [vmem:[%s6819_s3 + $0x30] sm:$0xff] }
 0x55e   : > { %v2510_v59 = vunpack.c.l.b16 %v2306_v28  ;;  %2493 = vrot.lane.b32.xlu2 %v2488_v35, %s5078_s1  ;;  %v2400_v35 = vunpack.c.l.b16 %v1420_v21 }
 0x560   : > { %v2516_v18 = vpack.c.b16 %v2510_v59, %v2509_v40  ;;  %v6778_v1 = vpop.xlane.xlu1 %1559  ;;  %v1782_v33 = vpop.xlane.xlu2 %1781  ;;  %v2405_v28 = vpack.c.b16 %v2400_v35, %v2399_v27 }
 0x561   : > { %4908 = vrcp.f32 %v1782_v33  ;;  %v6803_v16 = vpop.f32.mrf.mxu2  ;;  %v2068_v35 = vpop.f32.mrf.mxu0 }
 0x562   : > { %2521 = vrot.lane.b32.xlu0 %v2516_v18, %s5076_s28  ;;  %v1338_v59 = vpop.xlane.xlu0 %1337 }
 0x566   : > { %2355 = vrot.lane.b32.xlu2 %v2349_v31, %s5081_s20 }
 0x567   : > { %v4909_v51 = vpop.eup %4908 }
 0x568   : > { %v1785_v6 = vpop.xlane.xlu1 %1784  ;;  %v1857_v52 = vmul.f32 %v4909_v51, %v6725_v48 }
 0x569   : > { %4910 = vrcp.f32 %v1785_v6  ;;  %v2287_v5 = vpop.f32.mrf.mxu2 }
 0x56a   : > { %4912 = vrcp.f32 %v2001_v29  ;;  %v1865_v34 = vpack.c.bf16 %v1857_v52, %v1857_v52 }
 0x56b   : > { %4914 = vrcp.f32 %v6740_v57 }
 0x56c   : > { %v6792_v56 = vunpack.c.l.b16 %v1865_v34  ;;  %4916 = vrcp.f32 %v6763_v61 }
 0x56d   : > { %4918 = vrcp.f32 %v897_v47 }
 0x56e   : > { %2383 = vrot.lane.b32.xlu2 %v2377_v50, %s5080_s2  ;;  %4920 = vrcp.f32 %v6731_v54  ;;  %v1563_v54 = vpop.xlane.xlu0 %1562 }
 0x56f   : > { %v4911_v53 = vpop.eup %4910  ;;  %4922 = vrcp.f32 %v6769_v63 }
 0x570   : > { %v1858_v55 = vmul.f32 %v4911_v53, %v6733_v62  ;;  %v4913_v48 = vpop.eup %4912  ;;  %v6805_v19 = vpop.xlane.xlu1 %2225  ;;  %4924 = vrcp.f32 %v6723_v14  ;;  %v4539_v14 = vld [vmem:[%s6819_s3 + $0x38] sm:$0xff] }
 0x571   : > { %v4915_v60 = vpop.eup %4914  ;;  %v2078_v62 = vmul.f32 %v4913_v48, %v2065_v13  ;;  %4926 = vrcp.f32 %v1338_v59  ;;  %2645 = vmatpush.bf16.msra.mxu3 %v4539_v14 }
 0x572   : > { %v1866_v2 = vpack.c.bf16 %v1858_v55, %v1858_v55  ;;  %v2077_v29 = vmul.f32 %v4915_v60, %v2063_v4  ;;  %v4917_v33 = vpop.eup %4916  ;;  %4928 = vrcp.f32 %v6771_v10  ;;  %v4536_v60 = vld [vmem:[%s6819_s3 + $0x20] sm:$0xff] }
 0x573   : > { %v2086_v18 = vpack.c.bf16 %v2078_v62, %v2078_v62  ;;  %v4919_v61 = vpop.eup %4918  ;;  %v969_v12 = vmul.f32 %v4917_v33, %v6507_v15  ;;  %4930 = vrcp.f32 %v6761_v26 }
 0x574   : > { %v6794_v40 = vunpack.c.l.b16 %v1866_v2  ;;  %v2085_v8 = vpack.c.bf16 %v2077_v29, %v2077_v29  ;;  %v970_v9 = vmul.f32 %v4919_v61, %v6516_v32  ;;  %v4921_v58 = vpop.eup %4920  ;;  %4932 = vrcp.f32 %v6755_v3  ;;  %v2290_v29 = vpop.f32.mrf.mxu2 }
 0x575   : > { %v2484_v31 = vunpack.c.l.b16 %v2086_v18  ;;  %v4923_v63 = vpop.eup %4922  ;;  %v1634_v32 = vmul.f32 %v4921_v58, %v6615_v43  ;;  %v7649_v43 = vld [vmem:[#allocation33_spill] sm:$0xff]  ;;  %2646 = vmatpush.bf16.msra.mxu3 %v4538_v49  ;;  %4934 = vrcp.f32 %v6738_v30 }
 0x576   : > { %2411 = vrot.lane.b32.xlu2 %v2405_v28, %s5079_s19  ;;  %v2462_v57 = vpack.c.b16 %v6794_v40, %v6792_v56  ;;  %v2483_v25 = vunpack.c.l.b16 %v2085_v8  ;;  %v4925_v37 = vpop.eup %4924  ;;  %v978_v24 = vpack.c.bf16 %v970_v9, %v970_v9  ;;  %v1414_v51 = vmul.f32 %v4923_v63, %v6633_v36  ;;  %v2004_v50 = vpop.xlane.xlu0 %2003  ;;  %v4535_v58 = vld [vmem:[%s6819_s3 + $0x18] sm:$0xff] }
 0x577   : > { %v4927_v15 = vpop.eup %4926  ;;  %v1633_v4 = vmul.f32 %v4925_v37, %v6593_v42  ;;  %v1642_v52 = vpack.c.bf16 %v1634_v32, %v1634_v32  ;;  %v661_v26 = vsel %vm591_vm1, %v7649_v43, 0.0  ;;  %v4537_v42 = vld [vmem:[%s6819_s3 + $0x28] sm:$0xff]  ;;  %4936 = vrcp.f32 %v6778_v1  ;;  %v2070_v37 = vpop.f32.mrf.mxu0  ;;  %v4534_v32 = vld [vmem:[%s6819_s3 + $0x10] sm:$0xff] }
 0x578   : > { %v2489_v7 = vpack.c.b16 %v2484_v31, %v2483_v25  ;;  %v6827_v17 = vpop.xlane.xlu1 %650  ;;  %v2346_v47 = vunpack.c.l.b16 %v978_v24  ;;  %v1413_v10 = vmul.f32 %v4927_v15, %v6619_v38  ;;  %v4929_v21 = vpop.eup %4928  ;;  %v1422_v36 = vpack.c.bf16 %v1414_v51, %v1414_v51 }
 0x579   : > { %v1641_v27 = vpack.c.bf16 %v1633_v4, %v1633_v4  ;;  %v4931_v34 = vpop.eup %4930  ;;  %v2007_v38 = vpop.xlane.xlu2 %2006  ;;  %v2428_v3 = vunpack.c.l.b16 %v1642_v52  ;;  %v1192_v2 = vmul.f32 %v4929_v21, %v6520_v20  ;;  %2647 = vmatpush.bf16.msra.mxu3 %v4537_v42  ;;  %4938 = vrcp.f32 %v1563_v54  ;;  %v4532_v42 = vld [vmem:[%s6819_s3] sm:$0xff] }
 0x57a   : > { %v1421_v55 = vpack.c.bf16 %v1413_v10, %v1413_v10  ;;  %v2402_v28 = vunpack.c.l.b16 %v1422_v36  ;;  %v4933_v48 = vpop.eup %4932  ;;  %v1191_v59 = vmul.f32 %v4931_v34, %v6513_v23  ;;  %4940 = vrcp.f32 %v2007_v38 }
 0x57b   : > { %v2427_v30 = vunpack.c.l.b16 %v1641_v27  ;;  %v2300_v1 = vmul.f32 %v4933_v48, %v2287_v5  ;;  %v4935_v45 = vpop.eup %4934  ;;  %4942 = vrcp.f32 %v2004_v50 }
 0x57c   : > { %659 = vadd.xlane.f32.xlu1 %v658_v22  ;;  %v2401_v62 = vunpack.c.l.b16 %v1421_v55  ;;  %v1200_v22 = vpack.c.bf16 %v1192_v2, %v1192_v2  ;;  %v2299_v33 = vmul.f32 %v4935_v45, %v6803_v16  ;;  %v1199_v31 = vpack.c.bf16 %v1191_v59, %v1191_v59  ;;  %v2292_v4 = vpop.f32.mrf.mxu2 }
 0x57d   : > { %v2433_v18 = vpack.c.b16 %v2428_v3, %v2427_v30  ;;  %2648 = vmatpush.bf16.msra.mxu3 %v4536_v60  ;;  %v4937_v20 = vpop.eup %4936  ;;  %v7650_v30 = vld [vmem:[#allocation20_spill] sm:$0xff] }
 0x57e   : > { %2467 = vrot.lane.b32.xlu2 %v2461_v39, %s5075_s27  ;;  %v977_v39 = vpack.c.bf16 %v969_v12, %v969_v12  ;;  %v2229_v8 = vpop.xlane.xlu0 %2228  ;;  %v2406_v61 = vpack.c.b16 %v2402_v28, %v2401_v62  ;;  %v2308_v12 = vpack.c.bf16 %v2300_v1, %v2300_v1  ;;  %v2374_v25 = vunpack.c.l.b16 %v1200_v22 }
 0x57f   : > { %v4939_v23 = vpop.eup %4938  ;;  %v1635_v9 = vmul.f32 %v4937_v20, %v6625_v0  ;;  %4944 = vrcp.f32 %v2229_v8  ;;  %v2373_v63 = vunpack.c.l.b16 %v1199_v31 }
 0x580   : > { %v2345_v6 = vunpack.c.l.b16 %v977_v39  ;;  %v4941_v54 = vpop.eup %4940  ;;  %4946 = vrcp.f32 %v6805_v19  ;;  %v1636_v14 = vmul.f32 %v4939_v23, %v6643_v41  ;;  %v2512_v15 = vunpack.c.l.b16 %v2308_v12  ;;  %v4533_v19 = vld [vmem:[%s6819_s3 + $0x8] sm:$0xff] }
 0x581   : > { %v4943_v39 = vpop.eup %4942  ;;  %2649 = vmatpush.bf16.msra.mxu3 %v4535_v58  ;;  %v2080_v24 = vmul.f32 %v4941_v54, %v2070_v37  ;;  %v2378_v51 = vpack.c.b16 %v2374_v25, %v2373_v63  ;;  %4948 = vrcp.f32 %v6753_v11 }
 0x582   : > { %v2350_v53 = vpack.c.b16 %v2346_v47, %v2345_v6  ;;  %v1643_v6 = vpack.c.bf16 %v1635_v9, %v1635_v9  ;;  %v2079_v0 = vmul.f32 %v4943_v39, %v2068_v35  ;;  %v1644_v47 = vpack.c.bf16 %v1636_v14, %v1636_v14  ;;  %v648_v35 = vpop.xlane.xlu2 %647  ;;  %v7651_v9 = vld [vmem:[#allocation21_spill] sm:$0xff]  ;;  %v7652_v39 = vld [vmem:[#allocation18_spill] sm:$0xff] }
 0x583   : > { %v2088_v50 = vpack.c.bf16 %v2080_v24, %v2080_v24  ;;  %4950 = vrcp.f32 %v6782_v46 }
 0x584   : > { %v2429_v52 = vunpack.c.l.b16 %v1643_v6  ;;  %v2430_v36 = vunpack.c.l.b16 %v1644_v47  ;;  %4952 = vrcp.f32 %v6827_v17 }
 0x585   : > { %v4945_v49 = vpop.eup %4944  ;;  %2650 = vmatpush.bf16.msra.mxu3 %v4534_v32  ;;  %v2486_v27 = vunpack.c.l.b16 %v2088_v50  ;;  %4954 = vrcp.f32 %v648_v35 }
 0x586   : > { %2495 = vrot.lane.b32.xlu2 %v2489_v7, %s5078_s1  ;;  %v2307_v7 = vpack.c.bf16 %v2299_v33, %v2299_v33  ;;  %v4947_v10 = vpop.eup %4946  ;;  %v2302_v43 = vmul.f32 %v4945_v49, %v2292_v4  ;;  %v2434_v55 = vpack.c.b16 %v2430_v36, %v2429_v52  ;;  %v2352_v1 = vpop.permute.xlu0 %2351 }
 0x587   : > { %v4949_v11 = vpop.eup %4948 }
 0x588   : > { %v2511_v5 = vunpack.c.l.b16 %v2307_v7  ;;  %v2310_v34 = vpack.c.bf16 %v2302_v43, %v2302_v43  ;;  %v742_v46 = vmul.f32 %v4949_v11, %v6353_v44 }
 0x589   : > { %2651 = vmatpush.bf16.msra.mxu3 %v4533_v19  ;;  %v4951_v3 = vpop.eup %4950 }
 0x58a   : > { %v2517_v41 = vpack.c.b16 %v2512_v15, %v2511_v5  ;;  %v2514_v38 = vunpack.c.l.b16 %v2310_v34  ;;  %v741_v59 = vmul.f32 %v4951_v3, %v7650_v30  ;;  %v750_v60 = vpack.c.bf16 %v742_v46, %v742_v46  ;;  %v2380_v45 = vpop.permute.xlu2 %2379  ;;  %v4953_v12 = vpop.eup %4952  ;;  %v7655_v30 = vld [vmem:[#allocation37_spill] sm:$0xff] }
 0x58b   : > { %v4955_v25 = vpop.eup %4954  ;;  %v744_v58 = vmul.f32 %v4953_v12, %v7651_v9 }
 0x58c   : > { %662 = vadd.xlane.f32.xlu0 %v661_v26  ;;  %v2087_v26 = vpack.c.bf16 %v2079_v0, %v2079_v0  ;;  %v749_v62 = vpack.c.bf16 %v741_v59, %v741_v59  ;;  %v743_v63 = vmul.f32 %v4955_v25, %v7652_v39 }
 0x58d   : > { %2652 = vmatpush.bf16.msra.mxu3 %v4532_v42  ;;  %v752_v24 = vpack.c.bf16 %v744_v58, %v744_v58  ;;  %v7653_v42 = vld [vmem:[#allocation35_spill] sm:$0xff] }
 0x58e   : > { %2357 = vrot.lane.b32.xlu2 %v2350_v53, %s5081_s20  ;;  %v2301_v53 = vmul.f32 %v4947_v10, %v2290_v29  ;;  %v2485_v56 = vunpack.c.l.b16 %v2087_v26  ;;  %v2320_v29 = vunpack.c.l.b16 %v750_v60  ;;  %v2436_v44 = vpop.permute.xlu0 %2435  ;;  %v751_v32 = vpack.c.bf16 %v743_v63, %v743_v63  ;;  %v7656_v60 = vld [vmem:[#allocation38_spill] sm:$0xff]  ;;  %s3990_s20 = sshll.u32 %s5073_s0, 1  ;;  %s139_s0 = sadd.s32 1, %s5073_s0  }
 0x58f   : > { %v2322_v6 = vunpack.c.l.b16 %v752_v24  ;;  %s228_s22 = scalar_lea.vmem %s7516_s10, %s3990_s20  ;;  %p136_p0 = scmp.ge.s32.totalorder %s139_s0, 4  }
 0x590   : > { %v6840_v13 = vpop.permute.xlu1 %2407  ;;  %v2309_v40 = vpack.c.bf16 %v2301_v53, %v2301_v53 }
 0x592   : > { %v2513_v28 = vunpack.c.l.b16 %v2309_v40  ;;  %v2464_v31 = vpop.permute.xlu2 %2463 }
 0x594   : > { %v2518_v48 = vpack.c.b16 %v2514_v38, %v2513_v28 }
 0x595   : > { %2439 = vrot.lane.b32.xlu1 %v2433_v18, %s5077_s30  ;;  %v2319_v18 = vunpack.c.l.b16 %v749_v62 }
 0x596   : > { %2413 = vrot.lane.b32.xlu2 %v2406_v61, %s5079_s19  ;;  %v2492_v7 = vpop.permute.xlu0 %2491 }
 0x597   : > { %v2327_v20 = vpack.c.b16 %v2320_v29, %v2319_v18 }
 0x598   : > { %v6850_v16 = vpop.permute.xlu1 %2353 }
 0x599   : > { %v2529_v33 = vsel %vm92_vm0, %v2327_v20, %v2352_v1 }
 0x59a   : > { %v2541_v8 = vsel %vm2539_vm2, %v2529_v33, %v2380_v45 }
 0x59b   : > { %v2550_v61 = vsel %vm2548_vm3, %v2541_v8, %v6840_v13 }
 0x59c   : > { %v2558_v54 = vsel %vm591_vm1, %v2550_v61, %v2436_v44 }
 0x59d   : > { %2385 = vrot.lane.b32.xlu1 %v2378_v51, %s5080_s2  ;;  %v2567_v17 = vsel %vm2565_vm4, %v2558_v54, %v2464_v31  ;;  %v2321_v51 = vunpack.c.l.b16 %v751_v32  ;;  %s7065_s2 = scalar_lea.vmem %s7517_s11, %s4540_s26 }
 0x59e   : > { %2469 = vrot.lane.b32.xlu2 %v2462_v57, %s5075_s27  ;;  %v2490_v57 = vpack.c.b16 %v2486_v27, %v2485_v56  ;;  %v2576_v13 = vsel %vm2574_vm5, %v2567_v17, %v2492_v7 }
 0x59f   : > { %v2328_v5 = vpack.c.b16 %v2322_v6, %v2321_v51  ;;  %v6916_v51 = vld [vmem:[%s6913_s25] sm:$0x3f] }
 0x5a0   : > { %v6861_v21 = vpop.permute.xlu1 %2381  ;;  %2523 = vrot.lane.b32.xlu0 %v2517_v41, %s5076_s28 }
 0x5a1   : > { %v2532_v49 = vsel %vm92_vm0, %v2328_v5, %v6850_v16 }
 0x5a2   : > { %v2543_v47 = vsel %vm2539_vm2, %v2532_v49, %v6861_v21  ;;  %v7657_v49 = vld [vmem:[#allocation17_spill] sm:$0xff] }
 0x5a5   : > { %2441 = vrot.lane.b32.xlu1 %v2434_v55, %s5077_s30  ;;  %v7654_v55 = vld [vmem:[#allocation36_spill] sm:$0xff]  ;;  %s6968_s30 = scalar_lea.vmem %s7515_s9, %s4540_s26 }
 0x5a8   : > { %v2410_v2 = vpop.permute.xlu1 %2409  ;;  %2497 = vrot.lane.b32.xlu0 %v2490_v57, %s5078_s1 }
 0x5a9   : > { %v2552_v19 = vsel %vm2548_vm3, %v2543_v47, %v2410_v2 }
 0x5ad   : > { %2525 = vrot.lane.b32.xlu1 %v2518_v48, %s5076_s28 }
 0x5b0   : > { %v2438_v22 = vpop.permute.xlu1 %2437 }
 0x5b1   : > { %v2560_v10 = vsel %vm591_vm1, %v2552_v19, %v2438_v22 }
 0x5b7   : > { %v657_v0 = vpop.xlane.xlu0 %656 }
 0x5b8   : > { %v2466_v23 = vpop.permute.xlu1 %2465 }
 0x5b9   : > { %v654_v14 = vpop.xlane.xlu2 %653  ;;  %v2569_v50 = vsel %vm2565_vm4, %v2560_v10, %v2466_v23 }
 0x5ba   : > { %4956 = vrcp.f32 %v654_v14 }
 0x5bb   : > { %4958 = vrcp.f32 %v657_v0  ;;  %v2596_v0 = vperm.slane %v6916_v51, 0 }
 0x5c0   : > { %v4957_v16 = vpop.eup %4956 }
 0x5c1   : > { %v2494_v4 = vpop.permute.xlu2 %2493  ;;  %v4959_v21 = vpop.eup %4958  ;;  %v745_v34 = vmul.f32 %v4957_v16, %v7653_v42 }
 0x5c2   : > { %v2578_v41 = vsel %vm2574_vm5, %v2569_v50, %v2494_v4  ;;  %v746_v56 = vmul.f32 %v4959_v21, %v7654_v55  ;;  %v7658_v50 = vld [vmem:[#allocation16_spill] sm:$0xff]  ;;  %v7661_v55 = vld [vmem:[#allocation13_spill] sm:$0xff] }
 0x5c3   : > { %v753_v11 = vpack.c.bf16 %v745_v34, %v745_v34 }
 0x5c4   : > { %v2520_v37 = vpop.permute.xlu1 %2519  ;;  %v754_v57 = vpack.c.bf16 %v746_v56, %v746_v56 }
 0x5c5   : > { %v2585_v15 = vsel %vm2583_vm6, %v2576_v13, %v2520_v37  ;;  %v2323_v35 = vunpack.c.l.b16 %v753_v11 }
 0x5c6   : > { %2653 = vmatmul.bf16.vlgmr.msra.gmra.mxu3 %v2585_v15  ;;  %v2324_v2 = vunpack.c.l.b16 %v754_v57  ;;  %v7662_v57 = vld [vmem:[#allocation12_spill] sm:$0xff] }
 0x5c8   : > { %v2329_v46 = vpack.c.b16 %v2324_v2, %v2323_v35 }
 0x5c9   : > { %v2356_v26 = vpop.permute.xlu2 %2355 }
 0x5ca   : > { %v2535_v29 = vsel %vm92_vm0, %v2329_v46, %v2356_v26  ;;  %v7659_v26 = vld [vmem:[#allocation15_spill] sm:$0xff] }
 0x5d1   : > { %v2384_v36 = vpop.permute.xlu2 %2383 }
 0x5d2   : > { %v2545_v22 = vsel %vm2539_vm2, %v2535_v29, %v2384_v36 }
 0x5d4   : > { %v2522_v52 = vpop.permute.xlu0 %2521 }
 0x5d5   : > { %v2588_v43 = vsel %vm2583_vm6, %v2578_v41, %v2522_v52 }
 0x5d6   : > { %2658 = vmatmul.bf16.gmra.mxu3 %v2588_v43 }
 0x5d9   : > { %v2412_v53 = vpop.permute.xlu2 %2411 }
 0x5da   : > { %v2554_v20 = vsel %vm2548_vm3, %v2545_v22, %v2412_v53 }
 0x5e1   : > { %v2468_v27 = vpop.permute.xlu2 %2467 }
 0x5e9   : > { %v2496_v3 = vpop.permute.xlu2 %2495 }
 0x5ef   : > { %v660_v40 = vpop.xlane.xlu1 %659 }
 0x5f0   : > { %4960 = vrcp.f32 %v660_v40 }
 0x5f1   : > { %v2358_v18 = vpop.permute.xlu2 %2357 }
 0x5f6   : > { %v4961_v28 = vpop.eup %4960 }
 0x5f7   : > { %v747_v59 = vmul.f32 %v4961_v28, %v7655_v30  ;;  %v7663_v28 = vld [vmem:[#allocation11_spill] sm:$0xff] }
 0x5f9   : > { %v755_v33 = vpack.c.bf16 %v747_v59, %v747_v59  ;;  %v2414_v58 = vpop.permute.xlu2 %2413 }
 0x5fb   : > { %v2325_v31 = vunpack.c.l.b16 %v755_v33 }
 0x5ff   : > { %v663_v38 = vpop.xlane.xlu0 %662 }
 0x600   : > { %4962 = vrcp.f32 %v663_v38 }
 0x601   : > { %v2470_v37 = vpop.permute.xlu2 %2469 }
 0x606   : > { %v4963_v48 = vpop.eup %4962 }
 0x607   : > { %v748_v62 = vmul.f32 %v4963_v48, %v7656_v60  ;;  %v2440_v1 = vpop.permute.xlu1 %2439 }
 0x608   : > { %v2562_v44 = vsel %vm591_vm1, %v2554_v20, %v2440_v1 }
 0x609   : > { %v756_v45 = vpack.c.bf16 %v748_v62, %v748_v62  ;;  %v2571_v61 = vsel %vm2565_vm4, %v2562_v44, %v2468_v27  ;;  %v7660_v27 = vld [vmem:[#allocation14_spill] sm:$0xff] }
 0x60a   : > { %v2580_v25 = vsel %vm2574_vm5, %v2571_v61, %v2496_v3  ;;  %v5082_v3 = vmov 128.0  }
 0x60b   : > { %v2326_v8 = vunpack.c.l.b16 %v756_v45  ;;  %4964 = vrcp.f32 %v5082_v3  ;;  %v4549_v3 = vld [vmem:[%s6968_s30 + $0x44] sm:$0xf] }
 0x60d   : > { %v2330_v12 = vpack.c.b16 %v2326_v8, %v2325_v31  ;;  %v7664_v31 = vld [vmem:[#allocation10_spill] sm:$0xff] }
 0x60f   : > { %v2386_v23 = vpop.permute.xlu1 %2385  ;;  %v2538_v17 = vsel %vm92_vm0, %v2330_v12, %v2358_v18  ;;  %vm3449_vm0 = vcmask (%p136_p0), 23552  }
 0x610   : > { %v2547_v39 = vsel %vm2539_vm2, %v2538_v17, %v2386_v23 }
 0x611   : > { %v2556_v63 = vsel %vm2548_vm3, %v2547_v39, %v2414_v58  ;;  %v4965_v48 = vpop.eup %4964 }
 0x612   : > { %v2524_v54 = vpop.permute.xlu0 %2523  ;;  %v2699_v30 = vmul.f32 128.0, %v4965_v48  ;;  %vm2703_vm7 = vweird.f32 %v4965_v48 }
 0x613   : > { %v2591_v9 = vsel %vm2583_vm6, %v2580_v25, %v2524_v54 }
 0x614   : > { %2663 = vmatmul.bf16.gmra.mxu3 %v2591_v9  ;;  %v2700_v59 = vsub.f32 1.0, %v2699_v30  ;;  %v4547_v30 = vld [vmem:[%s6968_s30 + $0x34] sm:$0xf] }
 0x616   : > { %v2701_v60 = vmul.f32 %v4965_v48, %v2700_v59 }
 0x617   : > { %v2442_v7 = vpop.permute.xlu1 %2441 }
 0x618   : > { %v2564_v14 = vsel %vm591_vm1, %v2556_v63, %v2442_v7  ;;  %v2702_v62 = vadd.f32 %v4965_v48, %v2701_v60  ;;  %v4212_v60 = vld [vmem:[%s6968_s30 + $0x38] sm:$0xf0] }
 0x619   : > { %v2573_v13 = vsel %vm2565_vm4, %v2564_v14, %v2470_v37 }
 0x61a   : > { %v2498_v24 = vpop.permute.xlu0 %2497  ;;  %v6926_v1 = vsel %vm2703_vm7, %v4965_v48, %v2702_v62  ;;  %v4548_v48 = vld [vmem:[%s6968_s30 + $0x34] sm:$0xf0]  ;;  %v4215_v62 = vor.u32 %v4547_v30, %v4212_v60  ;;  %v7022_v60 = vperm.slane %v6916_v51, 2 }
 0x61b   : > { %v2582_v32 = vsel %vm2574_vm5, %v2573_v13, %v2498_v24 }
 0x61f   : > { %v2526_v15 = vpop.permute.xlu1 %2525 }
 0x620   : > { %v2594_v6 = vsel %vm2583_vm6, %v2582_v32, %v2526_v15 }
 0x624   : > { %2668 = vmatmul.bf16.gmra.mxu3 %v2594_v6 }
 0x649   : > { %v2654_v5 = vpop.f32.mrf.mxu3 }
 0x64a   : > { %v2655_v4 = vadd.f32 %v2654_v5, %v2596_v0 }
 0x64c   : > { %v2674_v47 = vadd.f32 %v7657_v49, %v2655_v4 }
 0x64e   : > { %2682 = vadd.xlane.f32.xlu2 %v2674_v47 }
 0x651   : > { %v2656_v19 = vpop.f32.mrf.mxu3 }
 0x652   : > { %v2657_v10 = vadd.f32 %v2656_v19, %v2596_v0  ;;  %v4556_v19 = vld [vmem:[%s6968_s30 + $0x74] sm:$0xf0] }
 0x654   : > { %v2675_v41 = vadd.f32 %v7658_v50, %v2657_v10  ;;  %v4555_v10 = vld [vmem:[%s6968_s30 + $0x74] sm:$0xf] }
 0x656   : > { %2684 = vadd.xlane.f32.xlu0 %v2675_v41 }
 0x659   : > { %v2659_v52 = vpop.f32.mrf.mxu3 }
 0x65a   : > { %v2660_v43 = vadd.f32 %v2659_v52, %v2596_v0 }
 0x65c   : > { %v2676_v36 = vadd.f32 %v7659_v26, %v2660_v43  ;;  %v4234_v26 = vld [vmem:[%s6968_s30 + $0x60] sm:$0xf] }
 0x65e   : > { %2686 = vadd.xlane.f32.xlu1 %v2676_v36 }
 0x661   : > { %v2661_v53 = vpop.f32.mrf.mxu3 }
 0x662   : > { %v2662_v16 = vadd.f32 %v2661_v53, %v2596_v0  ;;  %v4553_v53 = vld [vmem:[%s6968_s30 + $0x64] sm:$0xf] }
 0x664   : > { %v2677_v21 = vadd.f32 %v7660_v27, %v2662_v16  ;;  %v4236_v27 = vld [vmem:[%s6968_s30 + $0x68] sm:$0xf0] }
 0x666   : > { %2688 = vadd.xlane.f32.xlu2 %v2677_v21 }
 0x697   : > { %v2664_v42 = vpop.f32.mrf.mxu3 }
 0x698   : > { %v2665_v34 = vadd.f32 %v2664_v42, %v2596_v0  ;;  %v4226_v42 = vld [vmem:[%s6968_s30 + $0x50] sm:$0xf] }
 0x69a   : > { %v2678_v56 = vadd.f32 %v7661_v55, %v2665_v34  ;;  %v4552_v34 = vld [vmem:[%s6968_s30 + $0x54] sm:$0xf0]  ;;  %v4551_v55 = vld [vmem:[%s6968_s30 + $0x54] sm:$0xf] }
 0x69c   : > { %2690 = vadd.xlane.f32.xlu0 %v2678_v56 }
 0x69f   : > { %v2666_v40 = vpop.f32.mrf.mxu3 }
 0x6a0   : > { %v2667_v11 = vadd.f32 %v2666_v40, %v2596_v0  ;;  %v4228_v40 = vld [vmem:[%s6968_s30 + $0x58] sm:$0xf0] }
 0x6a2   : > { %v2679_v38 = vadd.f32 %v7662_v57, %v2667_v11  ;;  %v4231_v11 = vor.u32 %v4551_v55, %v4228_v40  ;;  %v4218_v57 = vld [vmem:[%s6968_s30 + $0x40] sm:$0xf] }
 0x6a4   : > { %2692 = vadd.xlane.f32.xlu1 %v2679_v38 }
 0x6a7   : > { %v2669_v35 = vpop.f32.mrf.mxu3 }
 0x6a8   : > { %v2670_v2 = vadd.f32 %v2669_v35, %v2596_v0 }
 0x6aa   : > { %v2680_v46 = vadd.f32 %v7663_v28, %v2670_v2  ;;  %v4220_v2 = vld [vmem:[%s6968_s30 + $0x48] sm:$0xf0] }
 0x6ab   : > { %v4223_v28 = vor.u32 %v4549_v3, %v4220_v2 }
 0x6ac   : > { %2694 = vadd.xlane.f32.xlu1 %v2680_v46 }
 0x6af   : > { %v2671_v20 = vpop.f32.mrf.mxu3 }
 0x6b0   : > { %v2672_v44 = vadd.f32 %v2671_v20, %v2596_v0 }
 0x6b2   : > { %v6937_v23 = vadd.f32 %v7664_v31, %v2672_v44  ;;  %v4544_v31 = vld [vmem:[%s6968_s30 + $0x14] sm:$0xf0] }
 0x6c1   : > { %v2683_v29 = vpop.xlane.xlu2 %2682 }
 0x6c2   : > { %v2705_v45 = vmul.f32 %v6926_v1, %v2683_v29  ;;  %v4202_v29 = vld [vmem:[%s6968_s30 + $0x20] sm:$0xf] }
 0x6c4   : > { %v6929_v22 = vsub.f32 %v2674_v47, %v2705_v45  ;;  %v4242_v47 = vld [vmem:[%s6968_s30 + $0x70] sm:$0xf]  ;;  %v4546_v45 = vld [vmem:[%s6968_s30 + $0x24] sm:$0xf0] }
 0x6c5   : > { %v4243_v50 = vor.u32 %v4556_v19, %v4242_v47  ;;  %v4203_v20 = vor.u32 %v4546_v45, %v4202_v29 }
 0x6c6   : > { %v2721_v18 = vmul.f32 %v6929_v22, %v6929_v22 }
 0x6c7   : > { %2956 = vmatpush.bf16.msrb.mxu0 %v4243_v50 }
 0x6c8   : > { %2729 = vadd.xlane.f32.xlu2 %v2721_v18  ;;  %v4545_v18 = vld [vmem:[%s6968_s30 + $0x24] sm:$0xf] }
 0x6c9   : > { %v2685_v33 = vpop.xlane.xlu0 %2684 }
 0x6ca   : > { %v2706_v8 = vmul.f32 %v6926_v1, %v2685_v33  ;;  %v4204_v33 = vld [vmem:[%s6968_s30 + $0x28] sm:$0xf0] }
 0x6cb   : > { %v4207_v44 = vor.u32 %v4545_v18, %v4204_v33 }
 0x6cc   : > { %v6934_v61 = vsub.f32 %v2675_v41, %v2706_v8  ;;  %v4244_v41 = vld [vmem:[%s6968_s30 + $0x78] sm:$0xf0]  ;;  %v4194_v8 = vld [vmem:[%s6968_s30 + $0x10] sm:$0xf] }
 0x6cd   : > { %v4247_v43 = vor.u32 %v4555_v10, %v4244_v41 }
 0x6ce   : > { %v2722_v12 = vmul.f32 %v6934_v61, %v6934_v61 }
 0x6cf   : > { %2985 = vmatpush.bf16.msrb.mxu1 %v4247_v43 }
 0x6d0   : > { %2696 = vadd.xlane.f32.xlu2 %v6937_v23  ;;  %2731 = vadd.xlane.f32.xlu0 %v2722_v12  ;;  %v4543_v12 = vld [vmem:[%s6968_s30 + $0x14] sm:$0xf] }
 0x6d1   : > { %v2687_v54 = vpop.xlane.xlu1 %2686 }
 0x6d2   : > { %v2707_v25 = vmul.f32 %v6926_v1, %v2687_v54 }
 0x6d4   : > { %v6943_v9 = vsub.f32 %v2676_v36, %v2707_v25  ;;  %v4554_v36 = vld [vmem:[%s6968_s30 + $0x64] sm:$0xf0]  ;;  %v4195_v25 = vor.u32 %v4544_v31, %v4194_v8 }
 0x6d5   : > { %v4235_v16 = vor.u32 %v4554_v36, %v4234_v26 }
 0x6d6   : > { %v2723_v58 = vmul.f32 %v6943_v9, %v6943_v9 }
 0x6d7   : > { %2957 = vmatpush.bf16.msrb.mxu0 %v4235_v16 }
 0x6d8   : > { %2733 = vadd.xlane.f32.xlu0 %v2723_v58  ;;  %v4196_v58 = vld [vmem:[%s6968_s30 + $0x18] sm:$0xf0] }
 0x6d9   : > { %v2689_v17 = vpop.xlane.xlu2 %2688 }
 0x6da   : > { %v2708_v7 = vmul.f32 %v6926_v1, %v2689_v17 }
 0x6dc   : > { %v6948_v39 = vsub.f32 %v2677_v21, %v2708_v7  ;;  %v4239_v21 = vor.u32 %v4553_v53, %v4236_v27  ;;  %v4199_v7 = vor.u32 %v4543_v12, %v4196_v58 }
 0x6de   : > { %v2724_v63 = vmul.f32 %v6948_v39, %v6948_v39  ;;  %2986 = vmatpush.bf16.msrb.mxu1 %v4239_v21 }
 0x6e0   : > { %2735 = vadd.xlane.f32.xlu1 %v2724_v63 }
 0x6e2   : > { %2987 = vmatpush.bf16.msrb.mxu1 %v4231_v11 }
 0x6e6   : > { %2988 = vmatpush.bf16.msrb.mxu1 %v4223_v28 }
 0x6ea   : > { %2989 = vmatpush.bf16.msrb.mxu1 %v4215_v62 }
 0x6ee   : > { %2990 = vmatpush.bf16.msrb.mxu1 %v4207_v44 }
 0x6f2   : > { %2991 = vmatpush.bf16.msrb.mxu1 %v4199_v7 }
 0x70f   : > { %v2691_v14 = vpop.xlane.xlu0 %2690 }
 0x710   : > { %v2709_v37 = vmul.f32 %v6926_v1, %v2691_v14  ;;  %v4186_v14 = vld [vmem:[%s6968_s30] sm:$0xf] }
 0x712   : > { %v6953_v13 = vsub.f32 %v2678_v56, %v2709_v37  ;;  %v4227_v56 = vor.u32 %v4552_v34, %v4226_v42  ;;  %v4542_v37 = vld [vmem:[%s6968_s30 + $0x4] sm:$0xf0] }
 0x714   : > { %v2725_v24 = vmul.f32 %v6953_v13, %v6953_v13  ;;  %2958 = vmatpush.bf16.msrb.mxu0 %v4227_v56 }
 0x716   : > { %2737 = vadd.xlane.f32.xlu2 %v2725_v24  ;;  %v4187_v24 = vor.u32 %v4542_v37, %v4186_v14 }
 0x717   : > { %v2693_v15 = vpop.xlane.xlu1 %2692 }
 0x718   : > { %v2710_v32 = vmul.f32 %v6926_v1, %v2693_v15  ;;  %v4541_v15 = vld [vmem:[%s6968_s30 + $0x4] sm:$0xf] }
 0x71a   : > { %v6958_v6 = vsub.f32 %v2679_v38, %v2710_v32  ;;  %v4550_v38 = vld [vmem:[%s6968_s30 + $0x44] sm:$0xf0]  ;;  %v4188_v32 = vld [vmem:[%s6968_s30 + $0x8] sm:$0xf0] }
 0x71b   : > { %v4219_v35 = vor.u32 %v4550_v38, %v4218_v57 }
 0x71c   : > { %v2726_v0 = vmul.f32 %v6958_v6, %v6958_v6 }
 0x71d   : > { %2959 = vmatpush.bf16.msrb.mxu0 %v4219_v35  ;;  %v7018_v35 = vperm.slane %v6916_v51, 1 }
 0x71e   : > { %2739 = vadd.xlane.f32.xlu0 %v2726_v0  ;;  %v4191_v0 = vor.u32 %v4541_v15, %v4188_v32 }
 0x71f   : > { %v2695_v5 = vpop.xlane.xlu1 %2694 }
 0x720   : > { %v2711_v4 = vmul.f32 %v6926_v1, %v2695_v5  ;;  %2992 = vmatpush.bf16.msrb.mxu1 %v4191_v0 }
 0x722   : > { %v6971_v49 = vsub.f32 %v2680_v46, %v2711_v4  ;;  %v4210_v46 = vld [vmem:[%s6968_s30 + $0x30] sm:$0xf] }
 0x723   : > { %v4211_v59 = vor.u32 %v4548_v48, %v4210_v46 }
 0x724   : > { %v2727_v52 = vmul.f32 %v6971_v49, %v6971_v49 }
 0x725   : > { %2960 = vmatpush.bf16.msrb.mxu0 %v4211_v59 }
 0x726   : > { %2741 = vadd.xlane.f32.xlu1 %v2727_v52 }
 0x729   : > { %2961 = vmatpush.bf16.msrb.mxu0 %v4203_v20 }
 0x72d   : > { %2962 = vmatpush.bf16.msrb.mxu0 %v4195_v25 }
 0x731   : > { %2963 = vmatpush.bf16.msrb.mxu0 %v4187_v24 }
 0x73b   : > { %v2730_v54 = vpop.xlane.xlu2 %2729 }
 0x73c   : > { %v2745_v17 = vmul.f32 %v2730_v54, %v6926_v1 }
 0x73e   : > { %v2753_v63 = vadd.f32 1e-05, %v2745_v17 }
 0x740   : > { %4966 = vrsqrt.f32 %v2753_v63  ;;  %vm2767_vm9 = vweird.f32 %v2753_v63 }
 0x743   : > { %v2697_v5 = vpop.xlane.xlu2 %2696  ;;  %v2732_v4 = vpop.xlane.xlu0 %2731 }
 0x744   : > { %v2712_v47 = vmul.f32 %v6926_v1, %v2697_v5  ;;  %v2746_v19 = vmul.f32 %v2732_v4, %v6926_v1 }
 0x746   : > { %v4967_v10 = vpop.eup %4966  ;;  %v7011_v50 = vsub.f32 %v6937_v23, %v2712_v47  ;;  %v2754_v41 = vadd.f32 1e-05, %v2746_v19 }
 0x747   : > { %v2762_v52 = vmul.f32 %v4967_v10, %v2753_v63  ;;  %vm2768_vm8 = vweird.f32 %v4967_v10 }
 0x748   : > { %4968 = vrsqrt.f32 %v2754_v41  ;;  %v2728_v43 = vmul.f32 %v7011_v50, %v7011_v50  ;;  %vm2769_vm10 = vmor %vm2767_vm9, %vm2768_vm8  ;;  %vm2777_vm12 = vweird.f32 %v2754_v41 }
 0x749   : > { %v2763_v26 = vmul.f32 %v4967_v10, %v2762_v52 }
 0x74a   : > { %2743 = vadd.xlane.f32.xlu2 %v2728_v43 }
 0x74b   : > { %v2764_v36 = vmul.f32 0.5, %v2763_v26  ;;  %v2734_v53 = vpop.xlane.xlu0 %2733 }
 0x74c   : > { %v2747_v16 = vmul.f32 %v2734_v53, %v6926_v1 }
 0x74d   : > { %v2765_v27 = vsub.f32 1.5, %v2764_v36 }
 0x74e   : > { %v4969_v21 = vpop.eup %4968  ;;  %v2755_v42 = vadd.f32 1e-05, %v2747_v16 }
 0x74f   : > { %v2766_v34 = vmul.f32 %v4967_v10, %v2765_v27  ;;  %v2772_v55 = vmul.f32 %v4969_v21, %v2754_v41  ;;  %vm2778_vm11 = vweird.f32 %v4969_v21 }
 0x750   : > { %4970 = vrsqrt.f32 %v2755_v42  ;;  %vm2779_vm13 = vmor %vm2777_vm12, %vm2778_vm11  ;;  %vm2787_vm15 = vweird.f32 %v2755_v42 }
 0x751   : > { %v2773_v23 = vmul.f32 %v4969_v21, %v2772_v55  ;;  %v2770_v56 = vsel %vm2769_vm10, %v4967_v10, %v2766_v34 }
 0x752   : > { %v2841_v2 = vmul.f32 %v2770_v56, %v6929_v22 }
 0x753   : > { %v2774_v40 = vmul.f32 0.5, %v2773_v23  ;;  %v2736_v11 = vpop.xlane.xlu1 %2735 }
 0x754   : > { %v2748_v57 = vmul.f32 %v2736_v11, %v6926_v1  ;;  %v2850_v62 = vmul.f32 %v7018_v35, %v2841_v2 }
 0x755   : > { %v2775_v38 = vsub.f32 1.5, %v2774_v40 }
 0x756   : > { %v4971_v3 = vpop.eup %4970  ;;  %v2756_v28 = vadd.f32 1e-05, %v2748_v57  ;;  %v7028_v33 = vadd.f32 %v7022_v60, %v2850_v62  ;;  %v4563_v62 = vld [vmem:[%s7065_s2 + $0x28] sm:$0xff] }
 0x757   : > { %v2776_v46 = vmul.f32 %v4969_v21, %v2775_v38  ;;  %v2782_v48 = vmul.f32 %v4971_v3, %v2755_v42  ;;  %vm2788_vm14 = vweird.f32 %v4971_v3 }
 0x758   : > { %4972 = vrsqrt.f32 %v2756_v28  ;;  %vm2789_vm1 = vmor %vm2787_vm15, %vm2788_vm14  ;;  %vm2797_vm3 = vweird.f32 %v2756_v28 }
 0x759   : > { %v2780_v30 = vsel %vm2779_vm13, %v4969_v21, %v2776_v46  ;;  %v2783_v59 = vmul.f32 %v4971_v3, %v2782_v48  ;;  %v4573_v48 = vld [vmem:[%s7065_s2 + $0x78] sm:$0xff] }
 0x75a   : > { %v2842_v29 = vmul.f32 %v2780_v30, %v6934_v61  ;;  %3164 = vmatpush.bf16.msrb.mxu3 %v4573_v48  ;;  %v4564_v30 = vld [vmem:[%s7065_s2 + $0x30] sm:$0xff] }
 0x75b   : > { %v2784_v45 = vmul.f32 0.5, %v2783_v59  ;;  %v4572_v59 = vld [vmem:[%s7065_s2 + $0x70] sm:$0xff] }
 0x75c   : > { %v2851_v18 = vmul.f32 %v7018_v35, %v2842_v29  ;;  %v4571_v29 = vld [vmem:[%s7065_s2 + $0x68] sm:$0xff] }
 0x75d   : > { %v2785_v20 = vsub.f32 1.5, %v2784_v45 }
 0x75e   : > { %v4973_v22 = vpop.eup %4972  ;;  %v7031_v44 = vadd.f32 %v7022_v60, %v2851_v18  ;;  %3165 = vmatpush.bf16.msrb.mxu3 %v4572_v59 }
 0x75f   : > { %v2786_v8 = vmul.f32 %v4971_v3, %v2785_v20  ;;  %v2792_v31 = vmul.f32 %v4973_v22, %v2756_v28  ;;  %vm2798_vm2 = vweird.f32 %v4973_v22  ;;  %v4562_v20 = vld [vmem:[%s7065_s2 + $0x20] sm:$0xff] }
 0x760   : > { %v2867_v12 = vpack.c.bf16 %v7031_v44, %v7028_v33  ;;  %vm2799_vm4 = vmor %vm2797_vm3, %vm2798_vm2 }
 0x761   : > { %v2793_v54 = vmul.f32 %v4973_v22, %v2792_v31  ;;  %v2790_v61 = vsel %vm2789_vm1, %v4971_v3, %v2786_v8 }
 0x762   : > { %2964 = vmatmul.bf16.vlgmr.msrb.gmra.mxu0 %v2867_v12  ;;  %2993 = vmatmul.bf16.vlgmr.msrb.gmra.mxu1 %v2867_v12  ;;  %v2843_v17 = vmul.f32 %v2790_v61, %v6943_v9  ;;  %v4569_v61 = vld [vmem:[%s7065_s2 + $0x58] sm:$0xff] }
 0x763   : > { %v2794_v25 = vmul.f32 0.5, %v2793_v54  ;;  %3166 = vmatpush.bf16.msrb.mxu3 %v4571_v29  ;;  %v4561_v54 = vld [vmem:[%s7065_s2 + $0x18] sm:$0xff] }
 0x764   : > { %v2852_v37 = vmul.f32 %v7018_v35, %v2843_v17  ;;  %v4560_v17 = vld [vmem:[%s7065_s2 + $0x10] sm:$0xff] }
 0x765   : > { %v2795_v58 = vsub.f32 1.5, %v2794_v25 }
 0x766   : > { %v7040_v15 = vadd.f32 %v7022_v60, %v2852_v37  ;;  %v4567_v37 = vld [vmem:[%s7065_s2 + $0x48] sm:$0xff] }
 0x767   : > { %v2796_v7 = vmul.f32 %v4973_v22, %v2795_v58 }
 0x769   : > { %v2800_v63 = vsel %vm2799_vm4, %v4973_v22, %v2796_v7  ;;  %v4570_v22 = vld [vmem:[%s7065_s2 + $0x60] sm:$0xff]  ;;  %v4568_v7 = vld [vmem:[%s7065_s2 + $0x50] sm:$0xff] }
 0x76a   : > { %v2844_v14 = vmul.f32 %v2800_v63, %v6948_v39  ;;  %3167 = vmatpush.bf16.msrb.mxu3 %v4570_v22 }
 0x76c   : > { %v2853_v24 = vmul.f32 %v7018_v35, %v2844_v14  ;;  %v4559_v14 = vld [vmem:[%s7065_s2 + $0x8] sm:$0xff] }
 0x76e   : > { %v7043_v32 = vadd.f32 %v7022_v60, %v2853_v24  ;;  %3168 = vmatpush.bf16.msrb.mxu3 %v4569_v61 }
 0x770   : > { %v2868_v0 = vpack.c.bf16 %v7043_v32, %v7040_v15 }
 0x772   : > { %2969 = vmatmul.bf16.gmra.mxu0 %v2868_v0  ;;  %2998 = vmatmul.bf16.gmra.mxu1 %v2868_v0 }
 0x773   : > { %3169 = vmatpush.bf16.msrb.mxu3 %v4568_v7 }
 0x777   : > { %3170 = vmatpush.bf16.msrb.mxu3 %v4567_v37 }
 0x789   : > { %v2738_v9 = vpop.xlane.xlu2 %2737 }
 0x78a   : > { %v2749_v5 = vmul.f32 %v2738_v9, %v6926_v1 }
 0x78c   : > { %v2757_v4 = vadd.f32 1e-05, %v2749_v5 }
 0x78e   : > { %4974 = vrsqrt.f32 %v2757_v4  ;;  %vm2807_vm6 = vweird.f32 %v2757_v4 }
 0x791   : > { %v2740_v39 = vpop.xlane.xlu0 %2739 }
 0x792   : > { %v2750_v47 = vmul.f32 %v2740_v39, %v6926_v1  ;;  %v4566_v39 = vld [vmem:[%s7065_s2 + $0x40] sm:$0xff] }
 0x793   : > { %3171 = vmatpush.bf16.msrb.mxu3 %v4566_v39 }
 0x794   : > { %v4975_v19 = vpop.eup %4974  ;;  %v2758_v10 = vadd.f32 1e-05, %v2750_v47 }
 0x795   : > { %v2802_v41 = vmul.f32 %v4975_v19, %v2757_v4  ;;  %vm2808_vm5 = vweird.f32 %v4975_v19  ;;  %v4558_v4 = vld [vmem:[%s7065_s2] sm:$0xff] }
 0x796   : > { %4976 = vrsqrt.f32 %v2758_v10  ;;  %vm2809_vm7 = vmor %vm2807_vm6, %vm2808_vm5  ;;  %vm2817_vm9 = vweird.f32 %v2758_v10 }
 0x797   : > { %v2803_v52 = vmul.f32 %v4975_v19, %v2802_v41 }
 0x799   : > { %v2804_v43 = vmul.f32 0.5, %v2803_v52  ;;  %v2742_v56 = vpop.xlane.xlu1 %2741 }
 0x79a   : > { %v2751_v57 = vmul.f32 %v2742_v56, %v6926_v1 }
 0x79b   : > { %v2805_v26 = vsub.f32 1.5, %v2804_v43 }
 0x79c   : > { %v4977_v36 = vpop.eup %4976  ;;  %v2759_v2 = vadd.f32 1e-05, %v2751_v57 }
 0x79d   : > { %v2806_v53 = vmul.f32 %v4975_v19, %v2805_v26  ;;  %v2812_v16 = vmul.f32 %v4977_v36, %v2758_v10  ;;  %vm2818_vm8 = vweird.f32 %v4977_v36 }
 0x79e   : > { %vm2819_vm10 = vmor %vm2817_vm9, %vm2818_vm8  ;;  %4978 = vrsqrt.f32 %v2759_v2  ;;  %vm2827_vm12 = vweird.f32 %v2759_v2 }
 0x79f   : > { %v2813_v27 = vmul.f32 %v4977_v36, %v2812_v16  ;;  %v2810_v21 = vsel %vm2809_vm7, %v4975_v19, %v2806_v53 }
 0x7a0   : > { %v2845_v55 = vmul.f32 %v2810_v21, %v6953_v13 }
 0x7a1   : > { %v2814_v42 = vmul.f32 0.5, %v2813_v27 }
 0x7a2   : > { %v2854_v38 = vmul.f32 %v7018_v35, %v2845_v55 }
 0x7a3   : > { %v2815_v34 = vsub.f32 1.5, %v2814_v42 }
 0x7a4   : > { %v7055_v28 = vadd.f32 %v7022_v60, %v2854_v38  ;;  %v4979_v45 = vpop.eup %4978 }
 0x7a5   : > { %v2816_v23 = vmul.f32 %v4977_v36, %v2815_v34  ;;  %v2822_v18 = vmul.f32 %v4979_v45, %v2759_v2  ;;  %vm2828_vm11 = vweird.f32 %v4979_v45 }
 0x7a6   : > { %vm2829_vm13 = vmor %vm2827_vm12, %vm2828_vm11 }
 0x7a7   : > { %v2820_v40 = vsel %vm2819_vm10, %v4977_v36, %v2816_v23  ;;  %v2823_v8 = vmul.f32 %v4979_v45, %v2822_v18 }
 0x7a8   : > { %v2846_v11 = vmul.f32 %v2820_v40, %v6958_v6  ;;  %v4565_v6 = vld [vmem:[%s7065_s2 + $0x38] sm:$0xff] }
 0x7a9   : > { %3135 = vmatpush.bf16.msrb.mxu2 %v4565_v6  ;;  %v2824_v58 = vmul.f32 0.5, %v2823_v8 }
 0x7aa   : > { %v2855_v3 = vmul.f32 %v7018_v35, %v2846_v11 }
 0x7ab   : > { %v2825_v63 = vsub.f32 1.5, %v2824_v58 }
 0x7ac   : > { %v7058_v46 = vadd.f32 %v7022_v60, %v2855_v3 }
 0x7ad   : > { %3136 = vmatpush.bf16.msrb.mxu2 %v4564_v30  ;;  %v2826_v0 = vmul.f32 %v4979_v45, %v2825_v63 }
 0x7ae   : > { %v2869_v13 = vpack.c.bf16 %v7058_v46, %v7055_v28 }
 0x7af   : > { %v2830_v47 = vsel %vm2829_vm13, %v4979_v45, %v2826_v0 }
 0x7b0   : > { %2974 = vmatmul.bf16.gmra.mxu0 %v2869_v13  ;;  %3003 = vmatmul.bf16.gmra.mxu1 %v2869_v13  ;;  %v2847_v41 = vmul.f32 %v2830_v47, %v6971_v49 }
 0x7b1   : > { %3137 = vmatpush.bf16.msrb.mxu2 %v4563_v62 }
 0x7b2   : > { %v2856_v36 = vmul.f32 %v7018_v35, %v2847_v41 }
 0x7b4   : > { %v7091_v16 = vadd.f32 %v7022_v60, %v2856_v36 }
 0x7b5   : > { %3138 = vmatpush.bf16.msrb.mxu2 %v4562_v20 }
 0x7b9   : > { %3139 = vmatpush.bf16.msrb.mxu2 %v4561_v54 }
 0x7bd   : > { %v2744_v31 = vpop.xlane.xlu2 %2743  ;;  %3140 = vmatpush.bf16.msrb.mxu2 %v4560_v17 }
 0x7be   : > { %v2752_v12 = vmul.f32 %v2744_v31, %v6926_v1 }
 0x7c0   : > { %v2760_v25 = vadd.f32 1e-05, %v2752_v12 }
 0x7c1   : > { %3141 = vmatpush.bf16.msrb.mxu2 %v4559_v14 }
 0x7c2   : > { %4980 = vrsqrt.f32 %v2760_v25  ;;  %vm2837_vm15 = vweird.f32 %v2760_v25 }
 0x7c5   : > { %3142 = vmatpush.bf16.msrb.mxu2 %v4558_v4 }
 0x7c8   : > { %v4981_v24 = vpop.eup %4980 }
 0x7c9   : > { %v2832_v9 = vmul.f32 %v4981_v24, %v2760_v25  ;;  %vm2838_vm14 = vweird.f32 %v4981_v24 }
 0x7ca   : > { %vm2839_vm1 = vmor %vm2837_vm15, %vm2838_vm14 }
 0x7cb   : > { %v2833_v5 = vmul.f32 %v4981_v24, %v2832_v9 }
 0x7cd   : > { %v2834_v19 = vmul.f32 0.5, %v2833_v5 }
 0x7cf   : > { %v2835_v10 = vsub.f32 1.5, %v2834_v19 }
 0x7d1   : > { %v2836_v52 = vmul.f32 %v4981_v24, %v2835_v10 }
 0x7d3   : > { %v2840_v43 = vsel %vm2839_vm1, %v4981_v24, %v2836_v52 }
 0x7d4   : > { %v2848_v26 = vmul.f32 %v2840_v43, %v7011_v50  ;;  %v229_v50 = vld [vmem:[%s228_s22] sm:$0x3] }
 0x7d5   : > { %v2873_v34 = vperm.slane %v229_v50, 1 }
 0x7d6   : > { %v2857_v53 = vmul.f32 %v7018_v35, %v2848_v26  ;;  %v2872_v35 = vperm.slane %v229_v50, 0 }
 0x7d8   : > { %v7094_v27 = vadd.f32 %v7022_v60, %v2857_v53 }
 0x7da   : > { %v2870_v49 = vpack.c.bf16 %v7094_v27, %v7091_v16 }
 0x7dc   : > { %2979 = vmatmul.bf16.gmra.mxu0 %v2870_v49  ;;  %3008 = vmatmul.bf16.gmra.mxu1 %v2870_v49 }
 0x7df   : > { %v2965_v21 = vpop.f32.mrf.mxu0  ;;  %v2994_v42 = vpop.f32.mrf.mxu1 }
 0x7e0   : > { %v2966_v55 = vadd.f32 %v2965_v21, %v2872_v35  ;;  %v2995_v23 = vadd.f32 %v2994_v42, %v2873_v34 }
 0x7e2   : > { %v3014_v57 = vmax.f32 %v2966_v55, 0.0  ;;  %v3015_v38 = vmax.f32 %v2995_v23, 0.0 }
 0x7e7   : > { %v2967_v56 = vpop.f32.mrf.mxu0  ;;  %v2996_v60 = vpop.f32.mrf.mxu1 }
 0x7e8   : > { %v2968_v40 = vadd.f32 %v2967_v56, %v2872_v35  ;;  %v2997_v11 = vadd.f32 %v2996_v60, %v2873_v34  ;;  %v3038_v56 = vperm.slane %v6916_v51, 3 }
 0x7ea   : > { %v3016_v3 = vmax.f32 %v2968_v40, 0.0  ;;  %v3017_v2 = vmax.f32 %v2997_v11, 0.0 }
 0x7ec   : > { %v3030_v13 = vpack.c.bf16 %v3016_v3, %v3014_v57  ;;  %v3031_v6 = vpack.c.bf16 %v3017_v2, %v3015_v38 }
 0x7ee   : > { %3143 = vmatmul.bf16.vlgmr.msrb.gmra.mxu2 %v3030_v13  ;;  %3172 = vmatmul.bf16.vlgmr.msrb.gmra.mxu3 %v3031_v6 }
 0x7ef   : > { %v2970_v48 = vpop.f32.mrf.mxu0  ;;  %v2999_v30 = vpop.f32.mrf.mxu1 }
 0x7f0   : > { %v2971_v59 = vadd.f32 %v2970_v48, %v2872_v35  ;;  %v3000_v62 = vadd.f32 %v2999_v30, %v2873_v34 }
 0x7f2   : > { %v3018_v22 = vmax.f32 %v2971_v59, 0.0  ;;  %v3019_v8 = vmax.f32 %v3000_v62, 0.0 }
 0x7f7   : > { %v2972_v29 = vpop.f32.mrf.mxu0  ;;  %v3001_v45 = vpop.f32.mrf.mxu1 }
 0x7f8   : > { %v2973_v18 = vadd.f32 %v2972_v29, %v2872_v35  ;;  %v3002_v20 = vadd.f32 %v3001_v45, %v2873_v34 }
 0x7fa   : > { %v3020_v31 = vmax.f32 %v2973_v18, 0.0  ;;  %v3021_v12 = vmax.f32 %v3002_v20, 0.0 }
 0x7fc   : > { %v3032_v54 = vpack.c.bf16 %v3020_v31, %v3018_v22  ;;  %v3033_v61 = vpack.c.bf16 %v3021_v12, %v3019_v8 }
 0x7fe   : > { %3148 = vmatmul.bf16.gmra.mxu2 %v3032_v54  ;;  %3177 = vmatmul.bf16.gmra.mxu3 %v3033_v61 }
 0x82d   : > { %v2975_v25 = vpop.f32.mrf.mxu0  ;;  %v3004_v58 = vpop.f32.mrf.mxu1 }
 0x82e   : > { %v2976_v17 = vadd.f32 %v2975_v25, %v2872_v35  ;;  %v3005_v7 = vadd.f32 %v3004_v58, %v2873_v34 }
 0x830   : > { %v3022_v0 = vmax.f32 %v2976_v17, 0.0  ;;  %v3023_v9 = vmax.f32 %v3005_v7, 0.0 }
 0x835   : > { %v2977_v63 = vpop.f32.mrf.mxu0  ;;  %v3006_v14 = vpop.f32.mrf.mxu1 }
 0x836   : > { %v2978_v37 = vadd.f32 %v2977_v63, %v2872_v35  ;;  %v3007_v24 = vadd.f32 %v3006_v14, %v2873_v34 }
 0x838   : > { %v3024_v5 = vmax.f32 %v2978_v37, 0.0  ;;  %v3025_v4 = vmax.f32 %v3007_v24, 0.0 }
 0x83a   : > { %v3034_v39 = vpack.c.bf16 %v3024_v5, %v3022_v0  ;;  %v3035_v47 = vpack.c.bf16 %v3025_v4, %v3023_v9 }
 0x83c   : > { %3153 = vmatmul.bf16.gmra.mxu2 %v3034_v39  ;;  %3182 = vmatmul.bf16.gmra.mxu3 %v3035_v47 }
 0x859   : > { %v2980_v19 = vpop.f32.mrf.mxu0  ;;  %v3009_v10 = vpop.f32.mrf.mxu1 }
 0x85a   : > { %v2981_v41 = vadd.f32 %v2980_v19, %v2872_v35  ;;  %v3010_v52 = vadd.f32 %v3009_v10, %v2873_v34 }
 0x85c   : > { %v3026_v49 = vmax.f32 %v2981_v41, 0.0  ;;  %v3027_v50 = vmax.f32 %v3010_v52, 0.0 }
 0x861   : > { %v2982_v43 = vpop.f32.mrf.mxu0  ;;  %v3011_v26 = vpop.f32.mrf.mxu1 }
 0x862   : > { %v2983_v36 = vadd.f32 %v2982_v43, %v2872_v35  ;;  %v3012_v53 = vadd.f32 %v3011_v26, %v2873_v34 }
 0x864   : > { %v3028_v21 = vmax.f32 %v2983_v36, 0.0  ;;  %v3029_v42 = vmax.f32 %v3012_v53, 0.0 }
 0x866   : > { %v3036_v55 = vpack.c.bf16 %v3028_v21, %v3026_v49  ;;  %v3037_v23 = vpack.c.bf16 %v3029_v42, %v3027_v50 }
 0x868   : > { %3158 = vmatmul.bf16.gmra.mxu2 %v3036_v55  ;;  %3187 = vmatmul.bf16.gmra.mxu3 %v3037_v23 }
 0x871   : > { %v3144_v60 = vpop.f32.mrf.mxu2  ;;  %v3173_v40 = vpop.f32.mrf.mxu3 }
 0x872   : > { %v3145_v11 = vadd.f32 %v3144_v60, %v3038_v56 }
 0x874   : > { %v3174_v57 = vadd.f32 %v3173_v40, %v3145_v11 }
 0x876   : > { %v3193_v38 = vadd.f32 %v3174_v57, %v7028_v33 }
 0x878   : > { %3201 = vadd.xlane.f32.xlu0 %v3193_v38 }
 0x879   : > { %v3146_v3 = vpop.f32.mrf.mxu2  ;;  %v3175_v35 = vpop.f32.mrf.mxu3 }
 0x87a   : > { %v3147_v34 = vadd.f32 %v3146_v3, %v3038_v56 }
 0x87c   : > { %v3176_v2 = vadd.f32 %v3175_v35, %v3147_v34 }
 0x87e   : > { %v3194_v13 = vadd.f32 %v3176_v2, %v7031_v44 }
 0x880   : > { %3203 = vadd.xlane.f32.xlu1 %v3194_v13 }
 0x881   : > { %v3149_v6 = vpop.f32.mrf.mxu2  ;;  %v3178_v48 = vpop.f32.mrf.mxu3 }
 0x882   : > { %v3150_v30 = vadd.f32 %v3149_v6, %v3038_v56 }
 0x884   : > { %v3179_v59 = vadd.f32 %v3178_v48, %v3150_v30 }
 0x886   : > { %v3195_v51 = vadd.f32 %v3179_v59, %v7040_v15 }
 0x888   : > { %3205 = vadd.xlane.f32.xlu2 %v3195_v51 }
 0x889   : > { %v3151_v62 = vpop.f32.mrf.mxu2  ;;  %v3180_v45 = vpop.f32.mrf.mxu3 }
 0x88a   : > { %v3152_v29 = vadd.f32 %v3151_v62, %v3038_v56 }
 0x88c   : > { %v3181_v18 = vadd.f32 %v3180_v45, %v3152_v29 }
 0x88e   : > { %v3196_v33 = vadd.f32 %v3181_v18, %v7043_v32 }
 0x890   : > { %3207 = vadd.xlane.f32.xlu0 %v3196_v33 }
 0x8bf   : > { %v3154_v20 = vpop.f32.mrf.mxu2  ;;  %v3183_v22 = vpop.f32.mrf.mxu3 }
 0x8c0   : > { %v3155_v8 = vadd.f32 %v3154_v20, %v3038_v56 }
 0x8c2   : > { %v3184_v31 = vadd.f32 %v3183_v22, %v3155_v8 }
 0x8c4   : > { %v3197_v44 = vadd.f32 %v3184_v31, %v7055_v28 }
 0x8c6   : > { %3209 = vadd.xlane.f32.xlu1 %v3197_v44 }
 0x8c7   : > { %v3156_v12 = vpop.f32.mrf.mxu2  ;;  %v3185_v61 = vpop.f32.mrf.mxu3 }
 0x8c8   : > { %v3157_v54 = vadd.f32 %v3156_v12, %v3038_v56 }
 0x8ca   : > { %v3186_v25 = vadd.f32 %v3185_v61, %v3157_v54  ;;  %v4998_v54 = vld [vmem:[%s6913_s25] sm:$0x3f]  ;;  %s7680_s25 = sld [smem:[#allocation39_spill]] (%p136_p0) }
 0x8cb   : > { %v7155_v61 = vperm.slane %v4998_v54, 4 }
 0x8cc   : > { %v3198_v15 = vadd.f32 %v3186_v25, %v7058_v46 }
 0x8ce   : > { %3211 = vadd.xlane.f32.xlu2 %v3198_v15 }
 0x8eb   : > { %v3159_v58 = vpop.f32.mrf.mxu2  ;;  %v3188_v17 = vpop.f32.mrf.mxu3 }
 0x8ec   : > { %v3160_v7 = vadd.f32 %v3159_v58, %v3038_v56  ;;  %v3202_v63 = vpop.xlane.xlu0 %3201  ;;  %v7157_v58 = vperm.slane %v4998_v54, 5 }
 0x8ed   : > { %v3217_v32 = vmul.f32 %v3202_v63, %v6926_v1 }
 0x8ee   : > { %v3189_v14 = vadd.f32 %v3188_v17, %v3160_v7 }
 0x8ef   : > { %v7110_v37 = vsub.f32 %v3193_v38, %v3217_v32 }
 0x8f0   : > { %v3199_v24 = vadd.f32 %v3189_v14, %v7091_v16 }
 0x8f1   : > { %v3233_v28 = vmul.f32 %v7110_v37, %v7110_v37 }
 0x8f2   : > { %3213 = vadd.xlane.f32.xlu0 %v3199_v24 }
 0x8f3   : > { %3241 = vadd.xlane.f32.xlu2 %v3233_v28  ;;  %v3204_v0 = vpop.xlane.xlu1 %3203  ;;  %v3161_v9 = vpop.f32.mrf.mxu2 }
 0x8f4   : > { %v3218_v46 = vmul.f32 %v3204_v0, %v6926_v1  ;;  %v3162_v5 = vadd.f32 %v3161_v9, %v3038_v56  ;;  %v3190_v4 = vpop.f32.mrf.mxu3 }
 0x8f6   : > { %v7116_v39 = vsub.f32 %v3194_v13, %v3218_v46  ;;  %v3191_v47 = vadd.f32 %v3190_v4, %v3162_v5 }
 0x8f8   : > { %v3200_v19 = vadd.f32 %v3191_v47, %v7094_v27  ;;  %v3234_v10 = vmul.f32 %v7116_v39, %v7116_v39 }
 0x8fa   : > { %3243 = vadd.xlane.f32.xlu0 %v3234_v10  ;;  %3215 = vadd.xlane.f32.xlu1 %v3200_v19 }
 0x8fb   : > { %v3206_v16 = vpop.xlane.xlu2 %3205 }
 0x8fc   : > { %v3219_v41 = vmul.f32 %v3206_v16, %v6926_v1 }
 0x8fe   : > { %v7122_v52 = vsub.f32 %v3195_v51, %v3219_v41 }
 0x900   : > { %v3235_v43 = vmul.f32 %v7122_v52, %v7122_v52 }
 0x902   : > { %3245 = vadd.xlane.f32.xlu1 %v3235_v43 }
 0x903   : > { %v3208_v26 = vpop.xlane.xlu0 %3207 }
 0x904   : > { %v3220_v36 = vmul.f32 %v3208_v26, %v6926_v1 }
 0x906   : > { %v7127_v53 = vsub.f32 %v3196_v33, %v3220_v36 }
 0x908   : > { %v3236_v27 = vmul.f32 %v7127_v53, %v7127_v53 }
 0x90a   : > { %3247 = vadd.xlane.f32.xlu2 %v3236_v27 }
 0x939   : > { %v3210_v49 = vpop.xlane.xlu1 %3209 }
 0x93a   : > { %v3221_v50 = vmul.f32 %v3210_v49, %v6926_v1 }
 0x93c   : > { %v7132_v21 = vsub.f32 %v3197_v44, %v3221_v50 }
 0x93e   : > { %v3237_v42 = vmul.f32 %v7132_v21, %v7132_v21 }
 0x940   : > { %3249 = vadd.xlane.f32.xlu0 %v3237_v42 }
 0x941   : > { %v3212_v55 = vpop.xlane.xlu2 %3211 }
 0x942   : > { %v3222_v23 = vmul.f32 %v3212_v55, %v6926_v1 }
 0x944   : > { %v7137_v56 = vsub.f32 %v3198_v15, %v3222_v23 }
 0x946   : > { %v3238_v60 = vmul.f32 %v7137_v56, %v7137_v56 }
 0x948   : > { %3251 = vadd.xlane.f32.xlu1 %v3238_v60 }
 0x965   : > { %v3214_v40 = vpop.xlane.xlu0 %3213 }
 0x966   : > { %v3242_v11 = vpop.xlane.xlu2 %3241  ;;  %v3223_v57 = vmul.f32 %v3214_v40, %v6926_v1 }
 0x967   : > { %v3257_v38 = vmul.f32 %v3242_v11, %v6926_v1 }
 0x968   : > { %v7143_v3 = vsub.f32 %v3199_v24, %v3223_v57 }
 0x969   : > { %v3265_v35 = vadd.f32 1e-05, %v3257_v38 }
 0x96a   : > { %v3239_v34 = vmul.f32 %v7143_v3, %v7143_v3 }
 0x96b   : > { %4982 = vrsqrt.f32 %v3265_v35  ;;  %vm3279_vm3 = vweird.f32 %v3265_v35 }
 0x96c   : > { %3253 = vadd.xlane.f32.xlu2 %v3239_v34 }
 0x96d   : > { %v3216_v2 = vpop.xlane.xlu1 %3215  ;;  %v3244_v13 = vpop.xlane.xlu0 %3243 }
 0x96e   : > { %v3224_v6 = vmul.f32 %v3216_v2, %v6926_v1  ;;  %v3258_v48 = vmul.f32 %v3244_v13, %v6926_v1 }
 0x970   : > { %v7149_v30 = vsub.f32 %v3200_v19, %v3224_v6  ;;  %v3266_v59 = vadd.f32 1e-05, %v3258_v48 }
 0x971   : > { %v4983_v51 = vpop.eup %4982 }
 0x972   : > { %v3274_v62 = vmul.f32 %v4983_v51, %v3265_v35  ;;  %4984 = vrsqrt.f32 %v3266_v59  ;;  %v3240_v29 = vmul.f32 %v7149_v30, %v7149_v30  ;;  %vm3280_vm2 = vweird.f32 %v4983_v51 }
 0x973   : > { %vm3281_vm4 = vmor %vm3279_vm3, %vm3280_vm2  ;;  %vm3289_vm6 = vweird.f32 %v3266_v59 }
 0x974   : > { %v3275_v45 = vmul.f32 %v4983_v51, %v3274_v62  ;;  %3255 = vadd.xlane.f32.xlu0 %v3240_v29 }
 0x975   : > { %v3246_v18 = vpop.xlane.xlu1 %3245 }
 0x976   : > { %v3276_v33 = vmul.f32 0.5, %v3275_v45  ;;  %v3259_v20 = vmul.f32 %v3246_v18, %v6926_v1 }
 0x978   : > { %v4985_v22 = vpop.eup %4984  ;;  %v3277_v8 = vsub.f32 1.5, %v3276_v33  ;;  %v3267_v31 = vadd.f32 1e-05, %v3259_v20 }
 0x979   : > { %v3284_v44 = vmul.f32 %v4985_v22, %v3266_v59  ;;  %vm3290_vm5 = vweird.f32 %v4985_v22 }
 0x97a   : > { %v3278_v12 = vmul.f32 %v4983_v51, %v3277_v8  ;;  %4986 = vrsqrt.f32 %v3267_v31  ;;  %vm3291_vm7 = vmor %vm3289_vm6, %vm3290_vm5  ;;  %vm3299_vm9 = vweird.f32 %v3267_v31 }
 0x97b   : > { %v3285_v25 = vmul.f32 %v4985_v22, %v3284_v44 }
 0x97c   : > { %v3282_v15 = vsel %vm3281_vm4, %v4983_v51, %v3278_v12 }
 0x97d   : > { %v3353_v17 = vmul.f32 %v3282_v15, %v7110_v37  ;;  %v3286_v7 = vmul.f32 0.5, %v3285_v25  ;;  %v3248_v63 = vpop.xlane.xlu2 %3247 }
 0x97e   : > { %v3260_v32 = vmul.f32 %v3248_v63, %v6926_v1 }
 0x97f   : > { %v3362_v14 = vmul.f32 %v7155_v61, %v3353_v17  ;;  %v3287_v24 = vsub.f32 1.5, %v3286_v7 }
 0x980   : > { %v4987_v28 = vpop.eup %4986  ;;  %v3268_v0 = vadd.f32 1e-05, %v3260_v32 }
 0x981   : > { %v7163_v9 = vadd.f32 %v7157_v58, %v3362_v14   ;;  %v3288_v46 = vmul.f32 %v4985_v22, %v3287_v24  ;;  %v3294_v5 = vmul.f32 %v4987_v28, %v3267_v31  ;;  %vm3300_vm8 = vweird.f32 %v4987_v28 }
 0x982   : > { %4988 = vrsqrt.f32 %v3268_v0  ;;  %vm3301_vm10 = vmor %vm3299_vm9, %vm3300_vm8  ;;  %vm3309_vm12 = vweird.f32 %v3268_v0 }
 0x983   : > { %v3292_v4 = vsel %vm3291_vm7, %v4985_v22, %v3288_v46  ;;  %v3295_v37 = vmul.f32 %v4987_v28, %v3294_v5 }
 0x984   : > { %v3354_v47 = vmul.f32 %v3292_v4, %v7116_v39 }
 0x985   : > { %v3296_v19 = vmul.f32 0.5, %v3295_v37 }
 0x986   : > { %v3363_v10 = vmul.f32 %v7155_v61, %v3354_v47 }
 0x987   : > { %v3297_v16 = vsub.f32 1.5, %v3296_v19 }
 0x988   : > { %v4989_v41 = vpop.eup %4988  ;;  %v7168_v32 = vadd.f32 %v7157_v58, %v3363_v10  }
 0x989   : > { %v3298_v26 = vmul.f32 %v4987_v28, %v3297_v16  ;;  %v3304_v36 = vmul.f32 %v4989_v41, %v3268_v0  ;;  %vm3310_vm11 = vweird.f32 %v4989_v41 }
 0x98a   : > { %v7665_v43 = vmov %v7168_v32  ;;  %vm3311_vm13 = vmor %vm3309_vm12, %vm3310_vm11  ;;  %vm3453_vm11 = vcmask (%p136_p0), 1040384   ;;  %vm3454_vm12 = vcmask (%p136_p0), 1041408  }
 0x98b   : > { %v3302_v27 = vsel %vm3301_vm10, %v4987_v28, %v3298_v26  ;;  %v3305_v49 = vmul.f32 %v4989_v41, %v3304_v36 }
 0x98c   : > { %v3355_v50 = vmul.f32 %v3302_v27, %v7122_v52 }
 0x98d   : > { %v3306_v42 = vmul.f32 0.5, %v3305_v49 }
 0x98e   : > { %v3364_v39 = vmul.f32 %v7155_v61, %v3355_v50 }
 0x98f   : > { %v3307_v55 = vsub.f32 1.5, %v3306_v42 }
 0x990   : > { %v7173_v25 = vadd.f32 %v7157_v58, %v3364_v39  }
 0x991   : > { %v3308_v60 = vmul.f32 %v4989_v41, %v3307_v55  ;;  %v3442_v55 = vld [vmem:[%s7680_s25] sm:$0xff] (%p136_p0) }
 0x992   : > { %v7666_v23 = vmov %v7173_v25 }
 0x993   : > { %v3312_v40 = vsel %vm3311_vm13, %v4989_v41, %v3308_v60  ;;  %v4435_v60 = vld [vmem:[%s7520_s14 + $0x70] sm:$0xf] (%p136_p0) }
 0x994   : > { %v3356_v11 = vmul.f32 %v3312_v40, %v7127_v53  ;;  %v4589_v40 = vld [vmem:[%s7520_s14 + $0x74] sm:$0xf0] (%p136_p0) }
 0x996   : > { %v3365_v57 = vmul.f32 %v7155_v61, %v3356_v11 }
 0x998   : > { %v7178_v33 = vadd.f32 %v7157_v58, %v3365_v57   ;;  %v4436_v57 = vor.u32 (%p136_p0), %v4589_v40, %v4435_v60  ;;  %v4597_v40 = vld [vmem:[%s7520_s14 + $0xb4] sm:$0xf0] (%p136_p0) }
 0x99a   : > { %v7667_v38 = vmov %v7178_v33  ;;  %3732 = vmatpush.bf16.msra.mxu3 (%p136_p0), %v4436_v57  ;;  %v4341_v57 = vld [vmem:[%s7520_s14 + $0xb8] sm:$0xf0] (%p136_p0) }
 0x9b3   : > { %v3250_v52 = vpop.xlane.xlu0 %3249 }
 0x9b4   : > { %v3261_v35 = vmul.f32 %v3250_v52, %v6926_v1  ;;  %v4427_v52 = vld [vmem:[%s7520_s14 + $0x60] sm:$0xf] (%p136_p0) }
 0x9b6   : > { %v3269_v34 = vadd.f32 1e-05, %v3261_v35  ;;  %v4587_v35 = vld [vmem:[%s7520_s14 + $0x64] sm:$0xf0] (%p136_p0) }
 0x9b8   : > { %4990 = vrsqrt.f32 %v3269_v34  ;;  %vm3319_vm15 = vweird.f32 %v3269_v34 }
 0x9bb   : > { %v3252_v2 = vpop.xlane.xlu1 %3251 }
 0x9bc   : > { %v3262_v13 = vmul.f32 %v3252_v2, %v6926_v1  ;;  %v4588_v2 = vld [vmem:[%s7520_s14 + $0x74] sm:$0xf] (%p136_p0) }
 0x9be   : > { %v4991_v6 = vpop.eup %4990  ;;  %v3270_v48 = vadd.f32 1e-05, %v3262_v13  ;;  %v4437_v13 = vld [vmem:[%s7520_s14 + $0x78] sm:$0xf0] (%p136_p0) }
 0x9bf   : > { %v3314_v59 = vmul.f32 %v4991_v6, %v3269_v34  ;;  %vm3320_vm14 = vweird.f32 %v4991_v6 }
 0x9c0   : > { %4992 = vrsqrt.f32 %v3270_v48  ;;  %vm3321_vm1 = vmor %vm3319_vm15, %vm3320_vm14  ;;  %vm3329_vm3 = vweird.f32 %v3270_v48  ;;  %vm3636_vm14 = vcmask (%p136_p0), 1041409   ;;  %vm3638_vm15 = vcmask (%p136_p0), 1042434  }
 0x9c1   : > { %v3315_v51 = vmul.f32 %v4991_v6, %v3314_v59  ;;  %v4428_v59 = vor.u32 (%p136_p0), %v4587_v35, %v4427_v52  ;;  %v4395_v52 = vld [vmem:[%s7520_s14 + $0x20] sm:$0xf] (%p136_p0)  ;;  %v4579_v35 = vld [vmem:[%s7520_s14 + $0x24] sm:$0xf0] (%p136_p0) }
 0x9c3   : > { %v3316_v62 = vmul.f32 0.5, %v3315_v51  ;;  %v4440_v51 = vor.u32 (%p136_p0), %v4588_v2, %v4437_v13  ;;  %3733 = vmatpush.bf16.msra.mxu3 (%p136_p0), %v4428_v59  ;;  %v4578_v2 = vld [vmem:[%s7520_s14 + $0x24] sm:$0xf] (%p136_p0)  ;;  %v3379_v13 = vrot.slane (%p136_p0), %v7163_v9, 4  ;;  %v4387_v59 = vld [vmem:[%s7520_s14 + $0x10] sm:$0xf] (%p136_p0) }
 0x9c5   : > { %v3317_v53 = vsub.f32 1.5, %v3316_v62  ;;  %v4605_v62 = vld [vmem:[%s7520_s14 + $0xf4] sm:$0xf0] (%p136_p0) }
 0x9c6   : > { %v4993_v29 = vpop.eup %4992 }
 0x9c7   : > { %v3318_v45 = vmul.f32 %v4991_v6, %v3317_v53  ;;  %v3324_v18 = vmul.f32 %v4993_v29, %v3270_v48  ;;  %vm3330_vm2 = vweird.f32 %v4993_v29  ;;  %v3443_v48 = vpack.c.bf16 (%p136_p0), %v3442_v55, %v3442_v55  ;;  %v4604_v53 = vld [vmem:[%s7520_s14 + $0xf4] sm:$0xf] (%p136_p0)  ;;  %v4339_v55 = vld [vmem:[%s7520_s14 + $0xb0] sm:$0xf] (%p136_p0) }
 0x9c8   : > { %vm3331_vm4 = vmor %vm3329_vm3, %vm3330_vm2  ;;  %vm3642_vm2 = vcmask (%p136_p0), 1044484   ;;  %vm3644_vm3 = vcmask (%p136_p0), 1045509  }
 0x9c9   : > { %v3322_v33 = vsel %vm3321_vm1, %v4991_v6, %v3318_v45  ;;  %v3325_v20 = vmul.f32 %v4993_v29, %v3324_v18  ;;  %v4371_v6 = vld [vmem:[%s7520_s14 + $0xf0] sm:$0xf] (%p136_p0)  ;;  %vm3640_vm1 = vcmask (%p136_p0), 1043459  }
 0x9ca   : > { %v3357_v22 = vmul.f32 %v3322_v33, %v7132_v21  ;;  %v7676_v33 = vmov %v7667_v38  ;;  %v4372_v45 = vor.u32 (%p136_p0), %v4605_v62, %v4371_v6  ;;  %v4340_v6 = vor.u32 (%p136_p0), %v4597_v40, %v4339_v55  ;;  %v4331_v62 = vld [vmem:[%s7520_s14 + $0xa0] sm:$0xf] (%p136_p0) }
 0x9cb   : > { %v3326_v8 = vmul.f32 0.5, %v3325_v20  ;;  %v4419_v33 = vld [vmem:[%s7520_s14 + $0x50] sm:$0xf] (%p136_p0)  ;;  %v4585_v20 = vld [vmem:[%s7520_s14 + $0x54] sm:$0xf0] (%p136_p0) }
 0x9cc   : > { %v3366_v31 = vmul.f32 %v7155_v61, %v3357_v22  ;;  %v4586_v22 = vld [vmem:[%s7520_s14 + $0x64] sm:$0xf] (%p136_p0)  ;;  %3594 = vmatpush.bf16.msra.mxu1 (%p136_p0), %v4372_v45  ;;  %v4577_v45 = vld [vmem:[%s7520_s14 + $0x14] sm:$0xf0] (%p136_p0) }
 0x9cd   : > { %v3327_v44 = vsub.f32 1.5, %v3326_v8  ;;  %v4429_v8 = vld [vmem:[%s7520_s14 + $0x68] sm:$0xf0] (%p136_p0) }
 0x9ce   : > { %v7185_v28 = vadd.f32 %v7157_v58, %v3366_v31   ;;  %v4363_v31 = vld [vmem:[%s7520_s14 + $0xe0] sm:$0xf] (%p136_p0) }
 0x9cf   : > { %v3328_v54 = vmul.f32 %v4993_v29, %v3327_v44  ;;  %v4603_v44 = vld [vmem:[%s7520_s14 + $0xe4] sm:$0xf0] (%p136_p0) }
 0x9d0   : > { %v7668_v12 = vmov %v7185_v28 }
 0x9d1   : > { %v3332_v25 = vsel %vm3331_vm4, %v4993_v29, %v3328_v54  ;;  %v4432_v54 = vor.u32 (%p136_p0), %v4586_v22, %v4429_v8  ;;  %v4389_v22 = vld [vmem:[%s7520_s14 + $0x18] sm:$0xf0] (%p136_p0)  ;;  %v4323_v8 = vld [vmem:[%s7520_s14 + $0x90] sm:$0xf] (%p136_p0)  ;;  %vm3646_vm4 = vcmask (%p136_p0), 1046534  }
 0x9d2   : > { %v3358_v15 = vmul.f32 %v3332_v25, %v7137_v56  ;;  %v7677_v25 = vmov %v7666_v23 }
 0x9d3   :  { %v4364_v25 = vor.u32 (%p136_p0), %v4603_v44, %v4363_v31 }
 0x9d4   : > { %v3367_v17 = vmul.f32 %v7155_v61, %v3358_v15  ;;  %v4602_v15 = vld [vmem:[%s7520_s14 + $0xe4] sm:$0xf] (%p136_p0) }
 0x9d5   :  { %3595 = vmatpush.bf16.msra.mxu1 (%p136_p0), %v4364_v25  ;;  %v4592_v25 = vld [vmem:[%s7520_s14 + $0x94] sm:$0xf] (%p136_p0) }
 0x9d6   : > { %v7190_v36 = vadd.f32 %v7157_v58, %v3367_v17   ;;  %v4365_v17 = vld [vmem:[%s7520_s14 + $0xe8] sm:$0xf0] (%p136_p0) }
 0x9d8   : > { %v7669_v7 = vmov %v7190_v36 }
 0x9df   : > { %v3254_v21 = vpop.xlane.xlu2 %3253 }
 0x9e0   : > { %v3263_v63 = vmul.f32 %v3254_v21, %v6926_v1  ;;  %v4411_v21 = vld [vmem:[%s7520_s14 + $0x40] sm:$0xf] (%p136_p0) }
 0x9e2   : > { %v3271_v32 = vadd.f32 1e-05, %v3263_v63  ;;  %v4420_v63 = vor.u32 (%p136_p0), %v4585_v20, %v4419_v33  ;;  %v4333_v33 = vld [vmem:[%s7520_s14 + $0xa8] sm:$0xf0] (%p136_p0)  ;;  %v4576_v20 = vld [vmem:[%s7520_s14 + $0x14] sm:$0xf] (%p136_p0) }
 0x9e4   : > { %4994 = vrsqrt.f32 %v3271_v32  ;;  %vm3339_vm6 = vweird.f32 %v3271_v32  ;;  %3734 = vmatpush.bf16.msra.mxu3 (%p136_p0), %v4420_v63  ;;  %v3391_v63 = vrot.slane (%p136_p0), %v7666_v23, 4 }
 0x9e7   : > { %v3256_v14 = vpop.xlane.xlu0 %3255 }
 0x9e8   : > { %v3264_v24 = vmul.f32 %v3256_v14, %v6926_v1  ;;  %v4583_v14 = vld [vmem:[%s7520_s14 + $0x44] sm:$0xf0] (%p136_p0) }
 0x9ea   : > { %v4995_v28 = vpop.eup %4994  ;;  %v3272_v46 = vadd.f32 1e-05, %v3264_v24  ;;  %v7679_v24 = vmov %v7163_v9 }
 0x9eb   : > { %v3334_v0 = vmul.f32 %v4995_v28, %v3271_v32  ;;  %vm3340_vm5 = vweird.f32 %v4995_v28  ;;  %v7678_v32 = vmov %v7665_v43  ;;  %v4584_v24 = vld [vmem:[%s7520_s14 + $0x54] sm:$0xf] (%p136_p0) }
 0x9ec   : > { %4996 = vrsqrt.f32 %v3272_v46  ;;  %vm3341_vm7 = vmor %vm3339_vm6, %vm3340_vm5  ;;  %vm3349_vm9 = vweird.f32 %v3272_v46  ;;  %v4368_v32 = vor.u32 (%p136_p0), %v4602_v15, %v4365_v17  ;;  %v3385_v15 = vrot.slane (%p136_p0), %v7665_v43, 4 }
 0x9ed   : > { %v3335_v5 = vmul.f32 %v4995_v28, %v3334_v0  ;;  %v4355_v0 = vld [vmem:[%s7520_s14 + $0xd0] sm:$0xf] (%p136_p0)  ;;  %vm3648_vm5 = vcmask (%p136_p0), 1047559  }
 0x9ef   : > { %v3336_v4 = vmul.f32 0.5, %v3335_v5  ;;  %v4600_v5 = vld [vmem:[%s7520_s14 + $0xd4] sm:$0xf] (%p136_p0) }
 0x9f1   : > { %v3337_v56 = vsub.f32 1.5, %v3336_v4 }
 0x9f2   : > { %v4997_v37 = vpop.eup %4996 }
 0x9f3   : > { %v3338_v47 = vmul.f32 %v4995_v28, %v3337_v56  ;;  %v3344_v19 = vmul.f32 %v4997_v37, %v3272_v46  ;;  %vm3350_vm8 = vweird.f32 %v4997_v37  ;;  %v4601_v46 = vld [vmem:[%s7520_s14 + $0xd4] sm:$0xf0] (%p136_p0)  ;;  %v4357_v56 = vld [vmem:[%s7520_s14 + $0xd8] sm:$0xf0] (%p136_p0) }
 0x9f4   : > { %vm3351_vm10 = vmor %vm3349_vm9, %vm3350_vm8 }
 0x9f5   : > { %v3342_v10 = vsel %vm3341_vm7, %v4995_v28, %v3338_v47  ;;  %v3345_v41 = vmul.f32 %v4997_v37, %v3344_v19  ;;  %v7675_v28 = vmov %v7668_v12  ;;  %v4360_v47 = vor.u32 (%p136_p0), %v4600_v5, %v4357_v56  ;;  %v4582_v19 = vld [vmem:[%s7520_s14 + $0x44] sm:$0xf] (%p136_p0)  ;;  %v4379_v5 = vld [vmem:[%s7520_s14] sm:$0xf] (%p136_p0) }
 0x9f6   : > { %v3359_v16 = vmul.f32 %v3342_v10, %v7143_v3  ;;  %v4421_v28 = vld [vmem:[%s7520_s14 + $0x58] sm:$0xf0] (%p136_p0)  ;;  %v4413_v10 = vld [vmem:[%s7520_s14 + $0x48] sm:$0xf0] (%p136_p0)  ;;  %v3380_v56 = vadd.f32 (%p136_p0), %v3379_v13, %v7163_v9 }
 0x9f7   : > { %v3346_v1 = vmul.f32 0.5, %v3345_v41  ;;  %v4424_v4 = vor.u32 (%p136_p0), %v4584_v24, %v4421_v28  ;;  %v4412_v41 = vor.u32 (%p136_p0), %v4583_v14, %v4411_v21  ;;  %v4325_v21 = vld [vmem:[%s7520_s14 + $0x98] sm:$0xf0] (%p136_p0)  ;;  %v3403_v14 = vrot.slane (%p136_p0), %v7668_v12, 4 }
 0x9f8   : > { %v3368_v26 = vmul.f32 %v7155_v61, %v3359_v16  ;;  %v4347_v16 = vld [vmem:[%s7520_s14 + $0xc0] sm:$0xf] (%p136_p0)  ;;  %v4388_v24 = vor.u32 (%p136_p0), %v4577_v45, %v4387_v59  ;;  %v3409_v28 = vrot.slane (%p136_p0), %v7669_v7, 4 }
 0x9f9   : > { %v3347_v36 = vsub.f32 1.5, %v3346_v1  ;;  %v4598_v1 = vld [vmem:[%s7520_s14 + $0xc4] sm:$0xf] (%p136_p0)  ;;  %3735 = vmatpush.bf16.msra.mxu3 (%p136_p0), %v4412_v41 }
 0x9fa   : > { %v7197_v29 = vadd.f32 %v7157_v58, %v3368_v26   ;;  %v4599_v26 = vld [vmem:[%s7520_s14 + $0xc4] sm:$0xf0] (%p136_p0) }
 0x9fb   : > { %v3348_v49 = vmul.f32 %v4997_v37, %v3347_v36  ;;  %v7674_v36 = vmov %v7669_v7 }
 0x9fc   : > { %v7670_v27 = vmov %v7197_v29  ;;  %v4349_v36 = vld [vmem:[%s7520_s14 + $0xc8] sm:$0xf0] (%p136_p0) }
 0x9fd   : > { %v3352_v50 = vsel %vm3351_vm10, %v4997_v37, %v3348_v49  ;;  %v7673_v29 = vmov %v7670_v27  ;;  %v4403_v49 = vld [vmem:[%s7520_s14 + $0x30] sm:$0xf] (%p136_p0) }
 0x9fe   : > { %v3360_v42 = vmul.f32 %v3352_v50, %v7149_v30  ;;  %v3444_v30 = vld [vmem:[%s7518_s12] sm:$0x3] (%p136_p0)  ;;  %v4373_v29 = vld [vmem:[%s7520_s14 + $0xf8] sm:$0xf0] (%p136_p0)  ;;  %v4581_v50 = vld [vmem:[%s7520_s14 + $0x34] sm:$0xf0] (%p136_p0) }
 0x9ff   :  { %v4376_v18 = vor.u32 (%p136_p0), %v4604_v53, %v4373_v29  ;;  %v4404_v60 = vor.u32 (%p136_p0), %v4581_v50, %v4403_v49  ;;  %v4595_v53 = vld [vmem:[%s7520_s14 + $0xa4] sm:$0xf0] (%p136_p0)  ;;  %v4396_v29 = vor.u32 (%p136_p0), %v4579_v35, %v4395_v52  ;;  %v3381_v50 = vrot.slane (%p136_p0), %v3380_v56, 2 }
 0xa00   : > { %v3369_v39 = vmul.f32 %v7155_v61, %v3360_v42  ;;  %v5083_v61 = vmov (%p136_p0), 65535   ;;  %v4416_v42 = vor.u32 (%p136_p0), %v4582_v19, %v4413_v10  ;;  %v4332_v44 = vor.u32 (%p136_p0), %v4595_v53, %v4331_v62 }
 0xa01   :  { %138 = sbr.rel (!%p136_p0) target bundleno = 158 (0x9e), region = 106  ;;  %3607 = vmatpush.bf16.msra.mxu2 (%p136_p0), %v4376_v18  ;;  %3736 = vmatpush.bf16.msra.mxu3 (%p136_p0), %v4404_v60  ;;  %v4594_v18 = vld [vmem:[%s7520_s14 + $0xa4] sm:$0xf] (%p136_p0)  ;;  %v4328_v19 = vor.u32 (%p136_p0), %v4592_v25, %v4325_v21  ;;  %v3386_v10 = vadd.f32 (%p136_p0), %v3385_v15, %v7665_v43 }
 0xa02   : > { %v7202_v37 = vadd.f32 %v7157_v58, %v3369_v39   ;;  %v3455_v58 = vsel (%p136_p0), %vm3453_vm11, 4294967295, %v5083_v61  ;;  %v4348_v39 = vor.u32 (%p136_p0), %v4599_v26, %v4347_v16  ;;  %v4580_v61 = vld [vmem:[%s7520_s14 + $0x34] sm:$0xf] (%p136_p0)  ;;  %v4336_v17 = vor.u32 (%p136_p0), %v4594_v18, %v4333_v33 }
 0xa03   :  { %v3456_v11 = vsel (%p136_p0), %vm3454_vm12, %v3455_v58, 0  ;;  %v4405_v58 = vld [vmem:[%s7520_s14 + $0x38] sm:$0xf0] (%p136_p0)  ;;  %v3392_v16 = vadd.f32 (%p136_p0), %v3391_v63, %v7666_v23  ;;  %v3404_v26 = vadd.f32 (%p136_p0), %v3403_v14, %v7668_v12 }
 0xa04   : > { %v7671_v3 = vmov %v7202_v37  ;;  %v3458_v34 = vand.u32 (%p136_p0), %v3456_v11, %v3444_v30  ;;  %v4352_v30 = vor.u32 (%p136_p0), %v4598_v1, %v4349_v36  ;;  %v4596_v11 = vld [vmem:[%s7520_s14 + $0xb4] sm:$0xf] (%p136_p0)  ;;  %v3410_v36 = vadd.f32 (%p136_p0), %v3409_v28, %v7669_v7 }
 0xa05   : > { %v7672_v37 = vmov %v7671_v3  ;;  %3608 = vmatpush.bf16.msra.mxu2 (%p136_p0), %v4368_v32  ;;  %v3397_v32 = vrot.slane (%p136_p0), %v7667_v38, 4  ;;  %3737 = vmatpush.bf16.msra.mxu3 (%p136_p0), %v4396_v29  ;;  %v3393_v43 = vrot.slane (%p136_p0), %v3392_v16, 2  ;;  %v3405_v23 = vrot.slane (%p136_p0), %v3404_v26, 2 }
 0xa06   :  { %3467 = vmatpush.bf16.msra.mxu0 %v3458_v34  ;;  %v4356_v37 = vor.u32 %v4601_v46, %v4355_v0  ;;  %v4408_v34 = vor.u32 %v4580_v61, %v4405_v58  ;;  %v3415_v0 = vrot.slane %v7670_v27, 4  ;;  %v3421_v46 = vrot.slane %v7671_v3, 4 }
 0xa07   :  { %v3398_v41 = vadd.f32 %v3397_v32, %v7667_v38  ;;  %v3411_v38 = vrot.slane %v3410_v36, 2  ;;  %v3382_v58 = vadd.f32 %v3381_v50, %v3380_v56  ;;  %v3394_v55 = vadd.f32 %v3393_v43, %v3392_v16 }
 0xa08   :  { %3596 = vmatpush.bf16.msra.mxu1 %v4356_v37  ;;  %v4392_v37 = vor.u32 %v4576_v20, %v4389_v22  ;;  %v3416_v9 = vadd.f32 %v3415_v0, %v7670_v27  ;;  %v3422_v49 = vadd.f32 %v3421_v46, %v7671_v3  ;;  %v3406_v60 = vadd.f32 %v3405_v23, %v3404_v26 }
 0xa09   :  { %4312 = vmatmul.msk.bf16.vlgmr.msra.gmra.mxu0 %vm3449_vm0, %v3443_v48  ;;  %3609 = vmatpush.bf16.msra.mxu2 %v4360_v47  ;;  %v4344_v48 = vor.u32 %v4596_v11, %v4341_v57  ;;  %v3412_v3 = vadd.f32 %v3411_v38, %v3410_v36  ;;  %v3383_v52 = vrot.slane %v3382_v58, 1 }
 0xa0a   :  { %3745 = vmatpush.bf16.msrb.mxu0 %v4440_v51  ;;  %v4397_v51 = vld [vmem:[%s7520_s14 + $0x28] sm:$0xf0]  ;;  %3738 = vmatpush.bf16.msra.mxu3 %v4388_v24  ;;  %v3417_v12 = vrot.slane %v3416_v9, 2  ;;  %v3423_v61 = vrot.slane %v3422_v49, 2 }
 0xa0b   :  { %v4400_v31 = vor.u32 %v4578_v2, %v4397_v51  ;;  %v3395_v2 = vrot.slane %v3394_v55, 1  ;;  %v3384_v53 = vadd.f32 %v3383_v52, %v3382_v58  ;;  %v4612_v52 = vld [vmem:[%s7522_s16 + $0x30] sm:$0xff] }
 0xa0c   :  { %3597 = vmatpush.bf16.msra.mxu1 %v4348_v39  ;;  %v3399_v39 = vrot.slane %v3398_v41, 2  ;;  %v3418_v40 = vadd.f32 %v3417_v12, %v3416_v9  ;;  %v3424_v11 = vadd.f32 %v3423_v61, %v3422_v49  ;;  %v4574_v12 = vld [vmem:[%s7520_s14 + $0x4] sm:$0xf]  ;;  %v4381_v61 = vld [vmem:[%s7520_s14 + $0x8] sm:$0xf0] }
 0xa0d   :  { %3610 = vmatpush.bf16.msra.mxu2 %v4352_v30  ;;  %v5084_v30 = vmov 8.0   ;;  %v3396_v18 = vadd.f32 %v3395_v2, %v3394_v55  ;;  %v4384_v58 = vor.u32 %v4574_v12, %v4381_v61  ;;  %v4591_v55 = vld [vmem:[%s7520_s14 + $0x84] sm:$0xf0] }
 0xa0e   :  { %3746 = vmatpush.bf16.msrb.mxu0 %v4432_v54  ;;  %v4593_v54 = vld [vmem:[%s7520_s14 + $0x94] sm:$0xf0]  ;;  %5001 = vrcp.f32 %v5084_v30  ;;  %v3400_v27 = vadd.f32 %v3399_v39, %v3398_v41  ;;  %v3419_v59 = vrot.slane %v3418_v40, 1  ;;  %v3425_v51 = vrot.slane %v3424_v11, 1  ;;  %v4619_v2 = vld [vmem:[%s7522_s16 + $0x68] sm:$0xff] }
 0xa0f   :  { %v4324_v47 = vor.u32 %v4593_v54, %v4323_v8 }
 0xa10   :  { %3598 = vmatpush.bf16.msra.mxu1 %v4340_v6  ;;  %v3401_v13 = vrot.slane %v3400_v27, 1  ;;  %v3407_v6 = vrot.slane %v3406_v60, 1  ;;  %v3420_v8 = vadd.f32 %v3419_v59, %v3418_v40  ;;  %v4999_v59 = vld [vmem:[%s7519_s13] ss:$0 sm:$0xff] }
 0xa11   :  { %3611 = vmatpush.bf16.msra.mxu2 %v4344_v48  ;;  %v3413_v48 = vrot.slane %v3412_v3, 1 }
 0xa12   :  { %3747 = vmatpush.bf16.msrb.mxu0 %v4424_v4  ;;  %v4575_v4 = vld [vmem:[%s7520_s14 + $0x4] sm:$0xf0]  ;;  %v3402_v33 = vadd.f32 %v3401_v13, %v3400_v27  ;;  %v3408_v20 = vadd.f32 %v3407_v6, %v3406_v60  ;;  %v4590_v27 = vld [vmem:[%s7520_s14 + $0x84] sm:$0xf] }
 0xa13   :  { %v4380_v1 = vor.u32 %v4575_v4, %v4379_v5  ;;  %v3414_v22 = vadd.f32 %v3413_v48, %v3412_v3  ;;  %v4317_v3 = vld [vmem:[%s7520_s14 + $0x88] sm:$0xf0]  ;;  %v4610_v13 = vld [vmem:[%s7522_s16 + $0x20] sm:$0xff]  ;;  %v4609_v48 = vld [vmem:[%s7522_s16 + $0x18] sm:$0xff] }
 0xa14   :  { %3599 = vmatpush.bf16.msra.mxu1 %v4332_v44  ;;  %v5002_v57 = vpop.eup %5001  ;;  %v4320_v40 = vor.u32 %v4590_v27, %v4317_v3  ;;  %v4618_v6 = vld [vmem:[%s7522_s16 + $0x60] sm:$0xff] }
 0xa15   :  { %3612 = vmatpush.bf16.msra.mxu2 %v4336_v17  ;;  %3739 = vmatpush.bf16.msra.mxu3 %v4380_v1  ;;  %vm3432_vm13 = vweird.f32 %v5002_v57 }
 0xa16   :  { %3748 = vmatpush.bf16.msrb.mxu0 %v4416_v42  ;;  %v3387_v42 = vrot.slane %v3386_v10, 2 }
 0xa18   :  { %3600 = vmatpush.bf16.msra.mxu1 %v4324_v47  ;;  %v3388_v7 = vadd.f32 %v3387_v42, %v3386_v10 }
 0xa19   :  { %3613 = vmatpush.bf16.msra.mxu2 %v4328_v19 }
 0xa1a   :  { %3749 = vmatpush.bf16.msrb.mxu0 %v4408_v34  ;;  %v3389_v35 = vrot.slane %v3388_v7, 1  ;;  %v3428_v34 = vmul.f32 8.0, %v5002_v57 }
 0xa1c   :  { %v3429_v62 = vsub.f32 1.0, %v3428_v34  ;;  %v3390_v29 = vadd.f32 %v3389_v35, %v3388_v7  ;;  %v4315_v7 = vld [vmem:[%s7520_s14 + $0x80] sm:$0xf]  ;;  %v4620_v35 = vld [vmem:[%s7522_s16 + $0x70] sm:$0xff]  ;;  %v4611_v34 = vld [vmem:[%s7522_s16 + $0x28] sm:$0xff] }
 0xa1d   :  { %v4316_v60 = vor.u32 %v4591_v55, %v4315_v7  ;;  %3614 = vmatpush.bf16.msra.mxu2 %v4320_v40 }
 0xa1e   :  { %3750 = vmatpush.bf16.msrb.mxu0 %v4400_v31  ;;  %v3430_v45 = vmul.f32 %v5002_v57, %v3429_v62  ;;  %v3426_v31 = vadd.f32 %v3425_v51, %v3424_v11  ;;  %v4613_v11 = vld [vmem:[%s7522_s16 + $0x38] sm:$0xff] }
 0xa1f   :  { %3601 = vmatpush.bf16.msra.mxu1 %v4316_v60 }
 0xa20   :  { %v3431_v44 = vadd.f32 %v5002_v57, %v3430_v45  ;;  %v4608_v45 = vld [vmem:[%s7522_s16 + $0x10] sm:$0xff] }
 0xa22   :  { %3751 = vmatpush.bf16.msrb.mxu0 %v4392_v37  ;;  %v3433_v54 = vsel %vm3432_vm13, %v5002_v57, %v3431_v44  ;;  %v4621_v57 = vld [vmem:[%s7522_s16 + $0x78] sm:$0xff] }
 0xa23   :  { %v3434_v25 = vmul.f32 %v3433_v54, %v3384_v53  ;;  %v3435_v15 = vmul.f32 %v3433_v54, %v3390_v29  ;;  %v3436_v17 = vmul.f32 %v3433_v54, %v3396_v18  ;;  %v3437_v21 = vmul.f32 %v3433_v54, %v3402_v33  ;;  %3902 = vmatpush.bf16.msrb.mxu1 %v4613_v11  ;;  %v4617_v33 = vld [vmem:[%s7522_s16 + $0x58] sm:$0xff] }
 0xa24   :  { %v3438_v63 = vmul.f32 %v3433_v54, %v3408_v20  ;;  %v3439_v32 = vmul.f32 %v3433_v54, %v3414_v22  ;;  %v3440_v14 = vmul.f32 %v3433_v54, %v3420_v8  ;;  %v3441_v24 = vmul.f32 %v3433_v54, %v3426_v31  ;;  %3915 = vmatpush.bf16.msrb.mxu2 %v4621_v57  ;;  %v4607_v22 = vld [vmem:[%s7522_s16 + $0x8] sm:$0xff]  ;;  %v4616_v8 = vld [vmem:[%s7522_s16 + $0x50] sm:$0xff]  ;;  %v4606_v31 = vld [vmem:[%s7522_s16] sm:$0xff] }
 0xa25   :  { %v3505_v28 = vpack.c.bf16 %v3434_v25, %v3434_v25  ;;  %v3506_v0 = vpack.c.bf16 %v3435_v15, %v3435_v15  ;;  %v3507_v46 = vpack.c.bf16 %v3436_v17, %v3436_v17  ;;  %v3508_v5 = vpack.c.bf16 %v3437_v21, %v3437_v21  ;;  %v4615_v54 = vld [vmem:[%s7522_s16 + $0x48] sm:$0xff]  ;;  %v4614_v15 = vld [vmem:[%s7522_s16 + $0x40] sm:$0xff] }
 0xa26   :  { %v3509_v4 = vpack.c.bf16 %v3438_v63, %v3438_v63  ;;  %v3510_v56 = vpack.c.bf16 %v3439_v32, %v3439_v32  ;;  %v3511_v37 = vpack.c.bf16 %v3440_v14, %v3440_v14  ;;  %v3512_v47 = vpack.c.bf16 %v3441_v24, %v3441_v24  ;;  %3752 = vmatpush.bf16.msrb.mxu0 %v4384_v58  ;;  %v3758_v17 = vld [vmem:[%s7521_s15] sm:$0x3] }
 0xa27   :  { %v3628_v19 = vunpack.c.l.b16 %v3505_v28  ;;  %v3629_v10 = vunpack.c.l.b16 %v3506_v0  ;;  %v3630_v16 = vunpack.c.l.b16 %v3507_v46  ;;  %v3631_v41 = vunpack.c.l.b16 %v3508_v5  ;;  %3903 = vmatpush.bf16.msrb.mxu1 %v4612_v52 }
 0xa28   :  { %v3632_v26 = vunpack.c.l.b16 %v3509_v4  ;;  %v3633_v1 = vunpack.c.l.b16 %v3510_v56  ;;  %v3634_v9 = vunpack.c.l.b16 %v3511_v37  ;;  %v3635_v50 = vunpack.c.l.b16 %v3512_v47  ;;  %3916 = vmatpush.bf16.msrb.mxu2 %v4620_v35 }
 0xa29   :  { %v3637_v36 = vsel %vm3636_vm14, %v3629_v10, %v3628_v19  ;;  %v3760_v21 = vperm.slane %v3758_v17, 0  ;;  %v3761_v28 = vperm.slane %v3758_v17, 1 }
 0xa2a   :  { %v3639_v49 = vsel %vm3638_vm15, %v3630_v16, %v3637_v36  ;;  %v5000_v16 = vld [vmem:[%s7523_s17] ss:$0 sm:$0xff] }
 0xa2b   :  { %v3641_v42 = vsel %vm3640_vm1, %v3631_v41, %v3639_v49  ;;  %3904 = vmatpush.bf16.msrb.mxu1 %v4611_v34 }
 0xa2c   :  { %v3643_v43 = vsel %vm3642_vm2, %v3632_v26, %v3641_v42  ;;  %3917 = vmatpush.bf16.msrb.mxu2 %v4619_v2 }
 0xa2d   :  { %v3645_v39 = vsel %vm3644_vm3, %v3633_v1, %v3643_v43 }
 0xa2e   :  { %v3647_v23 = vsel %vm3646_vm4, %v3634_v9, %v3645_v39 }
 0xa2f   :  { %v3649_v30 = vsel %vm3648_vm5, %v3635_v50, %v3647_v23  ;;  %3905 = vmatpush.bf16.msrb.mxu1 %v4610_v13 }
 0xa30   :  { %v3650_v38 = vpack.c.b16 %v3649_v30, %v3649_v30  ;;  %3918 = vmatpush.bf16.msrb.mxu2 %v4618_v6 }
 0xa32   :  { %3740 = vmatmul.bf16.vlgmr.msra.gmra.mxu3 %v3650_v38  ;;  %3753 = vmatmul.bf16.vlgmr.msrb.gmra.mxu0 %v3650_v38 }
 0xa33   :  { %3906 = vmatpush.bf16.msrb.mxu1 %v4609_v48 }
 0xa34   :  { %3919 = vmatpush.bf16.msrb.mxu2 %v4617_v33 }
 0xa37   :  { %3907 = vmatpush.bf16.msrb.mxu1 %v4608_v45 }
 0xa38   :  { %3920 = vmatpush.bf16.msrb.mxu2 %v4616_v8 }
 0xa3b   :  { %3908 = vmatpush.bf16.msrb.mxu1 %v4607_v22 }
 0xa3c   :  { %3921 = vmatpush.bf16.msrb.mxu2 %v4615_v54 }
 0xa3f   :  { %3909 = vmatpush.bf16.msrb.mxu1 %v4606_v31 }
 0xa40   :  { %3922 = vmatpush.bf16.msrb.mxu2 %v4614_v15 }
 0xa86   :  { %v3469_v51 = vpop.f32.mrf.mxu0 }
 0xa87   :  { %v3470_v62 = vadd.f32 %v4999_v59, %v3469_v51 }
 0xa89   :  { %v3513_v53 = vpack.c.bf16 %v3470_v62, %v3470_v62 }
 0xa8b   :  { %3602 = vmatmul.bf16.vlgmr.msra.gmra.mxu1 %v3513_v53  ;;  %3615 = vmatmul.bf16.vlgmr.msra.gmra.mxu2 %v3513_v53 }
 0xa8e   :  { %v3471_v29 = vpop.f32.mrf.mxu0 }
 0xaaf   :  { %v3754_v18 = vpop.f32.mrf.mxu0 }
 0xab5   :  { %v3741_v20 = vpop.f32.mrf.mxu3 }
 0xab7   :  { %v3756_v44 = vpop.f32.mrf.mxu0 }
 0xabd   :  { %v3743_v25 = vpop.f32.mrf.mxu3 }
 0xb08   :  { %v3603_v63 = vpop.f32.mrf.mxu1 }
 0xb09   :  { %v3742_v32 = vadd.f32 %v3741_v20, %v3603_v63 }
 0xb0b   :  { %v3764_v14 = vadd.f32 %v3760_v21, %v3742_v32 }
 0xb0d   :  { %v3766_v24 = vmax.f32 %v3764_v14, 0.0 }
 0xb0e   :  { %v3616_v0 = vpop.f32.mrf.mxu2 }
 0xb0f   :  { %v3768_v46 = vpack.c.bf16 %v3766_v24, %v3766_v24  ;;  %v3755_v5 = vadd.f32 %v3754_v18, %v3616_v0 }
 0xb10   :  { %v3605_v4 = vpop.f32.mrf.mxu1 }
 0xb11   :  { %v3765_v56 = vadd.f32 %v3761_v28, %v3755_v5  ;;  %3910 = vmatmul.bf16.vlgmr.msrb.gmra.mxu1 %v3768_v46 }
 0xb13   :  { %v3767_v37 = vmax.f32 %v3765_v56, 0.0 }
 0xb15   :  { %v3769_v47 = vpack.c.bf16 %v3767_v37, %v3767_v37 }
 0xb16   :  { %v3618_v19 = vpop.f32.mrf.mxu2 }
 0xb17   :  { %3923 = vmatmul.bf16.vlgmr.msrb.gmra.mxu2 %v3769_v47 }
 0xb8e   :  { %v3911_v10 = vpop.f32.mrf.mxu1 }
 0xb8f   :  { %v3912_v26 = vadd.f32 %v5000_v16, %v3911_v10 }
 0xb96   :  { %v3913_v41 = vpop.f32.mrf.mxu1 }
 0xb9a   :  { %v3924_v1 = vpop.f32.mrf.mxu2 }
 0xb9b   :  { %v3925_v36 = vadd.f32 %v3924_v1, %v3912_v26 }
 0xb9d   :  { %3928 = vst [vmem:[%s7524_s18] sm:$0xff] %v3925_v36 }
 0xba2   :  { %v3926_v9 = vpop.f32.mrf.mxu2 }

</bundles_post_ra>
